<compile_context>
chip_gen: v5e
topology: v5e:2x2
jax: 0.10.0
libtpu: 0.0.40
codegen_flags: <defaults>
</compile_context>

<pallas_src>
import jax
import jax.numpy as jnp
from jax.experimental import pallas as pl
from jax.experimental.pallas import tpu as pltpu

EPS = 1e-5  # nn.InstanceNorm2d default (affine=False, biased variance)


def _round_up(v, m):
    return (v + m - 1) // m * m


# ---------------------------------------------------------------------------
# Fused MaxPool + DoubleConv kernel (one batch image per grid step)
# ---------------------------------------------------------------------------
def _make_down_kernel(hp, wp, wcols, cin, cout, cp, k1, k2):
    L = hp * wcols                      # rows of the flattened output grid
    TOP = wcols + 8                     # 8-aligned start of the valid region
    RF = L + 2 * wcols + 16             # rows of the flattened padded image
    inv_hw = 1.0 / (hp * wp)            # number of *valid* output pixels
    # output row r reads padded-grid flat row r + offs[3*dy + dx]
    offs = [7 + dy * wcols + dx for dy in range(3) for dx in range(3)]
    f32, bf16 = jnp.float32, jnp.bfloat16

    def kernel(x_ref, w1_ref, w2_ref, m_ref, o_ref,
               xin_ref, p1_ref, p2_ref, mid_ref):
        # x_ref : (1, RF, 4*Cin) bf16  zero-padded grid, 4 pool candidates on lanes
        # w1    : (K1, CP) bf16  dense (9*Cin, Cout) conv1 weight, zero padded
        # w2    : (K2, CP) bf16  dense (9*Cout, Cout) conv2 weight, zero padded
        # m_ref : (L, 1)  f32    1.0 on the valid columns of the output grid
        # o_ref : (1, L, CP) f32 second ConvINRelu output (lane-dense slab)
        mask = m_ref[...]

        # ---- fused MaxPool2d(2): elementwise max of the 4 pool candidates ----
        xall = x_ref[0]                                        # (RF, 4*Cin)
        pooled = jnp.maximum(
            jnp.maximum(xall[:, 0 * cin:1 * cin], xall[:, 1 * cin:2 * cin]),
            jnp.maximum(xall[:, 2 * cin:3 * cin], xall[:, 3 * cin:4 * cin]))
        xin_ref[...] = pooled.astype(f32)       # pooled, zero-bordered image

        def conv_in_relu(src_ref, c, kk, p_ref, w_ref):
            # dense-K im2col: tap t -> patch columns [t*c, (t+1)*c)
            if kk > 9 * c:                      # zero only the K-pad tail
                p_ref[:, 9 * c:] = jnp.zeros((L, kk - 9 * c), bf16)
            for t, off in enumerate(offs):
                p_ref[:, t * c:(t + 1) * c] = src_ref[off:off + L, :c].astype(bf16)
            # single MXU matmul: bf16 operands, f32 accumulation
            y = jnp.dot(p_ref[...], w_ref[...], preferred_element_type=f32)
            # masked two-pass InstanceNorm (biased variance) + ReLU
            mu = jnp.sum(y * mask, axis=0, keepdims=True) * inv_hw
            yc = (y - mu) * mask
            var = jnp.sum(yc * yc, axis=0, keepdims=True) * inv_hw
            y = (y - mu) * jax.lax.rsqrt(var + EPS)
            return jnp.maximum(y, 0.0) * mask   # ReLU + zero the slack columns

        # ---- conv1 + IN + ReLU (taps from the pooled padded input) -----------
        out1 = conv_in_relu(xin_ref, cin, k1, p1_ref, w1_ref)   # (L, CP)

        # ---- hand off through a zero-bordered VMEM buffer ---------------------
        # only the small border strips are re-zeroed per step (8-aligned stores);
        # the valid region is fully overwritten and slack columns are masked out.
        mid_ref[0:TOP, :] = jnp.zeros((TOP, cp), f32)
        mid_ref[TOP:TOP + L, :] = out1
        mid_ref[TOP + L:RF, :] = jnp.zeros((RF - TOP - L, cp), f32)

        # ---- conv2 + IN + ReLU (taps from the VMEM intermediate) --------------
        o_ref[0] = conv_in_relu(mid_ref, cout, k2, p2_ref, w2_ref)

    return kernel


# ---------------------------------------------------------------------------
# Wrapper: Down.forward (NCHW in / NCHW out)
# ---------------------------------------------------------------------------
@jax.jit
def down_forward(x_nchw, params):
    w1, b1, w2, b2 = params          # biases cancel under InstanceNorm -> unused
    del b1, b2
    f32, bf16 = jnp.float32, jnp.bfloat16
    n, cin, h, w = x_nchw.shape
    assert h % 2 == 0 and w % 2 == 0, "MaxPool2d(2) path assumes even H, W"
    cout = w1.shape[-1]
    hp, wp = h // 2, w // 2
    wcols = _round_up(wp + 2, 8)     # padded grid width, sublane aligned
    L = hp * wcols
    TOP = wcols + 8
    RF = L + 2 * wcols + 16
    k1 = _round_up(9 * cin, 128)     # dense-packed K, rounded once at the end
    k2 = _round_up(9 * cout, 128)
    cp = _round_up(cout, 128)        # lane-dense matmul N / output slab

    # ---- input: ONE shuffle pass builds the kernel's pooled-grid layout ------
    # (n, RF, 4*Cin) bf16 where flat row TOP + y*wcols + x carries the 2x2 pool
    # window of pooled pixel (y, x); all other rows / slack columns are zero and
    # double as the convolution's SAME padding.  MaxPool itself runs in-kernel.
    # TODO(synk): also fold this NCHW->grouped-layout transpose into the kernel.
    xb = x_nchw.astype(bf16)
    xr = xb.reshape(n, cin, hp, 2, wp, 2)
    xr = jnp.transpose(xr, (0, 2, 4, 3, 5, 1))            # (n, hp, wp, 2, 2, cin)
    xr = xr.reshape(n, hp, wp, 4 * cin)
    xr = jnp.pad(xr, ((0, 0), (0, 0), (0, wcols - wp), (0, 0)))
    xr = xr.reshape(n, L, 4 * cin)
    xr = jnp.pad(xr, ((0, 0), (TOP, RF - TOP - L), (0, 0)))   # (n, RF, 4*cin)

    # conv weights: dense tap-major rows (t*C + ci), zero-padded to (K, CP)
    w1p = jnp.zeros((k1, cp), f32).at[:9 * cin, :cout].set(
        w1.reshape(9 * cin, cout)).astype(bf16)
    w2p = jnp.zeros((k2, cp), f32).at[:9 * cout, :cout].set(
        w2.reshape(9 * cout, cout)).astype(bf16)

    # 1.0 on the wp valid columns of every (wcols)-wide row of the output grid
    maskf = ((jnp.arange(L) % wcols) < wp).astype(f32).reshape(L, 1)

    # ---- generation-aware VMEM budget ----------------------------------------
    def _pad2(r, c, itemsize):
        return _round_up(r, 8) * _round_up(c, 128) * itemsize

    vmem_est = (
        2 * _pad2(RF, 4 * cin, 2)                 # input block (double-buffered)
        + 2 * _pad2(k1, cp, 2) + 2 * _pad2(k2, cp, 2)   # weights
        + 2 * _pad2(L, 1, 4)                      # mask
        + 2 * _pad2(L, cp, 4)                     # output block (double-buffered)
        + _pad2(RF, cin, 4)                       # pooled-input scratch
        + _pad2(L, k1, 2) + _pad2(L, k2, 2)       # dense-K patch scratches
        + _pad2(RF, cp, 4)                        # conv1->conv2 handoff buffer
    )
    vmem_cap = 64 << 20                           # v7x floor (64 MiB per core)
    try:
        vmem_cap = int(pltpu.get_tpu_info().vmem_capacity_bytes)
    except Exception:
        pass
    assert vmem_est < (vmem_cap * 4) // 5, (
        f"per-step VMEM {vmem_est / 2**20:.1f} MiB exceeds this TPU's budget "
        f"({vmem_cap / 2**20:.0f} MiB): tile the spatial axis")
    # TODO(synk): add a "parallel" row-tile grid axis (with conv halo) so large
    #             images fit and small batches feed both v7x TensorCores.
    # TODO(synk): single-buffer the grid-invariant operands (weights/mask) via
    #             pipeline_mode=pl.Buffered(1) once that path is reliable.

    kernel = _make_down_kernel(hp, wp, wcols, cin, cout, cp, k1, k2)
    out_flat = pl.pallas_call(
        kernel,
        out_shape=jax.ShapeDtypeStruct((n, L, cp), f32),
        grid=(n,),
        in_specs=[
            pl.BlockSpec((1, RF, 4 * cin), lambda i: (i, 0, 0)),
            pl.BlockSpec((k1, cp), lambda i: (0, 0)),
            pl.BlockSpec((k2, cp), lambda i: (0, 0)),
            pl.BlockSpec((L, 1), lambda i: (0, 0)),
        ],
        out_specs=pl.BlockSpec((1, L, cp), lambda i: (i, 0, 0)),
        scratch_shapes=[
            pltpu.VMEM((RF, cin), f32),           # pooled, zero-bordered input
            pltpu.VMEM((L, k1), jnp.bfloat16),    # conv1 dense-K patch matrix
            pltpu.VMEM((L, k2), jnp.bfloat16),    # conv2 dense-K patch matrix
            pltpu.VMEM((RF, cp), f32),            # zero-bordered conv1 output
        ],
        compiler_params=pltpu.CompilerParams(
            dimension_semantics=("parallel",),
            vmem_limit_bytes=int(min(vmem_cap, max(vmem_est + (8 << 20), 32 << 20))),
        ),
    )(xr, w1p, w2p, maskf)

    out = out_flat.reshape(n, hp, wcols, cp)[:, :, :wp, :cout]
    return jnp.transpose(out, (0, 3, 1, 2))                      # NHWC -> NCHW


# ---------------------------------------------------------------------------
# Pure-JAX reference (same bf16 conv-operand policy, f32 accumulation)
# ---------------------------------------------------------------------------
def reference_forward(x_nchw, params):
    w1, b1, w2, b2 = params
    f32, bf16 = jnp.float32, jnp.bfloat16
    x = jnp.transpose(x_nchw, (0, 2, 3, 1)).astype(f32)
    n, h, w, c = x.shape
    xp = x.reshape(n, h // 2, 2, w // 2, 2, c).max(axis=(2, 4))   # MaxPool2d(2)

    def conv_in_relu(inp, wgt, bias):
        y = jax.lax.conv_general_dilated(
            inp.astype(bf16).astype(f32), wgt.astype(bf16).astype(f32),
            (1, 1), "SAME", dimension_numbers=("NHWC", "HWIO", "NHWC"),
            precision=jax.lax.Precision.HIGHEST)
        y = y + bias
        mu = y.mean(axis=(1, 2), keepdims=True)
        var = ((y - mu) ** 2).mean(axis=(1, 2), keepdims=True)
        return jnp.maximum((y - mu) * jax.lax.rsqrt(var + EPS), 0.0)

    o1 = conv_in_relu(xp, w1, b1)
    o2 = conv_in_relu(o1, w2, b2)
    return jnp.transpose(o2, (0, 3, 1, 2))


def make_params(key, cin, cout):
    ks = jax.random.split(key, 4)
    w1 = 0.1 * jax.random.normal(ks[0], (3, 3, cin, cout), jnp.float32)   # HWIO
    b1 = 0.05 * jax.random.normal(ks[1], (cout,), jnp.float32)
    w2 = 0.1 * jax.random.normal(ks[2], (3, 3, cout, cout), jnp.float32)
    b2 = 0.05 * jax.random.normal(ks[3], (cout,), jnp.float32)
    return w1, b1, w2, b2


if __name__ == "__main__":
    # Down(in_channels=4, out_channels=32) on a (2, 4, 16, 16) NCHW input.
    N, CIN, COUT, H, W = 2, 4, 32, 16, 16
    key = jax.random.PRNGKey(0)
    kx, kp = jax.random.split(key)
    x = jax.random.normal(kx, (N, CIN, H, W), jnp.float32)
    params = make_params(kp, CIN, COUT)

    out = jax.block_until_ready(down_forward(x, params))
    ref = jax.block_until_ready(reference_forward(x, params))

    assert out.shape == (N, COUT, H // 2, W // 2), out.shape
    max_err = float(jnp.max(jnp.abs(out - ref)))
    assert jnp.allclose(out, ref, atol=5e-3, rtol=5e-3), max_err
    print("KERNEL_OK")
</pallas_src>

<mosaic_0001>
module attributes {stable_mosaic.version = 11 : i64} {
  func.func @kernel(%arg0: i32, %arg1: memref<1x176x16xbf16, #tpu.memory_space<vmem>>, %arg2: memref<128x128xbf16, #tpu.memory_space<vmem>>, %arg3: memref<384x128xbf16, #tpu.memory_space<vmem>>, %arg4: memref<128x1xf32, #tpu.memory_space<vmem>>, %arg5: memref<1x128x128xf32, #tpu.memory_space<vmem>>, %arg6: memref<176x4xf32, #tpu.memory_space<vmem>>, %arg7: memref<128x128xbf16, #tpu.memory_space<vmem>>, %arg8: memref<128x384xbf16, #tpu.memory_space<vmem>>, %arg9: memref<176x128xf32, #tpu.memory_space<vmem>>) attributes {dimension_semantics = [#tpu.dimension_semantics<parallel>], iteration_bounds = array<i64: 2>, scalar_prefetch = 0 : i64, scratch_operands = 4 : i64, tpu.core_type = #tpu.core_type<tc>, window_params = [{transform_indices = @transform_0, window_bounds = array<i64: 1, 176, 16>}, {pipeline_mode = #tpu.pipeline_mode<synchronous>, transform_indices = @transform_1, window_bounds = array<i64: 128, 128>}, {pipeline_mode = #tpu.pipeline_mode<synchronous>, transform_indices = @transform_2, window_bounds = array<i64: 384, 128>}, {pipeline_mode = #tpu.pipeline_mode<synchronous>, transform_indices = @transform_3, window_bounds = array<i64: 128, 1>}, {transform_indices = @transform_4, window_bounds = array<i64: 1, 128, 128>}]} {
    %c0 = arith.constant 0 : index
    %c0_0 = arith.constant 0 : index
    %0 = vector.load %arg4[%c0, %c0_0] : memref<128x1xf32, #tpu.memory_space<vmem>>, vector<128x1xf32>
    %c0_1 = arith.constant 0 : index
    %c0_2 = arith.constant 0 : index
    %c0_3 = arith.constant 0 : index
    %1 = vector.load %arg1[%c0_1, %c0_2, %c0_3] : memref<1x176x16xbf16, #tpu.memory_space<vmem>>, vector<1x176x16xbf16>
    %2 = vector.shape_cast %1 : vector<1x176x16xbf16> to vector<176x16xbf16>
    %3 = vector.extract_strided_slice %2 {offsets = [0, 0], sizes = [176, 4], strides = [1, 1]} : vector<176x16xbf16> to vector<176x4xbf16>
    %4 = vector.extract_strided_slice %2 {offsets = [0, 4], sizes = [176, 4], strides = [1, 1]} : vector<176x16xbf16> to vector<176x4xbf16>
    %5 = arith.maximumf %3, %4 : vector<176x4xbf16>
    %6 = vector.extract_strided_slice %2 {offsets = [0, 8], sizes = [176, 4], strides = [1, 1]} : vector<176x16xbf16> to vector<176x4xbf16>
    %7 = vector.extract_strided_slice %2 {offsets = [0, 12], sizes = [176, 4], strides = [1, 1]} : vector<176x16xbf16> to vector<176x4xbf16>
    %8 = arith.maximumf %6, %7 : vector<176x4xbf16>
    %9 = arith.maximumf %5, %8 : vector<176x4xbf16>
    %10 = arith.extf %9 : vector<176x4xbf16> to vector<176x4xf32>
    %c0_4 = arith.constant 0 : index
    %c0_5 = arith.constant 0 : index
    %11 = vector.load %arg6[%c0_4, %c0_5] : memref<176x4xf32, #tpu.memory_space<vmem>>, vector<176x4xf32>
    tpu.vector_store %arg6[%c0_4, %c0_5], %10 {strides = array<i32>} : memref<176x4xf32, #tpu.memory_space<vmem>>, vector<176x4xf32>,
    %cst = arith.constant 0.000000e+00 : bf16
    %12 = vector.broadcast %cst : bf16 to vector<128x92xbf16>
    %c0_6 = arith.constant 0 : index
    %c36 = arith.constant 36 : index
    %13 = vector.load %arg7[%c0_6, %c36] : memref<128x128xbf16, #tpu.memory_space<vmem>>, vector<128x92xbf16>
    tpu.vector_store %arg7[%c0_6, %c36], %12 {strides = array<i32>} : memref<128x128xbf16, #tpu.memory_space<vmem>>, vector<128x92xbf16>,
    %c7 = arith.constant 7 : index
    %c0_7 = arith.constant 0 : index
    %14 = vector.load %arg6[%c7, %c0_7] : memref<176x4xf32, #tpu.memory_space<vmem>>, vector<128x4xf32>
    %15 = arith.truncf %14 : vector<128x4xf32> to vector<128x4xbf16>
    %c0_8 = arith.constant 0 : index
    %c0_9 = arith.constant 0 : index
    %16 = vector.load %arg7[%c0_8, %c0_9] : memref<128x128xbf16, #tpu.memory_space<vmem>>, vector<128x4xbf16>
    tpu.vector_store %arg7[%c0_8, %c0_9], %15 {strides = array<i32>} : memref<128x128xbf16, #tpu.memory_space<vmem>>, vector<128x4xbf16>,
    %c8 = arith.constant 8 : index
    %c0_10 = arith.constant 0 : index
    %17 = vector.load %arg6[%c8, %c0_10] : memref<176x4xf32, #tpu.memory_space<vmem>>, vector<128x4xf32>
    %18 = arith.truncf %17 : vector<128x4xf32> to vector<128x4xbf16>
    %c0_11 = arith.constant 0 : index
    %c4 = arith.constant 4 : index
    %19 = vector.load %arg7[%c0_11, %c4] : memref<128x128xbf16, #tpu.memory_space<vmem>>, vector<128x4xbf16>
    tpu.vector_store %arg7[%c0_11, %c4], %18 {strides = array<i32>} : memref<128x128xbf16, #tpu.memory_space<vmem>>, vector<128x4xbf16>,
    %c9 = arith.constant 9 : index
    %c0_12 = arith.constant 0 : index
    %20 = vector.load %arg6[%c9, %c0_12] : memref<176x4xf32, #tpu.memory_space<vmem>>, vector<128x4xf32>
    %21 = arith.truncf %20 : vector<128x4xf32> to vector<128x4xbf16>
    %c0_13 = arith.constant 0 : index
    %c8_14 = arith.constant 8 : index
    %22 = vector.load %arg7[%c0_13, %c8_14] : memref<128x128xbf16, #tpu.memory_space<vmem>>, vector<128x4xbf16>
    tpu.vector_store %arg7[%c0_13, %c8_14], %21 {strides = array<i32>} : memref<128x128xbf16, #tpu.memory_space<vmem>>, vector<128x4xbf16>,
    %c23 = arith.constant 23 : index
    %c0_15 = arith.constant 0 : index
    %23 = vector.load %arg6[%c23, %c0_15] : memref<176x4xf32, #tpu.memory_space<vmem>>, vector<128x4xf32>
    %24 = arith.truncf %23 : vector<128x4xf32> to vector<128x4xbf16>
    %c0_16 = arith.constant 0 : index
    %c12 = arith.constant 12 : index
    %25 = vector.load %arg7[%c0_16, %c12] : memref<128x128xbf16, #tpu.memory_space<vmem>>, vector<128x4xbf16>
    tpu.vector_store %arg7[%c0_16, %c12], %24 {strides = array<i32>} : memref<128x128xbf16, #tpu.memory_space<vmem>>, vector<128x4xbf16>,
    %c24 = arith.constant 24 : index
    %c0_17 = arith.constant 0 : index
    %26 = vector.load %arg6[%c24, %c0_17] : memref<176x4xf32, #tpu.memory_space<vmem>>, vector<128x4xf32>
    %27 = arith.truncf %26 : vector<128x4xf32> to vector<128x4xbf16>
    %c0_18 = arith.constant 0 : index
    %c16 = arith.constant 16 : index
    %28 = vector.load %arg7[%c0_18, %c16] : memref<128x128xbf16, #tpu.memory_space<vmem>>, vector<128x4xbf16>
    tpu.vector_store %arg7[%c0_18, %c16], %27 {strides = array<i32>} : memref<128x128xbf16, #tpu.memory_space<vmem>>, vector<128x4xbf16>,
    %c25 = arith.constant 25 : index
    %c0_19 = arith.constant 0 : index
    %29 = vector.load %arg6[%c25, %c0_19] : memref<176x4xf32, #tpu.memory_space<vmem>>, vector<128x4xf32>
    %30 = arith.truncf %29 : vector<128x4xf32> to vector<128x4xbf16>
    %c0_20 = arith.constant 0 : index
    %c20 = arith.constant 20 : index
    %31 = vector.load %arg7[%c0_20, %c20] : memref<128x128xbf16, #tpu.memory_space<vmem>>, vector<128x4xbf16>
    tpu.vector_store %arg7[%c0_20, %c20], %30 {strides = array<i32>} : memref<128x128xbf16, #tpu.memory_space<vmem>>, vector<128x4xbf16>,
    %c39 = arith.constant 39 : index
    %c0_21 = arith.constant 0 : index
    %32 = vector.load %arg6[%c39, %c0_21] : memref<176x4xf32, #tpu.memory_space<vmem>>, vector<128x4xf32>
    %33 = arith.truncf %32 : vector<128x4xf32> to vector<128x4xbf16>
    %c0_22 = arith.constant 0 : index
    %c24_23 = arith.constant 24 : index
    %34 = vector.load %arg7[%c0_22, %c24_23] : memref<128x128xbf16, #tpu.memory_space<vmem>>, vector<128x4xbf16>
    tpu.vector_store %arg7[%c0_22, %c24_23], %33 {strides = array<i32>} : memref<128x128xbf16, #tpu.memory_space<vmem>>, vector<128x4xbf16>,
    %c40 = arith.constant 40 : index
    %c0_24 = arith.constant 0 : index
    %35 = vector.load %arg6[%c40, %c0_24] : memref<176x4xf32, #tpu.memory_space<vmem>>, vector<128x4xf32>
    %36 = arith.truncf %35 : vector<128x4xf32> to vector<128x4xbf16>
    %c0_25 = arith.constant 0 : index
    %c28 = arith.constant 28 : index
    %37 = vector.load %arg7[%c0_25, %c28] : memref<128x128xbf16, #tpu.memory_space<vmem>>, vector<128x4xbf16>
    tpu.vector_store %arg7[%c0_25, %c28], %36 {strides = array<i32>} : memref<128x128xbf16, #tpu.memory_space<vmem>>, vector<128x4xbf16>,
    %c41 = arith.constant 41 : index
    %c0_26 = arith.constant 0 : index
    %38 = vector.load %arg6[%c41, %c0_26] : memref<176x4xf32, #tpu.memory_space<vmem>>, vector<128x4xf32>
    %39 = arith.truncf %38 : vector<128x4xf32> to vector<128x4xbf16>
    %c0_27 = arith.constant 0 : index
    %c32 = arith.constant 32 : index
    %40 = vector.load %arg7[%c0_27, %c32] : memref<128x128xbf16, #tpu.memory_space<vmem>>, vector<128x4xbf16>
    tpu.vector_store %arg7[%c0_27, %c32], %39 {strides = array<i32>} : memref<128x128xbf16, #tpu.memory_space<vmem>>, vector<128x4xbf16>,
    %c0_28 = arith.constant 0 : index
    %c0_29 = arith.constant 0 : index
    %41 = vector.load %arg7[%c0_28, %c0_29] : memref<128x128xbf16, #tpu.memory_space<vmem>>, vector<128x128xbf16>
    %c0_30 = arith.constant 0 : index
    %c0_31 = arith.constant 0 : index
    %42 = vector.load %arg2[%c0_30, %c0_31] : memref<128x128xbf16, #tpu.memory_space<vmem>>, vector<128x128xbf16>
    %cst_32 = arith.constant dense<0.000000e+00> : vector<128x128xf32>
    %43 = tpu.matmul %41, %42, %cst_32 {dimension_numbers = #tpu.dot_dimension_numbers<[1], [0], [0], [1], [0, 0, 1, 1], [], []>} : vector<128x128xbf16>, vector<128x128xbf16>, vector<128x128xf32> -> vector<128x128xf32>
    %44 = vector.broadcast %0 : vector<128x1xf32> to vector<128x128xf32>
    %45 = arith.mulf %43, %44 : vector<128x128xf32>
    %cst_33 = arith.constant dense<0.000000e+00> : vector<128xf32>
    %46 = vector.multi_reduction <add>, %45, %cst_33 [0] : vector<128x128xf32> to vector<128xf32>
    %47 = vector.shape_cast %46 : vector<128xf32> to vector<1x128xf32>
    %cst_34 = arith.constant 1.562500e-02 : f32
    %48 = vector.broadcast %cst_34 : f32 to vector<1x128xf32>
    %49 = arith.mulf %47, %48 : vector<1x128xf32>
    %50 = vector.broadcast %49 : vector<1x128xf32> to vector<128x128xf32>
    %51 = arith.subf %43, %50 : vector<128x128xf32>
    %52 = vector.broadcast %0 : vector<128x1xf32> to vector<128x128xf32>
    %53 = arith.mulf %51, %52 : vector<128x128xf32>
    %54 = arith.mulf %53, %53 : vector<128x128xf32>
    %cst_35 = arith.constant dense<0.000000e+00> : vector<128xf32>
    %55 = vector.multi_reduction <add>, %54, %cst_35 [0] : vector<128x128xf32> to vector<128xf32>
    %56 = vector.shape_cast %55 : vector<128xf32> to vector<1x128xf32>
    %cst_36 = arith.constant 1.562500e-02 : f32
    %57 = vector.broadcast %cst_36 : f32 to vector<1x128xf32>
    %58 = arith.mulf %56, %57 : vector<1x128xf32>
    %59 = vector.broadcast %49 : vector<1x128xf32> to vector<128x128xf32>
    %60 = arith.subf %43, %59 : vector<128x128xf32>
    %cst_37 = arith.constant 9.99999974E-6 : f32
    %61 = vector.broadcast %cst_37 : f32 to vector<1x128xf32>
    %62 = arith.addf %58, %61 : vector<1x128xf32>
    %63 = math.rsqrt %62 : vector<1x128xf32>
    %64 = vector.broadcast %63 : vector<1x128xf32> to vector<128x128xf32>
    %65 = arith.mulf %60, %64 : vector<128x128xf32>
    %cst_38 = arith.constant 0.000000e+00 : f32
    %66 = vector.broadcast %cst_38 : f32 to vector<128x128xf32>
    %67 = arith.maximumf %65, %66 : vector<128x128xf32>
    %68 = vector.broadcast %0 : vector<128x1xf32> to vector<128x128xf32>
    %69 = arith.mulf %67, %68 : vector<128x128xf32>
    %cst_39 = arith.constant 0.000000e+00 : f32
    %70 = vector.broadcast %cst_39 : f32 to vector<24x128xf32>
    %c0_40 = arith.constant 0 : index
    %c0_41 = arith.constant 0 : index
    %71 = vector.load %arg9[%c0_40, %c0_41] : memref<176x128xf32, #tpu.memory_space<vmem>>, vector<24x128xf32>
    tpu.vector_store %arg9[%c0_40, %c0_41], %70 {strides = array<i32>} : memref<176x128xf32, #tpu.memory_space<vmem>>, vector<24x128xf32>,
    %c24_42 = arith.constant 24 : index
    %c0_43 = arith.constant 0 : index
    %72 = vector.load %arg9[%c24_42, %c0_43] : memref<176x128xf32, #tpu.memory_space<vmem>>, vector<128x128xf32>
    tpu.vector_store %arg9[%c24_42, %c0_43], %69 {strides = array<i32>} : memref<176x128xf32, #tpu.memory_space<vmem>>, vector<128x128xf32>,
    %cst_44 = arith.constant 0.000000e+00 : f32
    %73 = vector.broadcast %cst_44 : f32 to vector<24x128xf32>
    %c152 = arith.constant 152 : index
    %c0_45 = arith.constant 0 : index
    %74 = vector.load %arg9[%c152, %c0_45] : memref<176x128xf32, #tpu.memory_space<vmem>>, vector<24x128xf32>
    tpu.vector_store %arg9[%c152, %c0_45], %73 {strides = array<i32>} : memref<176x128xf32, #tpu.memory_space<vmem>>, vector<24x128xf32>,
    %cst_46 = arith.constant 0.000000e+00 : bf16
    %75 = vector.broadcast %cst_46 : bf16 to vector<128x96xbf16>
    %c0_47 = arith.constant 0 : index
    %c288 = arith.constant 288 : index
    %76 = vector.load %arg8[%c0_47, %c288] : memref<128x384xbf16, #tpu.memory_space<vmem>>, vector<128x96xbf16>
    tpu.vector_store %arg8[%c0_47, %c288], %75 {strides = array<i32>} : memref<128x384xbf16, #tpu.memory_space<vmem>>, vector<128x96xbf16>,
    %c7_48 = arith.constant 7 : index
    %c0_49 = arith.constant 0 : index
    %77 = vector.load %arg9[%c7_48, %c0_49] : memref<176x128xf32, #tpu.memory_space<vmem>>, vector<128x32xf32>
    %78 = arith.truncf %77 : vector<128x32xf32> to vector<128x32xbf16>
    %c0_50 = arith.constant 0 : index
    %c0_51 = arith.constant 0 : index
    %79 = vector.load %arg8[%c0_50, %c0_51] : memref<128x384xbf16, #tpu.memory_space<vmem>>, vector<128x32xbf16>
    tpu.vector_store %arg8[%c0_50, %c0_51], %78 {strides = array<i32>} : memref<128x384xbf16, #tpu.memory_space<vmem>>, vector<128x32xbf16>,
    %c8_52 = arith.constant 8 : index
    %c0_53 = arith.constant 0 : index
    %80 = vector.load %arg9[%c8_52, %c0_53] : memref<176x128xf32, #tpu.memory_space<vmem>>, vector<128x32xf32>
    %81 = arith.truncf %80 : vector<128x32xf32> to vector<128x32xbf16>
    %c0_54 = arith.constant 0 : index
    %c32_55 = arith.constant 32 : index
    %82 = vector.load %arg8[%c0_54, %c32_55] : memref<128x384xbf16, #tpu.memory_space<vmem>>, vector<128x32xbf16>
    tpu.vector_store %arg8[%c0_54, %c32_55], %81 {strides = array<i32>} : memref<128x384xbf16, #tpu.memory_space<vmem>>, vector<128x32xbf16>,
    %c9_56 = arith.constant 9 : index
    %c0_57 = arith.constant 0 : index
    %83 = vector.load %arg9[%c9_56, %c0_57] : memref<176x128xf32, #tpu.memory_space<vmem>>, vector<128x32xf32>
    %84 = arith.truncf %83 : vector<128x32xf32> to vector<128x32xbf16>
    %c0_58 = arith.constant 0 : index
    %c64 = arith.constant 64 : index
    %85 = vector.load %arg8[%c0_58, %c64] : memref<128x384xbf16, #tpu.memory_space<vmem>>, vector<128x32xbf16>
    tpu.vector_store %arg8[%c0_58, %c64], %84 {strides = array<i32>} : memref<128x384xbf16, #tpu.memory_space<vmem>>, vector<128x32xbf16>,
    %c23_59 = arith.constant 23 : index
    %c0_60 = arith.constant 0 : index
    %86 = vector.load %arg9[%c23_59, %c0_60] : memref<176x128xf32, #tpu.memory_space<vmem>>, vector<128x32xf32>
    %87 = arith.truncf %86 : vector<128x32xf32> to vector<128x32xbf16>
    %c0_61 = arith.constant 0 : index
    %c96 = arith.constant 96 : index
    %88 = vector.load %arg8[%c0_61, %c96] : memref<128x384xbf16, #tpu.memory_space<vmem>>, vector<128x32xbf16>
    tpu.vector_store %arg8[%c0_61, %c96], %87 {strides = array<i32>} : memref<128x384xbf16, #tpu.memory_space<vmem>>, vector<128x32xbf16>,
    %c24_62 = arith.constant 24 : index
    %c0_63 = arith.constant 0 : index
    %89 = vector.load %arg9[%c24_62, %c0_63] : memref<176x128xf32, #tpu.memory_space<vmem>>, vector<128x32xf32>
    %90 = arith.truncf %89 : vector<128x32xf32> to vector<128x32xbf16>
    %c0_64 = arith.constant 0 : index
    %c128 = arith.constant 128 : index
    %91 = vector.load %arg8[%c0_64, %c128] : memref<128x384xbf16, #tpu.memory_space<vmem>>, vector<128x32xbf16>
    tpu.vector_store %arg8[%c0_64, %c128], %90 {strides = array<i32>} : memref<128x384xbf16, #tpu.memory_space<vmem>>, vector<128x32xbf16>,
    %c25_65 = arith.constant 25 : index
    %c0_66 = arith.constant 0 : index
    %92 = vector.load %arg9[%c25_65, %c0_66] : memref<176x128xf32, #tpu.memory_space<vmem>>, vector<128x32xf32>
    %93 = arith.truncf %92 : vector<128x32xf32> to vector<128x32xbf16>
    %c0_67 = arith.constant 0 : index
    %c160 = arith.constant 160 : index
    %94 = vector.load %arg8[%c0_67, %c160] : memref<128x384xbf16, #tpu.memory_space<vmem>>, vector<128x32xbf16>
    tpu.vector_store %arg8[%c0_67, %c160], %93 {strides = array<i32>} : memref<128x384xbf16, #tpu.memory_space<vmem>>, vector<128x32xbf16>,
    %c39_68 = arith.constant 39 : index
    %c0_69 = arith.constant 0 : index
    %95 = vector.load %arg9[%c39_68, %c0_69] : memref<176x128xf32, #tpu.memory_space<vmem>>, vector<128x32xf32>
    %96 = arith.truncf %95 : vector<128x32xf32> to vector<128x32xbf16>
    %c0_70 = arith.constant 0 : index
    %c192 = arith.constant 192 : index
    %97 = vector.load %arg8[%c0_70, %c192] : memref<128x384xbf16, #tpu.memory_space<vmem>>, vector<128x32xbf16>
    tpu.vector_store %arg8[%c0_70, %c192], %96 {strides = array<i32>} : memref<128x384xbf16, #tpu.memory_space<vmem>>, vector<128x32xbf16>,
    %c40_71 = arith.constant 40 : index
    %c0_72 = arith.constant 0 : index
    %98 = vector.load %arg9[%c40_71, %c0_72] : memref<176x128xf32, #tpu.memory_space<vmem>>, vector<128x32xf32>
    %99 = arith.truncf %98 : vector<128x32xf32> to vector<128x32xbf16>
    %c0_73 = arith.constant 0 : index
    %c224 = arith.constant 224 : index
    %100 = vector.load %arg8[%c0_73, %c224] : memref<128x384xbf16, #tpu.memory_space<vmem>>, vector<128x32xbf16>
    tpu.vector_store %arg8[%c0_73, %c224], %99 {strides = array<i32>} : memref<128x384xbf16, #tpu.memory_space<vmem>>, vector<128x32xbf16>,
    %c41_74 = arith.constant 41 : index
    %c0_75 = arith.constant 0 : index
    %101 = vector.load %arg9[%c41_74, %c0_75] : memref<176x128xf32, #tpu.memory_space<vmem>>, vector<128x32xf32>
    %102 = arith.truncf %101 : vector<128x32xf32> to vector<128x32xbf16>
    %c0_76 = arith.constant 0 : index
    %c256 = arith.constant 256 : index
    %103 = vector.load %arg8[%c0_76, %c256] : memref<128x384xbf16, #tpu.memory_space<vmem>>, vector<128x32xbf16>
    tpu.vector_store %arg8[%c0_76, %c256], %102 {strides = array<i32>} : memref<128x384xbf16, #tpu.memory_space<vmem>>, vector<128x32xbf16>,
    %c0_77 = arith.constant 0 : index
    %c0_78 = arith.constant 0 : index
    %104 = vector.load %arg8[%c0_77, %c0_78] : memref<128x384xbf16, #tpu.memory_space<vmem>>, vector<128x384xbf16>
    %c0_79 = arith.constant 0 : index
    %c0_80 = arith.constant 0 : index
    %105 = vector.load %arg3[%c0_79, %c0_80] : memref<384x128xbf16, #tpu.memory_space<vmem>>, vector<384x128xbf16>
    %cst_81 = arith.constant dense<0.000000e+00> : vector<128x128xf32>
    %106 = tpu.matmul %104, %105, %cst_81 {dimension_numbers = #tpu.dot_dimension_numbers<[1], [0], [0], [1], [0, 0, 1, 1], [], []>} : vector<128x384xbf16>, vector<384x128xbf16>, vector<128x128xf32> -> vector<128x128xf32>
    %107 = vector.broadcast %0 : vector<128x1xf32> to vector<128x128xf32>
    %108 = arith.mulf %106, %107 : vector<128x128xf32>
    %cst_82 = arith.constant dense<0.000000e+00> : vector<128xf32>
    %109 = vector.multi_reduction <add>, %108, %cst_82 [0] : vector<128x128xf32> to vector<128xf32>
    %110 = vector.shape_cast %109 : vector<128xf32> to vector<1x128xf32>
    %cst_83 = arith.constant 1.562500e-02 : f32
    %111 = vector.broadcast %cst_83 : f32 to vector<1x128xf32>
    %112 = arith.mulf %110, %111 : vector<1x128xf32>
    %113 = vector.broadcast %112 : vector<1x128xf32> to vector<128x128xf32>
    %114 = arith.subf %106, %113 : vector<128x128xf32>
    %115 = vector.broadcast %0 : vector<128x1xf32> to vector<128x128xf32>
    %116 = arith.mulf %114, %115 : vector<128x128xf32>
    %117 = arith.mulf %116, %116 : vector<128x128xf32>
    %cst_84 = arith.constant dense<0.000000e+00> : vector<128xf32>
    %118 = vector.multi_reduction <add>, %117, %cst_84 [0] : vector<128x128xf32> to vector<128xf32>
    %119 = vector.shape_cast %118 : vector<128xf32> to vector<1x128xf32>
    %cst_85 = arith.constant 1.562500e-02 : f32
    %120 = vector.broadcast %cst_85 : f32 to vector<1x128xf32>
    %121 = arith.mulf %119, %120 : vector<1x128xf32>
    %122 = vector.broadcast %112 : vector<1x128xf32> to vector<128x128xf32>
    %123 = arith.subf %106, %122 : vector<128x128xf32>
    %cst_86 = arith.constant 9.99999974E-6 : f32
    %124 = vector.broadcast %cst_86 : f32 to vector<1x128xf32>
    %125 = arith.addf %121, %124 : vector<1x128xf32>
    %126 = math.rsqrt %125 : vector<1x128xf32>
    %127 = vector.broadcast %126 : vector<1x128xf32> to vector<128x128xf32>
    %128 = arith.mulf %123, %127 : vector<128x128xf32>
    %cst_87 = arith.constant 0.000000e+00 : f32
    %129 = vector.broadcast %cst_87 : f32 to vector<128x128xf32>
    %130 = arith.maximumf %128, %129 : vector<128x128xf32>
    %131 = vector.broadcast %0 : vector<128x1xf32> to vector<128x128xf32>
    %132 = arith.mulf %130, %131 : vector<128x128xf32>
    %c0_88 = arith.constant 0 : index
    %c0_89 = arith.constant 0 : index
    %c0_90 = arith.constant 0 : index
    %133 = vector.load %arg5[%c0_88, %c0_89, %c0_90] : memref<1x128x128xf32, #tpu.memory_space<vmem>>, vector<1x128x128xf32>
    %134 = vector.shape_cast %133 : vector<1x128x128xf32> to vector<128x128xf32>
    %135 = vector.shape_cast %132 : vector<128x128xf32> to vector<1x128x128xf32>
    tpu.vector_store %arg5[%c0_88, %c0_89, %c0_90], %135 {strides = array<i32>} : memref<1x128x128xf32, #tpu.memory_space<vmem>>, vector<1x128x128xf32>,
    return
  }
  func.func @transform_0(%arg0: i32) -> (i32, i32, i32) {
    %c0_i32 = arith.constant 0 : i32
    %c0_i32_0 = arith.constant 0 : i32
    %c0_i32_1 = arith.constant 0 : i32
    return %arg0, %c0_i32, %c0_i32_0 : i32, i32, i32
  }
  func.func @transform_1(%arg0: i32) -> (i32, i32) {
    %c0_i32 = arith.constant 0 : i32
    %c0_i32_0 = arith.constant 0 : i32
    %c0_i32_1 = arith.constant 0 : i32
    return %c0_i32, %c0_i32_0 : i32, i32
  }
  func.func @transform_2(%arg0: i32) -> (i32, i32) {
    %c0_i32 = arith.constant 0 : i32
    %c0_i32_0 = arith.constant 0 : i32
    %c0_i32_1 = arith.constant 0 : i32
    return %c0_i32, %c0_i32_0 : i32, i32
  }
  func.func @transform_3(%arg0: i32) -> (i32, i32) {
    %c0_i32 = arith.constant 0 : i32
    %c0_i32_0 = arith.constant 0 : i32
    %c0_i32_1 = arith.constant 0 : i32
    return %c0_i32, %c0_i32_0 : i32, i32
  }
  func.func @transform_4(%arg0: i32) -> (i32, i32, i32) {
    %c0_i32 = arith.constant 0 : i32
    %c0_i32_0 = arith.constant 0 : i32
    %c0_i32_1 = arith.constant 0 : i32
    return %arg0, %c0_i32, %c0_i32_0 : i32, i32, i32
  }
}

</mosaic_0001>

<bundles_post_ra>
// kernel: down_forward.1
= control target key start
LH: loop header
LB: loop body
LE: loop exit
PB: predicated region body
PF: predicated region fallthrough
CT: control target
= control target key end

     0   :  { %s4153_s15 = smov 0   ;;  %s5972_s0 = inlined_call_operand.vmem [shape: bf16[2,176,16], index: 0, kind: input, shape index: {}]   ;;  %s5973_s1 = inlined_call_operand.vmem [shape: bf16[128,128], index: 1, kind: input, shape index: {}]   ;;  %s5974_s2 = inlined_call_operand.vmem [shape: bf16[384,128], index: 2, kind: input, shape index: {}]   ;;  %s5975_s3 = inlined_call_operand.vmem [shape: f32[128,1], index: 3, kind: input, shape index: {}]   ;;  %s5976_s4 = inlined_call_operand.vmem [shape: f32[2,128,128], index: 4, kind: output, shape index: {}]  }
   0x1 LB: > { %s3580_s16 = sadd.s32 4294967295, %s4111_s15   ;;  %p3584_p0 = scmp.ge.s32.totalorder %s4111_s15, 1  ;;  %s4111_s15 = sphi %s4153_s15, %s14_s15  }
   0x2   : > { %p162_p1 = scmp.lt.s32.totalorder %s4111_s15, 3 }
   0x4   : > { %p163_p2 = pnand %p3584_p0, %p162_p1 }
   0x6   : > { %166 = sbr.rel (%p163_p2) target bundleno = 1596 (0x63c), region = 36 }
   0xb   : > { %p188_p3 = scmp.lt.s32.totalorder %s3580_s16, 1  ;;  %s4113_s21 = smov 124   ;;  %vm590_vm0 = vcmask 1043744   ;;  %vm567_vm1 = vcmask 31744   ;;  %vm639_vm2 = vcmask 27648   ;;  %vm752_vm3 = vcmask 60448  }
   0xc   : > { %s4114_s22 = smov 120   ;;  %s4116_s23 = smov 4   ;;  %vm865_vm4 = vcmask 93248   ;;  %vm978_vm5 = vcmask 126048   ;;  %vm1091_vm6 = vcmask 158848   ;;  %vm1204_vm7 = vcmask 191648  }
   0xd   : > { %s5990_s16 = smov (!%p188_p3, %s3580_s16), 1  ;;  %s4117_s24 = smov 8   ;;  %vm1317_vm8 = vcmask 224448   ;;  %vm1430_vm9 = vcmask 257248   ;;  %vm1543_vm10 = vcmask 290048   ;;  %vm2006_vm14 = vcmask 1043712  }
   0xe   : > { %s3965_s17 = smul.u32 88, %s5990_s16  ;;  %s4118_s25 = smov 12   ;;  %vm2055_vm15 = vcmask 257024  }
   0xf   : > { %s4119_s26 = smov 16   ;;  %s4120_s27 = smov 20  }
  0x10   : > { %s4167_s20 = scalar_lea.vmem %s5972_s0, %s3965_s17  ;;  %s4121_s28 = smov 24  }
  0x11   : > { %v4170_v0 = vld [vmem:[%s4167_s20 + $0x10] sm:$0xff]   ;;  %v4173_v1 = vld [vmem:[%s4167_s20 + $0x18] sm:$0xff]   ;;  %v4176_v2 = vld [vmem:[%s4167_s20] sm:$0xff]   ;;  %s4122_s29 = smov 28   ;;  %s4123_s30 = smov 32  }
  0x12   : > { %v3922_v3 = vunpack.c.h.bf16 %v4170_v0  ;;  %v3925_v4 = vunpack.c.l.bf16 %v4173_v1  ;;  %v4181_v5 = vld [vmem:[%s4167_s20 + $0x8] sm:$0xff]   ;;  %v3914_v6 = vunpack.c.h.bf16 %v4176_v2  ;;  %v4186_v8 = vld [vmem:[%s4167_s20 + $0x20] sm:$0xff]   ;;  %v3926_v11 = vunpack.c.h.bf16 %v4173_v1  ;;  %v4215_v23 = vld [vmem:[%s4167_s20 + $0x30] sm:$0xff]   ;;  %s4125_s11 = smov 64   ;;  %s4127_s18 = smov 96  }
  0x13   : > { %v3917_v7 = vunpack.c.l.bf16 %v4181_v5  ;;  %v3929_v12 = vunpack.c.l.bf16 %v4186_v8  ;;  %v3913_v13 = vunpack.c.l.bf16 %v4176_v2  ;;  %v3921_v14 = vunpack.c.l.bf16 %v4170_v0  ;;  %v4205_v19 = vld [vmem:[%s4167_s20 + $0x28] sm:$0xff]   ;;  %v4226_v27 = vld [vmem:[%s4167_s20 + $0x40] sm:$0xff]   ;;  %v4236_v31 = vld [vmem:[%s4167_s20 + $0x38] sm:$0xff]  }
  0x14   : > { %v3998_v9 = vpack.i.bf16 %v3925_v4, %v3922_v3  ;;  %v3918_v15 = vunpack.c.h.bf16 %v4181_v5  ;;  %v3930_v16 = vunpack.c.h.bf16 %v4186_v8  ;;  %v3933_v21 = vunpack.c.l.bf16 %v4205_v19  ;;  %v4251_v36 = vld [vmem:[%s4167_s20 + $0x48] sm:$0xff]   ;;  %v4261_v40 = vld [vmem:[%s4167_s20 + $0x50] sm:$0xff]  }
  0x15   : > { %v3988_v10 = vpack.i.bf16 %v3917_v7, %v3914_v6  ;;  %v4003_v18 = vpack.i.bf16 %v3929_v12, %v3926_v11  ;;  %v3934_v22 = vunpack.c.h.bf16 %v4205_v19  ;;  %v3937_v24 = vunpack.c.l.bf16 %v4215_v23 }
  0x16   : > { %3999 = vrot.lane.b32.xlu1 %v3998_v9, %s4113_s21  ;;  %v4008_v17 = vpack.i.bf16 %v3913_v13, %v3930_v16  ;;  %v3993_v20 = vpack.i.bf16 %v3921_v14, %v3918_v15  ;;  %v3938_v25 = vunpack.c.h.bf16 %v4215_v23  ;;  %v3945_v29 = vunpack.c.l.bf16 %v4226_v27 }
  0x17   : > { %3989 = vrot.lane.b32.xlu0 %v3988_v10, %s4113_s21  ;;  %v4013_v26 = vpack.i.bf16 %v3934_v22, %v3933_v21  ;;  %v3946_v30 = vunpack.c.h.bf16 %v4226_v27  ;;  %v3941_v32 = vunpack.c.l.bf16 %v4236_v31  ;;  %v3942_v33 = vunpack.c.h.bf16 %v4236_v31 }
  0x18   : > { %4009 = vrot.lane.b32.xlu2 %v4008_v17, %s4113_s21  ;;  %v4018_v28 = vpack.i.bf16 %v3938_v25, %v3937_v24  ;;  %v3949_v37 = vunpack.c.l.bf16 %v4251_v36  ;;  %v3950_v38 = vunpack.c.h.bf16 %v4251_v36  ;;  %v3953_v41 = vunpack.c.l.bf16 %v4261_v40 }
  0x19   : > { %v4028_v34 = vpack.i.bf16 %v3946_v30, %v3945_v29  ;;  %v4023_v35 = vpack.i.bf16 %v3942_v33, %v3941_v32  ;;  %v3954_v42 = vunpack.c.h.bf16 %v4261_v40 }
  0x1a   : > { %v4033_v39 = vpack.i.bf16 %v3950_v38, %v3949_v37 }
  0x1b   : > { %v4038_v43 = vpack.i.bf16 %v3954_v42, %v3953_v41 }
  0x1e   : > { %4004 = vrot.lane.b32.xlu1 %v4003_v18, %s4113_s21 }
  0x1f   : > { %3994 = vrot.lane.b32.xlu0 %v3993_v20, %s4113_s21 }
  0x20   : > { %4014 = vrot.lane.b32.xlu2 %v4013_v26, %s4113_s21 }
  0x27   : > { %4019 = vrot.lane.b32.xlu0 %v4018_v28, %s4113_s21 }
  0x28   : > { %4029 = vrot.lane.b32.xlu2 %v4028_v34, %s4113_s21 }
  0x2f   : > { %4024 = vrot.lane.b32.xlu0 %v4023_v35, %s4113_s21 }
  0x37   : > { %4034 = vrot.lane.b32.xlu0 %v4033_v39, %s4113_s21 }
  0x3f   : > { %4039 = vrot.lane.b32.xlu0 %v4038_v43, %s4113_s21 }
  0x72   : > { %v4010_v44 = vpop.permute.xlu2 %4009 }
  0x73   : > { %v4012_v56 = vunpack.i.h.bf16 %v4010_v44  ;;  %v4011_v57 = vunpack.i.l.bf16 %v4010_v44 }
  0x75   : > { %v4293_v17 = vmax.f32 %v3913_v13, %v4012_v56  ;;  %v4297_v18 = vmax.f32 %v3930_v16, %v4011_v57 }
  0x7a   : > { %v4015_v55 = vpop.permute.xlu2 %4014 }
  0x7b   : > { %v4017_v59 = vunpack.i.h.bf16 %v4015_v55  ;;  %v4016_v60 = vunpack.i.l.bf16 %v4015_v55 }
  0x7d   : > { %v4311_v2 = vmax.f32 %v3934_v22, %v4017_v59  ;;  %v4315_v8 = vmax.f32 %v3933_v21, %v4016_v60 }
  0x7f   : > { %v4068_v22 = vpack.i.bf16 %v4311_v2, %v4293_v17  ;;  %v4063_v26 = vpack.i.bf16 %v4315_v8, %v4297_v18 }
  0x82   : > { %v4030_v16 = vpop.permute.xlu2 %4029 }
  0x83   : > { %v4032_v19 = vunpack.i.h.bf16 %v4030_v16  ;;  %v4031_v21 = vunpack.i.l.bf16 %v4030_v16 }
  0x85   : > { %v4337_v23 = vmax.f32 %v3946_v30, %v4032_v19 }
  0x88   : > { %v4000_v45 = vpop.permute.xlu1 %3999 }
  0x89   : > { %v4002_v46 = vunpack.i.h.bf16 %v4000_v45  ;;  %v4001_v47 = vunpack.i.l.bf16 %v4000_v45  ;;  %v3990_v48 = vpop.permute.xlu0 %3989 }
  0x8a   : > { %v3992_v49 = vunpack.i.h.bf16 %v3990_v48  ;;  %v3991_v50 = vunpack.i.l.bf16 %v3990_v48 }
  0x8b   : > { %v4271_v51 = vmax.f32 %v3925_v4, %v4002_v46  ;;  %v4273_v52 = vmax.f32 %v3922_v3, %v4001_v47 }
  0x8c   : > { %v4275_v53 = vmax.f32 %v3917_v7, %v3992_v49  ;;  %v4277_v54 = vmax.f32 %v3914_v6, %v3991_v50  ;;  %v4115_v49 = vmov 0  }
  0x8d   : > { %v4053_v9 = vpack.i.bf16 %v4271_v51, %v4273_v52  ;;  %591 = vst.msk [vmem:[#allocation3] sm:$0xf] %vm590_vm0, %v4115_v49  ;;  %4098 = vset.pattern.permute.xlu0 %v4115_v49  ;;  %4099 = vset.pattern.permute.xlu1 %v4115_v49 }
  0x8e   : > { %v4043_v3 = vpack.i.bf16 %v4275_v53, %v4277_v54  ;;  %592 = vst.msk [vmem:[#allocation3 + $0x4] sm:$0xf] %vm590_vm0, %v4115_v49  ;;  %4100 = vset.pattern.permute.xlu2 %v4115_v49 }
  0x8f   : > { %4054 = vrot.lane.b32.xlu0 %v4053_v9, %s4114_s22  ;;  %593 = vst.msk [vmem:[#allocation3 + $0x8] sm:$0xf] %vm590_vm0, %v4115_v49 }
  0x90   : > { %v4005_v58 = vpop.permute.xlu1 %4004  ;;  %4044 = vrot.lane.b32.xlu1 %v4043_v3, %s4114_s22  ;;  %594 = vst.msk [vmem:[#allocation3 + $0xc] sm:$0xf] %vm590_vm0, %v4115_v49 }
  0x91   : > { %v4007_v61 = vunpack.i.h.bf16 %v4005_v58  ;;  %v4006_v62 = vunpack.i.l.bf16 %v4005_v58  ;;  %v3995_v63 = vpop.permute.xlu0 %3994  ;;  %595 = vst.msk [vmem:[#allocation3 + $0x10] sm:$0xf] %vm590_vm0, %v4115_v49 }
  0x92   : > { %v3997_v4 = vunpack.i.h.bf16 %v3995_v63  ;;  %v3996_v10 = vunpack.i.l.bf16 %v3995_v63  ;;  %596 = vst.msk [vmem:[#allocation3 + $0x14] sm:$0xf] %vm590_vm0, %v4115_v49 }
  0x93   : > { %v4285_v6 = vmax.f32 %v3929_v12, %v4007_v61  ;;  %v4289_v7 = vmax.f32 %v3926_v11, %v4006_v62  ;;  %597 = vst.msk [vmem:[#allocation3 + $0x18] sm:$0xf] %vm590_vm0, %v4115_v49 }
  0x94   : > { %v4302_v20 = vmax.f32 %v3921_v14, %v3997_v4  ;;  %v4306_v1 = vmax.f32 %v3918_v15, %v3996_v10  ;;  %598 = vst.msk [vmem:[#allocation3 + $0x1c] sm:$0xf] %vm590_vm0, %v4115_v49 }
  0x95   : > { %v4058_v0 = vpack.i.bf16 %v4285_v6, %v4289_v7  ;;  %599 = vst.msk [vmem:[#allocation3 + $0x20] sm:$0xf] %vm590_vm0, %v4115_v49 }
  0x96   : > { %v4048_v5 = vpack.i.bf16 %v4302_v20, %v4306_v1  ;;  %600 = vst.msk [vmem:[#allocation3 + $0x24] sm:$0xf] %vm590_vm0, %v4115_v49 }
  0x97   : > { %601 = vst.msk [vmem:[#allocation3 + $0x28] sm:$0xf] %vm590_vm0, %v4115_v49 }
  0x98   : > { %4059 = vrot.lane.b32.xlu1 %v4058_v0, %s4114_s22  ;;  %4049 = vrot.lane.b32.xlu2 %v4048_v5, %s4114_s22  ;;  %602 = vst.msk [vmem:[#allocation3 + $0x2c] sm:$0xf] %vm590_vm0, %v4115_v49 }
  0x99   : > { %v4020_v11 = vpop.permute.xlu0 %4019  ;;  %603 = vst.msk [vmem:[#allocation3 + $0x30] sm:$0xf] %vm590_vm0, %v4115_v49 }
  0x9a   : > { %v4022_v12 = vunpack.i.h.bf16 %v4020_v11  ;;  %v4021_v13 = vunpack.i.l.bf16 %v4020_v11  ;;  %604 = vst.msk [vmem:[#allocation3 + $0x34] sm:$0xf] %vm590_vm0, %v4115_v49 }
  0x9b   : > { %605 = vst.msk [vmem:[#allocation3 + $0x38] sm:$0xf] %vm590_vm0, %v4115_v49 }
  0x9c   : > { %v4323_v14 = vmax.f32 %v3938_v25, %v4022_v12  ;;  %v4327_v15 = vmax.f32 %v3937_v24, %v4021_v13  ;;  %v4341_v24 = vmax.f32 %v3945_v29, %v4031_v21  ;;  %606 = vst.msk [vmem:[#allocation3 + $0x3c] sm:$0xf] %vm590_vm0, %v4115_v49  ;;  %vm2168_vm0 = vcmask 519424  }
  0x9d   : > { %2007 = vst.msk [vmem:[#allocation4 + $0x8] sm:$0xf] %vm2006_vm14, %v4115_v49 }
  0x9e   : > { %v4073_v30 = vpack.i.bf16 %v4323_v14, %v4327_v15  ;;  %2008 = vst.msk [vmem:[#allocation4 + $0x14] sm:$0xf] %vm2006_vm14, %v4115_v49 }
  0x9f   : > { %2009 = vst.msk [vmem:[#allocation4 + $0x20] sm:$0xf] %vm2006_vm14, %v4115_v49 }
  0xa0   : > { %4069 = vrot.lane.b32.xlu1 %v4068_v22, %s4114_s22  ;;  %4064 = vrot.lane.b32.xlu2 %v4063_v26, %s4114_s22  ;;  %2010 = vst.msk [vmem:[#allocation4 + $0x2c] sm:$0xf] %vm2006_vm14, %v4115_v49 }
  0xa1   : > { %v4025_v28 = vpop.permute.xlu0 %4024  ;;  %2011 = vst.msk [vmem:[#allocation4 + $0x38] sm:$0xf] %vm2006_vm14, %v4115_v49 }
  0xa2   : > { %v4027_v25 = vunpack.i.h.bf16 %v4025_v28  ;;  %v4026_v34 = vunpack.i.l.bf16 %v4025_v28  ;;  %2012 = vst.msk [vmem:[#allocation4 + $0x44] sm:$0xf] %vm2006_vm14, %v4115_v49 }
  0xa3   : > { %2013 = vst.msk [vmem:[#allocation4 + $0x50] sm:$0xf] %vm2006_vm14, %v4115_v49 }
  0xa4   : > { %v4345_v35 = vmax.f32 %v3942_v33, %v4027_v25  ;;  %v4349_v39 = vmax.f32 %v3941_v32, %v4026_v34  ;;  %v4083_v32 = vpack.i.bf16 %v4337_v23, %v4341_v24  ;;  %2014 = vst.msk [vmem:[#allocation4 + $0x5c] sm:$0xf] %vm2006_vm14, %v4115_v49 }
  0xa5   : > { %2015 = vst.msk [vmem:[#allocation4 + $0x68] sm:$0xf] %vm2006_vm14, %v4115_v49 }
  0xa6   : > { %v4078_v29 = vpack.i.bf16 %v4345_v35, %v4349_v39  ;;  %2016 = vst.msk [vmem:[#allocation4 + $0x74] sm:$0xf] %vm2006_vm14, %v4115_v49 }
  0xa7   : > { %2017 = vst.msk [vmem:[#allocation4 + $0x80] sm:$0xf] %vm2006_vm14, %v4115_v49 }
  0xa8   : > { %4079 = vrot.lane.b32.xlu0 %v4078_v29, %s4114_s22  ;;  %4074 = vrot.lane.b32.xlu1 %v4073_v30, %s4114_s22  ;;  %2018 = vst.msk [vmem:[#allocation4 + $0x8c] sm:$0xf] %vm2006_vm14, %v4115_v49 }
  0xa9   : > { %v4035_v43 = vpop.permute.xlu0 %4034  ;;  %2019 = vst.msk [vmem:[#allocation4 + $0x98] sm:$0xf] %vm2006_vm14, %v4115_v49 }
  0xaa   : > { %v4037_v44 = vunpack.i.h.bf16 %v4035_v43  ;;  %v4036_v27 = vunpack.i.l.bf16 %v4035_v43  ;;  %2020 = vst.msk [vmem:[#allocation4 + $0xa4] sm:$0xf] %vm2006_vm14, %v4115_v49 }
  0xab   : > { %2021 = vst.msk [vmem:[#allocation4 + $0xb0] sm:$0xf] %vm2006_vm14, %v4115_v49 }
  0xac   : > { %v4359_v33 = vmax.f32 %v3950_v38, %v4037_v44  ;;  %v4363_v31 = vmax.f32 %v3949_v37, %v4036_v27  ;;  %2022 = vst.msk [vmem:[#allocation4 + $0xbc] sm:$0xf] %vm2006_vm14, %v4115_v49 }
  0xae   : > { %v4088_v48 = vpack.i.bf16 %v4359_v33, %v4363_v31 }
  0xb0   : > { %4084 = vrot.lane.b32.xlu0 %v4083_v32, %s4114_s22  ;;  %4089 = vrot.lane.b32.xlu2 %v4088_v48, %s4114_s22 }
  0xb1   : > { %v4040_v45 = vpop.permute.xlu0 %4039 }
  0xb2   : > { %v4042_v46 = vunpack.i.h.bf16 %v4040_v45  ;;  %v4041_v47 = vunpack.i.l.bf16 %v4040_v45 }
  0xb4   : > { %v4373_v38 = vmax.f32 %v3954_v42, %v4042_v46  ;;  %v4377_v36 = vmax.f32 %v3953_v41, %v4041_v47 }
  0xb6   : > { %v4093_v37 = vpack.i.bf16 %v4373_v38, %v4377_v36 }
  0xb8   : > { %4094 = vrot.lane.b32.xlu1 %v4093_v37, %s4114_s22 }
  0xf2   : > { %v4050_v40 = vpop.permute.xlu2 %4049 }
  0xf3   : > { %v4052_v41 = vunpack.i.h.bf16 %v4050_v40  ;;  %v4051_v42 = vunpack.i.l.bf16 %v4050_v40 }
  0xf5   : > { %v505_v50 = vmax.f32 %v4302_v20, %v4052_v41  ;;  %v504_v55 = vmax.f32 %v4306_v1, %v4051_v42 }
  0xf7   : > { %v527_v56 = vpack.c.bf16 %v505_v50, %v505_v50  ;;  %v526_v57 = vpack.c.bf16 %v504_v55, %v504_v55 }
  0xf9   : > { %v549_v58 = vunpack.c.l.bf16 %v527_v56  ;;  %v548_v59 = vunpack.c.l.bf16 %v526_v57 }
  0xfa   : > { %v4065_v60 = vpop.permute.xlu2 %4064 }
  0xfb   : > { %572 = vst.msk [vmem:[#allocation2 + $0x20] sm:$0xff] %vm567_vm1, %v549_v58  ;;  %v4067_v61 = vunpack.i.h.bf16 %v4065_v60  ;;  %v4066_v62 = vunpack.i.l.bf16 %v4065_v60 }
  0xfc   : > { %571 = vst.msk [vmem:[#allocation2 + $0x18] sm:$0xff] %vm567_vm1, %v548_v59 }
  0xfd   : > { %v511_v63 = vmax.f32 %v4315_v8, %v4067_v61  ;;  %v510_v9 = vmax.f32 %v4297_v18, %v4066_v62 }
  0xff   : > { %v533_v4 = vpack.c.bf16 %v511_v63, %v511_v63  ;;  %v532_v10 = vpack.c.bf16 %v510_v9, %v510_v9 }
 0x101   : > { %v555_v3 = vunpack.c.l.bf16 %v533_v4  ;;  %v554_v20 = vunpack.c.l.bf16 %v532_v10  ;;  %v4055_v1 = vpop.permute.xlu0 %4054 }
 0x102   : > { %v4057_v11 = vunpack.i.h.bf16 %v4055_v1  ;;  %v4056_v0 = vunpack.i.l.bf16 %v4055_v1  ;;  %v4045_v12 = vpop.permute.xlu1 %4044 }
 0x103   : > { %578 = vst.msk [vmem:[#allocation2 + $0x50] sm:$0xff] %vm567_vm1, %v555_v3  ;;  %v4047_v13 = vunpack.i.h.bf16 %v4045_v12  ;;  %v4046_v5 = vunpack.i.l.bf16 %v4045_v12  ;;  %v883_v16 = vld [vmem:[#allocation2 + $0x1f] sm:$0xff] }
 0x104   : > { %577 = vst.msk [vmem:[#allocation2 + $0x48] sm:$0xff] %vm567_vm1, %v554_v20  ;;  %v507_v8 = vmax.f32 %v4271_v51, %v4057_v11  ;;  %v506_v18 = vmax.f32 %v4273_v52, %v4056_v0  ;;  %v4429_v19 = vpack.c.bf16 %v883_v16, %v883_v16 }
 0x105   : > { %v503_v21 = vmax.f32 %v4275_v53, %v4047_v13  ;;  %v502_v22 = vmax.f32 %v4277_v54, %v4046_v5 }
 0x106   : > { %v529_v26 = vpack.c.bf16 %v507_v8, %v507_v8  ;;  %v528_v28 = vpack.c.bf16 %v506_v18, %v506_v18  ;;  %643 = vst.msk [vmem:[#allocation3 + $0xc] sm:$0xf] %vm639_vm2, %v4429_v19 }
 0x107   : > { %v525_v25 = vpack.c.bf16 %v503_v21, %v503_v21  ;;  %v524_v34 = vpack.c.bf16 %v502_v22, %v502_v22 }
 0x108   : > { %v551_v30 = vunpack.c.l.bf16 %v529_v26  ;;  %v550_v43 = vunpack.c.l.bf16 %v528_v28 }
 0x109   : > { %v547_v44 = vunpack.c.l.bf16 %v525_v25  ;;  %v546_v27 = vunpack.c.l.bf16 %v524_v34 }
 0x10a   : > { %574 = vst.msk [vmem:[#allocation2 + $0x30] sm:$0xff] %vm567_vm1, %v551_v30  ;;  %v4060_v51 = vpop.permute.xlu1 %4059  ;;  %v4090_v52 = vpop.permute.xlu2 %4089 }
 0x10b   : > { %573 = vst.msk [vmem:[#allocation2 + $0x28] sm:$0xff] %vm567_vm1, %v550_v43  ;;  %v4062_v53 = vunpack.i.h.bf16 %v4060_v51  ;;  %v4061_v29 = vunpack.i.l.bf16 %v4060_v51  ;;  %v4092_v54 = vunpack.i.h.bf16 %v4090_v52  ;;  %v4091_v32 = vunpack.i.l.bf16 %v4090_v52  ;;  %v1226_v45 = vld [vmem:[#allocation2 + $0x4f] sm:$0xff] }
 0x10c   : > { %570 = vst.msk [vmem:[#allocation2 + $0x10] sm:$0xff] %vm567_vm1, %v547_v44  ;;  %v4438_v46 = vpack.c.bf16 %v1226_v45, %v1226_v45 }
 0x10d   : > { %569 = vst.msk [vmem:[#allocation2 + $0x8] sm:$0xff] %vm567_vm1, %v546_v27  ;;  %v509_v47 = vmax.f32 %v4285_v6, %v4062_v53  ;;  %v508_v48 = vmax.f32 %v4289_v7, %v4061_v29  ;;  %v520_v37 = vmax.f32 %v4359_v33, %v4092_v54  ;;  %v519_v40 = vmax.f32 %v4363_v31, %v4091_v32 }
 0x10e   : > { %649 = vst.msk [vmem:[#allocation3 + $0x24] sm:$0xf] %vm639_vm2, %v4438_v46 }
 0x10f   : > { %v531_v41 = vpack.c.bf16 %v509_v47, %v509_v47  ;;  %v530_v42 = vpack.c.bf16 %v508_v48, %v508_v48  ;;  %v542_v50 = vpack.c.bf16 %v520_v37, %v520_v37  ;;  %v541_v55 = vpack.c.bf16 %v519_v40, %v519_v40 }
 0x111   : > { %v553_v56 = vunpack.c.l.bf16 %v531_v41  ;;  %v552_v57 = vunpack.c.l.bf16 %v530_v42  ;;  %v564_v58 = vunpack.c.l.bf16 %v542_v50  ;;  %v563_v59 = vunpack.c.l.bf16 %v541_v55  ;;  %v1108_v50 = vld [vmem:[#allocation2 + $0x19] sm:$0xff] }
 0x112   : > { %v4070_v60 = vpop.permute.xlu1 %4069  ;;  %v1222_v61 = vld [vmem:[#allocation2 + $0x2f] sm:$0xff]  ;;  %v1221_v31 = vld [vmem:[#allocation2 + $0x27] sm:$0xff] }
 0x113   : > { %576 = vst.msk [vmem:[#allocation2 + $0x40] sm:$0xff] %vm567_vm1, %v553_v56  ;;  %v4072_v6 = vunpack.i.h.bf16 %v4070_v60  ;;  %v4071_v7 = vunpack.i.l.bf16 %v4070_v60  ;;  %v657_v33 = vld [vmem:[#allocation2 + $0x10] sm:$0xff]  ;;  %v4449_v3 = vpack.c.bf16 %v1222_v61, %v1222_v61  ;;  %v4456_v13 = vpack.c.bf16 %v1221_v31, %v1221_v31 }
 0x114   : > { %v882_v62 = vld [vmem:[#allocation2 + $0x17] sm:$0xff]  ;;  %575 = vst.msk [vmem:[#allocation2 + $0x38] sm:$0xff] %vm567_vm1, %v552_v57  ;;  %v673_v63 = vpack.c.bf16 %v657_v33, %v657_v33  ;;  %v769_v9 = vld [vmem:[#allocation2 + $0x9] sm:$0xff]  ;;  %v4497_v33 = vpack.c.bf16 %v1108_v50, %v1108_v50 }
 0x115   : > { %v656_v4 = vld [vmem:[#allocation2 + $0x8] sm:$0xff]  ;;  %v898_v10 = vpack.c.bf16 %v882_v62, %v882_v62  ;;  %587 = vst.msk [vmem:[#allocation2 + $0x98] sm:$0xff] %vm567_vm1, %v564_v58  ;;  %v512_v20 = vmax.f32 %v4311_v2, %v4072_v6  ;;  %v501_v1 = vmax.f32 %v4293_v17, %v4071_v7  ;;  %v785_v11 = vpack.c.bf16 %v769_v9, %v769_v9  ;;  %v770_v22 = vld [vmem:[#allocation2 + $0x11] sm:$0xff] }
 0x116   : > { %v672_v0 = vpack.c.bf16 %v656_v4, %v656_v4  ;;  %v608_v12 = vld [vmem:[#allocation2 + $0xf] sm:$0xff]  ;;  %586 = vst.msk [vmem:[#allocation2 + $0x90] sm:$0xff] %vm567_vm1, %v563_v59  ;;  %706 = vrot.lane.b32.xlu0 %v673_v63, %s4116_s23  ;;  %v786_v32 = vpack.c.bf16 %v770_v22, %v770_v22  ;;  %v995_v57 = vld [vmem:[#allocation2 + $0x18] sm:$0xff] }
 0x117   : > { %v624_v5 = vpack.c.bf16 %v608_v12, %v608_v12  ;;  %v534_v16 = vpack.c.bf16 %v512_v20, %v512_v20  ;;  %v523_v8 = vpack.c.bf16 %v501_v1, %v501_v1  ;;  %817 = vrot.lane.b32.xlu1 %v785_v11, %s4117_s24  ;;  %642 = vst.msk [vmem:[#allocation3 + $0x8] sm:$0xf] %vm639_vm2, %v898_v10  ;;  %v1109_v20 = vld [vmem:[#allocation2 + $0x21] sm:$0xff] }
 0x118   : > { %704 = vrot.lane.b32.xlu2 %v672_v0, %s4116_s23  ;;  %645 = vst.msk [vmem:[#allocation3 + $0x14] sm:$0xf] %vm639_vm2, %v4449_v3  ;;  %v1011_v62 = vpack.c.bf16 %v995_v57, %v995_v57 }
 0x119   : > { %641 = vst.msk [vmem:[#allocation3 + $0x4] sm:$0xf] %vm639_vm2, %v624_v5  ;;  %v556_v17 = vunpack.c.l.bf16 %v534_v16  ;;  %v545_v2 = vunpack.c.l.bf16 %v523_v8  ;;  %v1125_v16 = vpack.c.bf16 %v1109_v20, %v1109_v20 }
 0x11a   : > { %v4080_v18 = vpop.permute.xlu0 %4079  ;;  %v4075_v21 = vpop.permute.xlu1 %4074  ;;  %644 = vst.msk [vmem:[#allocation3 + $0x10] sm:$0xf] %vm639_vm2, %v4456_v13  ;;  %v1225_v44 = vld [vmem:[#allocation2 + $0x47] sm:$0xff] }
 0x11b   : > { %579 = vst.msk [vmem:[#allocation2 + $0x58] sm:$0xff] %vm567_vm1, %v556_v17  ;;  %v4082_v26 = vunpack.i.h.bf16 %v4080_v18  ;;  %v4081_v28 = vunpack.i.l.bf16 %v4080_v18  ;;  %v4077_v25 = vunpack.i.h.bf16 %v4075_v21  ;;  %v4076_v34 = vunpack.i.l.bf16 %v4075_v21  ;;  %v1223_v30 = vld [vmem:[#allocation2 + $0x37] sm:$0xff]  ;;  %v1224_v43 = vld [vmem:[#allocation2 + $0x3f] sm:$0xff] }
 0x11c   : > { %568 = vst.msk [vmem:[#allocation2] sm:$0xff] %vm567_vm1, %v545_v2  ;;  %v4468_v27 = vpack.c.bf16 %v1223_v30, %v1223_v30  ;;  %v4470_v51 = vpack.c.bf16 %v1224_v43, %v1224_v43  ;;  %v4477_v45 = vpack.c.bf16 %v1225_v44, %v1225_v44 }
 0x11d   : > { %v516_v52 = vmax.f32 %v4345_v35, %v4082_v26  ;;  %v515_v53 = vmax.f32 %v4349_v39, %v4081_v28  ;;  %v514_v29 = vmax.f32 %v4323_v14, %v4077_v25  ;;  %v513_v54 = vmax.f32 %v4327_v15, %v4076_v34  ;;  %v996_v39 = vld [vmem:[#allocation2 + $0x20] sm:$0xff]  ;;  %v1335_v26 = vld [vmem:[#allocation2 + $0x30] sm:$0xff]  ;;  %v1334_v34 = vld [vmem:[#allocation2 + $0x28] sm:$0xff] }
 0x11e   : > { %930 = vrot.lane.b32.xlu0 %v898_v10, %s4118_s25  ;;  %646 = vst.msk [vmem:[#allocation3 + $0x18] sm:$0xf] %vm639_vm2, %v4468_v27  ;;  %v4490_v59 = vpack.c.bf16 %v996_v39, %v996_v39  ;;  %v1447_v25 = vld [vmem:[#allocation2 + $0x29] sm:$0xff]  ;;  %v1351_v43 = vpack.c.bf16 %v1335_v26, %v1335_v26 }
 0x11f   : > { %v538_v47 = vpack.c.bf16 %v516_v52, %v516_v52  ;;  %v537_v48 = vpack.c.bf16 %v515_v53, %v515_v53  ;;  %v536_v37 = vpack.c.bf16 %v514_v29, %v514_v29  ;;  %v535_v40 = vpack.c.bf16 %v513_v54, %v513_v54  ;;  %932 = vrot.lane.b32.xlu1 %v4429_v19, %s4118_s25  ;;  %v1448_v29 = vld [vmem:[#allocation2 + $0x31] sm:$0xff]  ;;  %v1451_v39 = vld [vmem:[#allocation2 + $0x49] sm:$0xff] }
 0x120   : > { %819 = vrot.lane.b32.xlu2 %v786_v32, %s4117_s24  ;;  %647 = vst.msk [vmem:[#allocation3 + $0x1c] sm:$0xf] %vm639_vm2, %v4470_v51  ;;  %v1463_v52 = vpack.c.bf16 %v1447_v25, %v1447_v25  ;;  %v1350_v53 = vpack.c.bf16 %v1334_v34, %v1334_v34  ;;  %v1464_v54 = vpack.c.bf16 %v1448_v29, %v1448_v29 }
 0x121   : > { %v560_v14 = vunpack.c.l.bf16 %v538_v47  ;;  %v559_v15 = vunpack.c.l.bf16 %v537_v48  ;;  %v558_v35 = vunpack.c.l.bf16 %v536_v37  ;;  %v557_v41 = vunpack.c.l.bf16 %v535_v40  ;;  %648 = vst.msk [vmem:[#allocation3 + $0x20] sm:$0xf] %vm639_vm2, %v4477_v45  ;;  %v1336_v47 = vld [vmem:[#allocation2 + $0x38] sm:$0xff]  ;;  %v1450_v40 = vld [vmem:[#allocation2 + $0x41] sm:$0xff] }
 0x122   : > { %v4085_v42 = vpop.permute.xlu0 %4084  ;;  %v1227_v55 = vld [vmem:[#allocation2 + $0x57] sm:$0xff]  ;;  %v1352_v37 = vpack.c.bf16 %v1336_v47, %v1336_v47  ;;  %v4591_v50 = vpack.c.bf16 %v1451_v39, %v1451_v39 }
 0x123   : > { %583 = vst.msk [vmem:[#allocation2 + $0x78] sm:$0xff] %vm567_vm1, %v560_v14  ;;  %v4087_v19 = vunpack.i.h.bf16 %v4085_v42  ;;  %v4086_v56 = vunpack.i.l.bf16 %v4085_v42  ;;  %v607_v58 = vld [vmem:[#allocation2 + $0x7] sm:$0xff]  ;;  %v4492_v61 = vpack.c.bf16 %v1227_v55, %v1227_v55  ;;  %v1466_v14 = vpack.c.bf16 %v1450_v40, %v1450_v40 }
 0x124   : > { %582 = vst.msk [vmem:[#allocation2 + $0x70] sm:$0xff] %vm567_vm1, %v559_v15  ;;  %v623_v60 = vpack.c.bf16 %v607_v58, %v607_v58  ;;  %v3860_v42 = vld [vmem:[%s5973_s1 + $0x28] sm:$0xff]  ;;  %v3859_v55 = vld [vmem:[%s5973_s1 + $0x20] sm:$0xff]  ;;  %v3857_v58 = vld [vmem:[%s5973_s1 + $0x10] sm:$0xff] }
 0x125   : > { %581 = vst.msk [vmem:[#allocation2 + $0x68] sm:$0xff] %vm567_vm1, %v558_v35  ;;  %v518_v6 = vmax.f32 %v4337_v23, %v4087_v19  ;;  %v517_v7 = vmax.f32 %v4341_v24, %v4086_v56  ;;  %v3861_v35 = vld [vmem:[%s5973_s1 + $0x30] sm:$0xff]  ;;  %v3858_v56 = vld [vmem:[%s5973_s1 + $0x18] sm:$0xff] }
 0x126   : > { %580 = vst.msk [vmem:[#allocation2 + $0x60] sm:$0xff] %vm567_vm1, %v557_v41  ;;  %1045 = vrot.lane.b32.xlu0 %v4490_v59, %s4119_s26 }
 0x127   : > { %v540_v31 = vpack.c.bf16 %v518_v6, %v518_v6  ;;  %v539_v63 = vpack.c.bf16 %v517_v7, %v517_v7  ;;  %1156 = vrot.lane.b32.xlu1 %v4497_v33, %s4120_s27  ;;  %640 = vst.msk [vmem:[#allocation3] sm:$0xf] %vm639_vm2, %v623_v60  ;;  %v1338_v60 = vld [vmem:[#allocation2 + $0x48] sm:$0xff] }
 0x128   : > { %1043 = vrot.lane.b32.xlu2 %v1011_v62, %s4119_s26  ;;  %650 = vst.msk [vmem:[#allocation3 + $0x28] sm:$0xf] %vm639_vm2, %v4492_v61  ;;  %v3856_v6 = vld [vmem:[%s5973_s1 + $0x8] sm:$0xff]  ;;  %v4617_v7 = vpack.c.bf16 %v1338_v60, %v1338_v60 }
 0x129   : > { %v562_v23 = vunpack.c.l.bf16 %v540_v31  ;;  %v561_v24 = vunpack.c.l.bf16 %v539_v63  ;;  %v3855_v31 = vld [vmem:[%s5973_s1] sm:$0xff] }
 0x12a   : > { %v4095_v9 = vpop.permute.xlu1 %4094 }
 0x12b   : > { %585 = vst.msk [vmem:[#allocation2 + $0x88] sm:$0xff] %vm567_vm1, %v562_v23  ;;  %v4097_v4 = vunpack.i.h.bf16 %v4095_v9  ;;  %v4096_v10 = vunpack.i.l.bf16 %v4095_v9  ;;  %v1231_v2 = vld [vmem:[#allocation2 + $0x77] sm:$0xff] }
 0x12c   : > { %584 = vst.msk [vmem:[#allocation2 + $0x80] sm:$0xff] %vm567_vm1, %v561_v24  ;;  %v1230_v1 = vld [vmem:[#allocation2 + $0x6f] sm:$0xff]  ;;  %v4525_v28 = vpack.c.bf16 %v1231_v2, %v1231_v2 }
 0x12d   : > { %v522_v11 = vmax.f32 %v4373_v38, %v4097_v4  ;;  %v521_v0 = vmax.f32 %v4377_v36, %v4096_v10  ;;  %v1228_v12 = vld [vmem:[#allocation2 + $0x5f] sm:$0xff]  ;;  %v4512_v5 = vpack.c.bf16 %v1230_v1, %v1230_v1  ;;  %v1229_v17 = vld [vmem:[#allocation2 + $0x67] sm:$0xff]  ;;  %v1452_v23 = vld [vmem:[#allocation2 + $0x51] sm:$0xff] }
 0x12e   : > { %1269 = vrot.lane.b32.xlu0 %v4456_v13, %s4121_s28  ;;  %v4516_v8 = vpack.c.bf16 %v1228_v12, %v1228_v12  ;;  %v4520_v38 = vpack.c.bf16 %v1229_v17, %v1229_v17  ;;  %654 = vst.msk [vmem:[#allocation3 + $0x38] sm:$0xf] %vm639_vm2, %v4525_v28  ;;  %v1339_v24 = vld [vmem:[#allocation2 + $0x50] sm:$0xff]  ;;  %v4630_v9 = vpack.c.bf16 %v1452_v23, %v1452_v23  ;;  %v1340_v12 = vld [vmem:[#allocation2 + $0x58] sm:$0xff] }
 0x12f   : > { %v544_v18 = vpack.c.bf16 %v522_v11, %v522_v11  ;;  %v543_v21 = vpack.c.bf16 %v521_v0, %v521_v0  ;;  %1271 = vrot.lane.b32.xlu1 %v4449_v3, %s4121_s28  ;;  %653 = vst.msk [vmem:[#allocation3 + $0x34] sm:$0xf] %vm639_vm2, %v4512_v5  ;;  %v1355_v4 = vpack.c.bf16 %v1339_v24, %v1339_v24  ;;  %v1344_v24 = vld [vmem:[#allocation2 + $0x78] sm:$0xff] }
 0x130   : > { %1158 = vrot.lane.b32.xlu2 %v1125_v16, %s4120_s27  ;;  %651 = vst.msk [vmem:[#allocation3 + $0x2c] sm:$0xf] %vm639_vm2, %v4516_v8  ;;  %v4649_v17 = vpack.c.bf16 %v1340_v12, %v1340_v12 }
 0x131   : > { %v566_v36 = vunpack.c.l.bf16 %v544_v18  ;;  %v565_v22 = vunpack.c.l.bf16 %v543_v21  ;;  %652 = vst.msk [vmem:[#allocation3 + $0x30] sm:$0xf] %vm639_vm2, %v4520_v38  ;;  %v1454_v21 = vld [vmem:[#allocation2 + $0x61] sm:$0xff] }
 0x133   : > { %589 = vst.msk [vmem:[#allocation2 + $0xa8] sm:$0xff] %vm567_vm1, %v566_v36  ;;  %v1232_v30 = vld [vmem:[#allocation2 + $0x7f] sm:$0xff] }
 0x134   : > { %588 = vst.msk [vmem:[#allocation2 + $0xa0] sm:$0xff] %vm567_vm1, %v565_v22  ;;  %v4533_v44 = vpack.c.bf16 %v1232_v30, %v1232_v30  ;;  %v4662_v22 = vpack.c.bf16 %v1454_v21, %v1454_v21  ;;  %vm2281_vm1 = vcmask 781824  }
 0x136   : > { %1384 = vrot.lane.b32.xlu0 %v1351_v43, %s4122_s29  ;;  %655 = vst.msk [vmem:[#allocation3 + $0x3c] sm:$0xf] %vm639_vm2, %v4533_v44  ;;  %vm2394_vm2 = vcmask 1044224  }
 0x137   : > { %1495 = vrot.lane.b32.xlu1 %v1463_v52, %s4123_s30 }
 0x138   : > { %1382 = vrot.lane.b32.xlu2 %v1350_v53, %s4122_s29 }
 0x13e   : > { %934 = vrot.lane.b32.xlu0 %v4456_v13, %s4118_s25  ;;  %v1337_v13 = vld [vmem:[#allocation2 + $0x40] sm:$0xff] }
 0x13f   : > { %708 = vrot.lane.b32.xlu1 %v1011_v62, %s4116_s23  ;;  %v4556_v32 = vpack.c.bf16 %v1337_v13, %v1337_v13 }
 0x140   : > { %1497 = vrot.lane.b32.xlu2 %v1464_v54, %s4123_s30 }
 0x146   : > { %1049 = vrot.lane.b32.xlu0 %v1351_v43, %s4119_s26 }
 0x147   : > { %821 = vrot.lane.b32.xlu1 %v4497_v33, %s4117_s24 }
 0x148   : > { %710 = vrot.lane.b32.xlu2 %v4490_v59, %s4116_s23 }
 0x14e   : > { %1273 = vrot.lane.b32.xlu0 %v4468_v27, %s4121_s28 }
 0x14f   : > { %936 = vrot.lane.b32.xlu1 %v4449_v3, %s4118_s25  ;;  %v1449_v3 = vld [vmem:[#allocation2 + $0x39] sm:$0xff] }
 0x150   : > { %823 = vrot.lane.b32.xlu2 %v1125_v16, %s4117_s24  ;;  %v4566_v48 = vpack.c.bf16 %v1449_v3, %v1449_v3 }
 0x156   : > { %1388 = vrot.lane.b32.xlu0 %v4556_v32, %s4122_s29 }
 0x157   : > { %1160 = vrot.lane.b32.xlu1 %v1463_v52, %s4120_s27 }
 0x158   : > { %1047 = vrot.lane.b32.xlu2 %v1350_v53, %s4119_s26 }
 0x15e   : > { %825 = vrot.lane.b32.xlu0 %v1463_v52, %s4117_s24  ;;  %v1341_v52 = vld [vmem:[#allocation2 + $0x60] sm:$0xff] }
 0x15f   : > { %1275 = vrot.lane.b32.xlu1 %v4470_v51, %s4121_s28  ;;  %v4678_v29 = vpack.c.bf16 %v1341_v52, %v1341_v52 }
 0x160   : > { %1162 = vrot.lane.b32.xlu2 %v1464_v54, %s4120_s27 }
 0x166   : > { %940 = vrot.lane.b32.xlu0 %v4470_v51, %s4118_s25  ;;  %v3862_v51 = vld [vmem:[%s5973_s1 + $0x38] sm:$0xff] }
 0x167   : > { %1499 = vrot.lane.b32.xlu1 %v4566_v48, %s4123_s30  ;;  %1688 = vmatpush.bf16.msra.mxu0 %v3862_v51 }
 0x168   : > { %1386 = vrot.lane.b32.xlu2 %v1352_v37, %s4122_s29 }
 0x16b   : > { %1689 = vmatpush.bf16.msra.mxu0 %v3861_v35 }
 0x16e   : > { %1164 = vrot.lane.b32.xlu0 %v4566_v48, %s4120_s27 }
 0x16f   : > { %712 = vrot.lane.b32.xlu1 %v1350_v53, %s4116_s23  ;;  %1690 = vmatpush.bf16.msra.mxu0 %v3860_v42  ;;  %v1453_v53 = vld [vmem:[#allocation2 + $0x59] sm:$0xff] }
 0x170   : > { %1501 = vrot.lane.b32.xlu2 %v1466_v14, %s4123_s30 }
 0x172   : > { %v705_v15 = vpop.permute.xlu2 %704 }
 0x173   : > { %753 = vst.msk [vmem:[#allocation3] sm:$0xf] %vm752_vm3, %v705_v15  ;;  %1691 = vmatpush.bf16.msra.mxu0 %v3859_v55 }
 0x176   : > { %1279 = vrot.lane.b32.xlu0 %v4438_v46, %s4121_s28 }
 0x177   : > { %827 = vrot.lane.b32.xlu1 %v1464_v54, %s4117_s24  ;;  %1692 = vmatpush.bf16.msra.mxu0 %v3858_v56  ;;  %v4680_v54 = vpack.c.bf16 %v1453_v53, %v1453_v53  ;;  %v1342_v56 = vld [vmem:[#allocation2 + $0x68] sm:$0xff] }
 0x178   : > { %714 = vrot.lane.b32.xlu2 %v1351_v43, %s4116_s23 }
 0x17a   : > { %v820_v41 = vpop.permute.xlu2 %819 }
 0x17b   : > { %1693 = vmatpush.bf16.msra.mxu0 %v3857_v58 }
 0x17e   : > { %1503 = vrot.lane.b32.xlu0 %v4591_v50, %s4123_s30 }
 0x17f   : > { %1051 = vrot.lane.b32.xlu1 %v1352_v37, %s4119_s26  ;;  %1694 = vmatpush.bf16.msra.mxu0 %v3856_v6  ;;  %v1456_v6 = vld [vmem:[#allocation2 + $0x71] sm:$0xff] }
 0x180   : > { %938 = vrot.lane.b32.xlu2 %v4468_v27, %s4118_s25 }
 0x182   : > { %v1044_v19 = vpop.permute.xlu2 %1043 }
 0x183   : > { %1695 = vmatpush.bf16.msra.mxu0 %v3855_v31 }
 0x186   : > { %716 = vrot.lane.b32.xlu0 %v1352_v37, %s4116_s23 }
 0x187   : > { %1166 = vrot.lane.b32.xlu1 %v1466_v14, %s4120_s27 }
 0x188   : > { %1053 = vrot.lane.b32.xlu2 %v4556_v32, %s4119_s26  ;;  %v707_v27 = vpop.permute.xlu0 %706 }
 0x189   : > { %754 = vst.msk [vmem:[#allocation3 + $0x4] sm:$0xf] %vm752_vm3, %v707_v27  ;;  %v818_v57 = vpop.permute.xlu1 %817 }
 0x18a   : > { %866 = vst.msk [vmem:[#allocation3] sm:$0xf] %vm865_vm4, %v818_v57  ;;  %v1159_v59 = vpop.permute.xlu2 %1158  ;;  %v4730_v57 = vpack.c.bf16 %v1342_v56, %v1342_v56 }
 0x18b   : > { %867 = vst.msk [vmem:[#allocation3 + $0x4] sm:$0xf] %vm865_vm4, %v820_v41 }
 0x18e   : > { %831 = vrot.lane.b32.xlu0 %v1466_v14, %s4117_s24  ;;  %v1343_v14 = vld [vmem:[#allocation2 + $0x70] sm:$0xff] }
 0x18f   : > { %1390 = vrot.lane.b32.xlu1 %v4617_v7, %s4122_s29  ;;  %v4709_v51 = vpack.c.bf16 %v1343_v14, %v1343_v14 }
 0x190   : > { %1277 = vrot.lane.b32.xlu2 %v4477_v45, %s4121_s28  ;;  %v931_v33 = vpop.permute.xlu0 %930 }
 0x191   : > { %979 = vst.msk [vmem:[#allocation3] sm:$0xf] %vm978_vm5, %v931_v33  ;;  %v933_v62 = vpop.permute.xlu1 %932 }
 0x192   : > { %980 = vst.msk [vmem:[#allocation3 + $0x4] sm:$0xf] %vm978_vm5, %v933_v62  ;;  %v1383_v63 = vpop.permute.xlu2 %1382 }
 0x193   : > { %1092 = vst.msk [vmem:[#allocation3] sm:$0xf] %vm1091_vm6, %v1044_v19  ;;  %v1455_v19 = vld [vmem:[#allocation2 + $0x69] sm:$0xff] }
 0x194   : > { %v1471_v27 = vpack.c.bf16 %v1455_v19, %v1455_v19 }
 0x196   : > { %1055 = vrot.lane.b32.xlu0 %v4617_v7, %s4119_s26 }
 0x197   : > { %1505 = vrot.lane.b32.xlu1 %v4630_v9, %s4123_s30 }
 0x198   : > { %1392 = vrot.lane.b32.xlu2 %v1355_v4, %s4122_s29  ;;  %v1046_v10 = vpop.permute.xlu0 %1045 }
 0x199   : > { %1093 = vst.msk [vmem:[#allocation3 + $0x4] sm:$0xf] %vm1091_vm6, %v1046_v10  ;;  %v1157_v20 = vpop.permute.xlu1 %1156 }
 0x19a   : > { %1205 = vst.msk [vmem:[#allocation3] sm:$0xf] %vm1204_vm7, %v1157_v20  ;;  %v1498_v1 = vpop.permute.xlu2 %1497  ;;  %v1458_v20 = vld [vmem:[#allocation2 + $0x81] sm:$0xff] }
 0x19b   : > { %1206 = vst.msk [vmem:[#allocation3 + $0x4] sm:$0xf] %vm1204_vm7, %v1159_v59 }
 0x19e   : > { %1170 = vrot.lane.b32.xlu0 %v4630_v9, %s4120_s27 }
 0x19f   : > { %718 = vrot.lane.b32.xlu1 %v4556_v32, %s4116_s23 }
 0x1a0   : > { %829 = vrot.lane.b32.xlu2 %v4566_v48, %s4117_s24  ;;  %v1270_v11 = vpop.permute.xlu0 %1269 }
 0x1a1   : > { %1318 = vst.msk [vmem:[#allocation3] sm:$0xf] %vm1317_vm8, %v1270_v11  ;;  %v1272_v0 = vpop.permute.xlu1 %1271  ;;  %v4770_v11 = vpack.c.bf16 %v1458_v20, %v1458_v20 }
 0x1a2   : > { %1319 = vst.msk [vmem:[#allocation3 + $0x4] sm:$0xf] %vm1317_vm8, %v1272_v0  ;;  %v711_v16 = vpop.permute.xlu2 %710 }
 0x1a3   : > { %756 = vst.msk [vmem:[#allocation3 + $0xc] sm:$0xf] %vm752_vm3, %v711_v16  ;;  %v1345_v16 = vld [vmem:[#allocation2 + $0x80] sm:$0xff] }
 0x1a4   : > { %1431 = vst.msk [vmem:[#allocation3] sm:$0xf] %vm1430_vm9, %v1383_v63 }
 0x1a6   : > { %1394 = vrot.lane.b32.xlu0 %v4649_v17, %s4122_s29 }
 0x1a7   : > { %942 = vrot.lane.b32.xlu1 %v4477_v45, %s4118_s25 }
 0x1a8   : > { %944 = vrot.lane.b32.xlu2 %v4438_v46, %s4118_s25  ;;  %v1385_v2 = vpop.permute.xlu0 %1384 }
 0x1a9   : > { %1432 = vst.msk [vmem:[#allocation3 + $0x4] sm:$0xf] %vm1430_vm9, %v1385_v2  ;;  %v1496_v18 = vpop.permute.xlu1 %1495 }
 0x1aa   : > { %1545 = vst.msk [vmem:[#allocation3 + $0x4] sm:$0xf] %vm1543_vm10, %v1498_v1  ;;  %v824_v36 = vpop.permute.xlu2 %823 }
 0x1ab   : > { %1544 = vst.msk [vmem:[#allocation3] sm:$0xf] %vm1543_vm10, %v1496_v18 }
 0x1ac   : > { %869 = vst.msk [vmem:[#allocation3 + $0xc] sm:$0xf] %vm865_vm4, %v824_v36 }
 0x1ae   : > { %1509 = vrot.lane.b32.xlu0 %v4662_v22, %s4123_s30 }
 0x1af   : > { %1057 = vrot.lane.b32.xlu1 %v1355_v4, %s4119_s26 }
 0x1b0   : > { %1168 = vrot.lane.b32.xlu2 %v4591_v50, %s4120_s27  ;;  %v935_v46 = vpop.permute.xlu0 %934 }
 0x1b1   : > { %v709_v45 = vpop.permute.xlu1 %708 }
 0x1b2   : > { %755 = vst.msk [vmem:[#allocation3 + $0x8] sm:$0xf] %vm752_vm3, %v709_v45  ;;  %v1048_v26 = vpop.permute.xlu2 %1047  ;;  %v3847_v25 = vld [vmem:[#allocation3] sm:$0xff] }
 0x1b3   : > { %1696 = vmatmul.bf16.vlgmr.msra.gmra.mxu0 %v3847_v25 }
 0x1b6   : > { %722 = vrot.lane.b32.xlu0 %v1355_v4, %s4116_s23  ;;  %v4759_v4 = vpack.c.bf16 %v1344_v24, %v1344_v24  ;;  %v1236_v24 = vld [vmem:[#allocation2 + $0x9f] sm:$0xff] }
 0x1b7   : > { %1281 = vrot.lane.b32.xlu1 %v4492_v61, %s4121_s28 }
 0x1b8   : > { %1283 = vrot.lane.b32.xlu2 %v4516_v8, %s4121_s28  ;;  %v1050_v34 = vpop.permute.xlu0 %1049 }
 0x1b9   : > { %v822_v30 = vpop.permute.xlu1 %821 }
 0x1ba   : > { %868 = vst.msk [vmem:[#allocation3 + $0x8] sm:$0xf] %vm865_vm4, %v822_v30  ;;  %v1163_v43 = vpop.permute.xlu2 %1162  ;;  %v1234_v30 = vld [vmem:[#allocation2 + $0x8f] sm:$0xff] }
 0x1bb   : > { %981 = vst.msk [vmem:[#allocation3 + $0x8] sm:$0xf] %vm978_vm5, %v935_v46  ;;  %v1250_v52 = vpack.c.bf16 %v1234_v30, %v1234_v30 }
 0x1bc   : > { %1094 = vst.msk [vmem:[#allocation3 + $0x8] sm:$0xf] %vm1091_vm6, %v1048_v26 }
 0x1be   : > { %946 = vrot.lane.b32.xlu0 %v4492_v61, %s4118_s25 }
 0x1bf   : > { %1396 = vrot.lane.b32.xlu1 %v4678_v29, %s4122_s29 }
 0x1c0   : > { %1507 = vrot.lane.b32.xlu2 %v4680_v54, %s4123_s30  ;;  %v1274_v13 = vpop.permute.xlu0 %1273 }
 0x1c1   : > { %v937_v32 = vpop.permute.xlu1 %936 }
 0x1c2   : > { %982 = vst.msk [vmem:[#allocation3 + $0xc] sm:$0xf] %vm978_vm5, %v937_v32  ;;  %v1387_v3 = vpop.permute.xlu2 %1386 }
 0x1c3   : > { %1095 = vst.msk [vmem:[#allocation3 + $0xc] sm:$0xf] %vm1091_vm6, %v1050_v34 }
 0x1c4   : > { %1208 = vst.msk [vmem:[#allocation3 + $0xc] sm:$0xf] %vm1204_vm7, %v1163_v43 }
 0x1c6   : > { %1061 = vrot.lane.b32.xlu0 %v4678_v29, %s4119_s26 }
 0x1c7   : > { %833 = vrot.lane.b32.xlu1 %v4591_v50, %s4117_s24 }
 0x1c8   : > { %720 = vrot.lane.b32.xlu2 %v4617_v7, %s4116_s23  ;;  %v1389_v61 = vpop.permute.xlu0 %1388  ;;  %v4740_v7 = vpack.c.bf16 %v1456_v6, %v1456_v6 }
 0x1c9   : > { %v1161_v47 = vpop.permute.xlu1 %1160 }
 0x1ca   : > { %1207 = vst.msk [vmem:[#allocation3 + $0x8] sm:$0xf] %vm1204_vm7, %v1161_v47  ;;  %v1502_v48 = vpop.permute.xlu2 %1501  ;;  %v1346_v47 = vld [vmem:[#allocation2 + $0x88] sm:$0xff] }
 0x1cb   : > { %1320 = vst.msk [vmem:[#allocation3 + $0x8] sm:$0xf] %vm1317_vm8, %v1274_v13 }
 0x1cc   : > { %1433 = vst.msk [vmem:[#allocation3 + $0x8] sm:$0xf] %vm1430_vm9, %v1387_v3 }
 0x1ce   : > { %1285 = vrot.lane.b32.xlu0 %v4520_v38, %s4121_s28 }
 0x1cf   : > { %948 = vrot.lane.b32.xlu1 %v4516_v8, %s4118_s25 }
 0x1d0   : > { %835 = vrot.lane.b32.xlu2 %v4630_v9, %s4117_s24  ;;  %v826_v37 = vpop.permute.xlu0 %825 }
 0x1d1   : > { %v1276_v40 = vpop.permute.xlu1 %1275 }
 0x1d2   : > { %1321 = vst.msk [vmem:[#allocation3 + $0xc] sm:$0xf] %vm1317_vm8, %v1276_v40  ;;  %v715_v15 = vpop.permute.xlu2 %714 }
 0x1d3   : > { %1434 = vst.msk [vmem:[#allocation3 + $0xc] sm:$0xf] %vm1430_vm9, %v1389_v61 }
 0x1d4   : > { %1547 = vst.msk [vmem:[#allocation3 + $0xc] sm:$0xf] %vm1543_vm10, %v1502_v48  ;;  %v1233_v48 = vld [vmem:[#allocation2 + $0x87] sm:$0xff] }
 0x1d5   : > { %758 = vst.msk [vmem:[#allocation3 + $0x14] sm:$0xf] %vm752_vm3, %v715_v15  ;;  %v1249_v40 = vpack.c.bf16 %v1233_v48, %v1233_v48 }
 0x1d6   : > { %1400 = vrot.lane.b32.xlu0 %v4709_v51, %s4122_s29 }
 0x1d7   : > { %1172 = vrot.lane.b32.xlu1 %v4680_v54, %s4120_s27 }
 0x1d8   : > { %1059 = vrot.lane.b32.xlu2 %v4649_v17, %s4119_s26  ;;  %v941_v8 = vpop.permute.xlu0 %940 }
 0x1d9   : > { %v1500_v35 = vpop.permute.xlu1 %1499 }
 0x1da   : > { %1546 = vst.msk [vmem:[#allocation3 + $0x8] sm:$0xf] %vm1543_vm10, %v1500_v35  ;;  %v939_v39 = vpop.permute.xlu2 %938  ;;  %v1460_v35 = vld [vmem:[#allocation2 + $0x91] sm:$0xff] }
 0x1de   : > { %724 = vrot.lane.b32.xlu0 %v4649_v17, %s4116_s23  ;;  %v1361_v17 = vpack.c.bf16 %v1345_v16, %v1345_v16 }
 0x1df   : > { %1287 = vrot.lane.b32.xlu1 %v4512_v5, %s4121_s28 }
 0x1e0   : > { %1174 = vrot.lane.b32.xlu2 %v4662_v22, %s4120_s27  ;;  %v1165_v41 = vpop.permute.xlu0 %1164 }
 0x1e1   : > { %v713_v42 = vpop.permute.xlu1 %712  ;;  %v3848_v50 = vld [vmem:[#allocation3 + $0x8] sm:$0xff] }
 0x1e2   : > { %757 = vst.msk [vmem:[#allocation3 + $0x10] sm:$0xf] %vm752_vm3, %v713_v42  ;;  %v1054_v55 = vpop.permute.xlu2 %1053  ;;  %1701 = vmatmul.bf16.gmra.mxu0 %v3848_v50 }
 0x1e3   : > { %870 = vst.msk [vmem:[#allocation3 + $0x10] sm:$0xf] %vm865_vm4, %v826_v37  ;;  %v1362_v37 = vpack.c.bf16 %v1346_v47, %v1346_v47 }
 0x1e4   : > { %983 = vst.msk [vmem:[#allocation3 + $0x10] sm:$0xf] %vm978_vm5, %v939_v39  ;;  %v1347_v39 = vld [vmem:[#allocation2 + $0x90] sm:$0xff] }
 0x1e5   : > { %v1363_v42 = vpack.c.bf16 %v1347_v39, %v1347_v39 }
 0x1e6   : > { %839 = vrot.lane.b32.xlu0 %v4662_v22, %s4117_s24  ;;  %v1457_v22 = vld [vmem:[#allocation2 + $0x79] sm:$0xff] }
 0x1e7   : > { %1511 = vrot.lane.b32.xlu1 %v1471_v27, %s4123_s30  ;;  %v4787_v46 = vpack.c.bf16 %v1457_v22, %v1457_v22  ;;  %v200_v22 = vld [vmem:[%s5975_s3 + $0x8] sm:$0xff] }
 0x1e8   : > { %1398 = vrot.lane.b32.xlu2 %v4730_v57, %s4122_s29  ;;  %v1280_v58 = vpop.permute.xlu0 %1279 }
 0x1e9   : > { %v828_v59 = vpop.permute.xlu1 %827 }
 0x1ea   : > { %871 = vst.msk [vmem:[#allocation3 + $0x14] sm:$0xf] %vm865_vm4, %v828_v59  ;;  %v1278_v60 = vpop.permute.xlu2 %1277 }
 0x1eb   : > { %984 = vst.msk [vmem:[#allocation3 + $0x14] sm:$0xf] %vm978_vm5, %v941_v8 }
 0x1ec   : > { %1097 = vst.msk [vmem:[#allocation3 + $0x14] sm:$0xf] %vm1091_vm6, %v1054_v55 }
 0x1ee   : > { %1063 = vrot.lane.b32.xlu0 %v4730_v57, %s4119_s26 }
 0x1ef   : > { %726 = vrot.lane.b32.xlu1 %v4678_v29, %s4116_s23 }
 0x1f0   : > { %1513 = vrot.lane.b32.xlu2 %v4740_v7, %s4123_s30  ;;  %v1504_v33 = vpop.permute.xlu0 %1503 }
 0x1f1   : > { %v1052_v62 = vpop.permute.xlu1 %1051 }
 0x1f2   : > { %1096 = vst.msk [vmem:[#allocation3 + $0x10] sm:$0xf] %vm1091_vm6, %v1052_v62  ;;  %v1393_v31 = vpop.permute.xlu2 %1392 }
 0x1f3   : > { %1209 = vst.msk [vmem:[#allocation3 + $0x10] sm:$0xf] %vm1204_vm7, %v1165_v41  ;;  %v1476_v41 = vpack.c.bf16 %v1460_v35, %v1460_v35 }
 0x1f4   : > { %1322 = vst.msk [vmem:[#allocation3 + $0x10] sm:$0xf] %vm1317_vm8, %v1278_v60 }
 0x1f6   : > { %1178 = vrot.lane.b32.xlu0 %v4740_v7, %s4120_s27 }
 0x1f7   : > { %950 = vrot.lane.b32.xlu1 %v4520_v38, %s4118_s25 }
 0x1f8   : > { %837 = vrot.lane.b32.xlu2 %v4680_v54, %s4117_s24  ;;  %v717_v63 = vpop.permute.xlu0 %716  ;;  %v1459_v54 = vld [vmem:[#allocation2 + $0x89] sm:$0xff] }
 0x1f9   : > { %759 = vst.msk [vmem:[#allocation3 + $0x18] sm:$0xf] %vm752_vm3, %v717_v63  ;;  %v1167_v23 = vpop.permute.xlu1 %1166  ;;  %v1475_v32 = vpack.c.bf16 %v1459_v54, %v1459_v54  ;;  %v203_v54 = vld [vmem:[%s5975_s3 + $0x20] sm:$0xff] }
 0x1fa   : > { %v830_v9 = vpop.permute.xlu2 %829  ;;  %1210 = vst.msk [vmem:[#allocation3 + $0x14] sm:$0xf] %vm1204_vm7, %v1167_v23 }
 0x1fb   : > { %872 = vst.msk [vmem:[#allocation3 + $0x18] sm:$0xf] %vm865_vm4, %v830_v9  ;;  %v199_v9 = vld [vmem:[%s5975_s3] sm:$0xff] }
 0x1fc   : > { %1323 = vst.msk [vmem:[#allocation3 + $0x14] sm:$0xf] %vm1317_vm8, %v1280_v58 }
 0x1fd   : > { %1436 = vst.msk [vmem:[#allocation3 + $0x14] sm:$0xf] %vm1430_vm9, %v1393_v31 }
 0x1fe   : > { %1402 = vrot.lane.b32.xlu0 %v4759_v4, %s4122_s29 }
 0x1ff   : > { %1065 = vrot.lane.b32.xlu1 %v4709_v51, %s4119_s26 }
 0x200   : > { %952 = vrot.lane.b32.xlu2 %v4512_v5, %s4118_s25  ;;  %v832_v38 = vpop.permute.xlu0 %831 }
 0x201   : > { %v1391_v10 = vpop.permute.xlu1 %1390 }
 0x202   : > { %1435 = vst.msk [vmem:[#allocation3 + $0x10] sm:$0xf] %vm1430_vm9, %v1391_v10  ;;  %v945_v1 = vpop.permute.xlu2 %944 }
 0x203   : > { %1548 = vst.msk [vmem:[#allocation3 + $0x10] sm:$0xf] %vm1543_vm10, %v1504_v33 }
 0x206   : > { %1517 = vrot.lane.b32.xlu0 %v4770_v11, %s4123_s30 }
 0x207   : > { %1289 = vrot.lane.b32.xlu1 %v4525_v28, %s4121_s28 }
 0x208   : > { %1176 = vrot.lane.b32.xlu2 %v1471_v27, %s4120_s27  ;;  %v1056_v0 = vpop.permute.xlu0 %1055 }
 0x209   : > { %v1506_v5 = vpop.permute.xlu1 %1505 }
 0x20a   : > { %1549 = vst.msk [vmem:[#allocation3 + $0x14] sm:$0xf] %vm1543_vm10, %v1506_v5  ;;  %v1169_v12 = vpop.permute.xlu2 %1168  ;;  %v1348_v5 = vld [vmem:[#allocation2 + $0x98] sm:$0xff] }
 0x20b   : > { %v1364_v16 = vpack.c.bf16 %v1348_v5, %v1348_v5 }
 0x20e   : > { %841 = vrot.lane.b32.xlu0 %v1471_v27, %s4117_s24 }
 0x20f   : > { %1404 = vrot.lane.b32.xlu1 %v1361_v17, %s4122_s29 }
 0x210   : > { %1291 = vrot.lane.b32.xlu2 %v4533_v44, %s4121_s28  ;;  %v1171_v2 = vpop.permute.xlu0 %1170 }
 0x211   : > { %v719_v18 = vpop.permute.xlu1 %718  ;;  %v3849_v21 = vld [vmem:[#allocation3 + $0x10] sm:$0xff] }
 0x212   : > { %760 = vst.msk [vmem:[#allocation3 + $0x1c] sm:$0xf] %vm752_vm3, %v719_v18  ;;  %v1284_v36 = vpop.permute.xlu2 %1283  ;;  %1706 = vmatmul.bf16.gmra.mxu0 %v3849_v21  ;;  %v207_v21 = vld [vmem:[%s5975_s3 + $0x40] sm:$0xff] }
 0x213   : > { %873 = vst.msk [vmem:[#allocation3 + $0x1c] sm:$0xf] %vm865_vm4, %v832_v38 }
 0x214   : > { %986 = vst.msk [vmem:[#allocation3 + $0x1c] sm:$0xf] %vm978_vm5, %v945_v1 }
 0x216   : > { %956 = vrot.lane.b32.xlu0 %v4533_v44, %s4118_s25 }
 0x217   : > { %728 = vrot.lane.b32.xlu1 %v4730_v57, %s4116_s23  ;;  %v1235_v57 = vld [vmem:[#allocation2 + $0x97] sm:$0xff] }
 0x218   : > { %1515 = vrot.lane.b32.xlu2 %v4787_v46, %s4123_s30  ;;  %v1395_v45 = vpop.permute.xlu0 %1394  ;;  %v1251_v59 = vpack.c.bf16 %v1235_v57, %v1235_v57 }
 0x219   : > { %v943_v26 = vpop.permute.xlu1 %942 }
 0x21a   : > { %v1508_v25 = vpop.permute.xlu2 %1507  ;;  %985 = vst.msk [vmem:[#allocation3 + $0x18] sm:$0xf] %vm978_vm5, %v943_v26 }
 0x21b   : > { %1098 = vst.msk [vmem:[#allocation3 + $0x18] sm:$0xf] %vm1091_vm6, %v1056_v0  ;;  %v204_v0 = vld [vmem:[%s5975_s3 + $0x28] sm:$0xff] }
 0x21c   : > { %1211 = vst.msk [vmem:[#allocation3 + $0x18] sm:$0xf] %vm1204_vm7, %v1169_v12 }
 0x21e   : > { %1180 = vrot.lane.b32.xlu0 %v4787_v46, %s4120_s27 }
 0x21f   : > { %843 = vrot.lane.b32.xlu1 %v4740_v7, %s4117_s24  ;;  %v1349_v7 = vld [vmem:[#allocation2 + $0xa0] sm:$0xff] }
 0x220   : > { %730 = vrot.lane.b32.xlu2 %v4709_v51, %s4116_s23  ;;  %v1510_v44 = vpop.permute.xlu0 %1509  ;;  %v1365_v62 = vpack.c.bf16 %v1349_v7, %v1349_v7 }
 0x221   : > { %v1058_v34 = vpop.permute.xlu1 %1057 }
 0x222   : > { %1099 = vst.msk [vmem:[#allocation3 + $0x1c] sm:$0xf] %vm1091_vm6, %v1058_v34  ;;  %v721_v43 = vpop.permute.xlu2 %720  ;;  %v201_v34 = vld [vmem:[%s5975_s3 + $0x10] sm:$0xff] }
 0x223   : > { %1212 = vst.msk [vmem:[#allocation3 + $0x1c] sm:$0xf] %vm1204_vm7, %v1171_v2 }
 0x224   : > { %1325 = vst.msk [vmem:[#allocation3 + $0x1c] sm:$0xf] %vm1317_vm8, %v1284_v36  ;;  %v1462_v36 = vld [vmem:[#allocation2 + $0xa1] sm:$0xff] }
 0x225   : > { %761 = vst.msk [vmem:[#allocation3 + $0x20] sm:$0xf] %vm752_vm3, %v721_v43 }
 0x226   : > { %1295 = vrot.lane.b32.xlu0 %v1250_v52, %s4121_s28 }
 0x227   : > { %1067 = vrot.lane.b32.xlu1 %v4759_v4, %s4119_s26 }
 0x228   : > { %954 = vrot.lane.b32.xlu2 %v4525_v28, %s4118_s25  ;;  %v723_v53 = vpop.permute.xlu0 %722 }
 0x229   : > { %v1282_v29 = vpop.permute.xlu1 %1281  ;;  %762 = vst.msk [vmem:[#allocation3 + $0x24] sm:$0xf] %vm752_vm3, %v723_v53  ;;  %v205_v53 = vld [vmem:[%s5975_s3 + $0x30] sm:$0xff] }
 0x22a   : > { %1324 = vst.msk [vmem:[#allocation3 + $0x18] sm:$0xf] %vm1317_vm8, %v1282_v29  ;;  %v836_v13 = vpop.permute.xlu2 %835  ;;  %v210_v29 = vld [vmem:[%s5975_s3 + $0x58] sm:$0xff] }
 0x22b   : > { %1437 = vst.msk [vmem:[#allocation3 + $0x18] sm:$0xf] %vm1430_vm9, %v1395_v45 }
 0x22c   : > { %1550 = vst.msk [vmem:[#allocation3 + $0x18] sm:$0xf] %vm1543_vm10, %v1508_v25 }
 0x22d   : > { %875 = vst.msk [vmem:[#allocation3 + $0x24] sm:$0xf] %vm865_vm4, %v836_v13 }
 0x22e   : > { %1519 = vrot.lane.b32.xlu0 %v1475_v32, %s4123_s30 }
 0x22f   : > { %1182 = vrot.lane.b32.xlu1 %v4770_v11, %s4120_s27 }
 0x230   : > { %1069 = vrot.lane.b32.xlu2 %v1361_v17, %s4119_s26  ;;  %v947_v28 = vpop.permute.xlu0 %946  ;;  %v4954_v5 = vpop.f32.mrf.mxu0 }
 0x231   : > { %v1397_v3 = vpop.permute.xlu1 %1396 }
 0x232   : > { %1438 = vst.msk [vmem:[#allocation3 + $0x1c] sm:$0xf] %vm1430_vm9, %v1397_v3  ;;  %v1060_v61 = vpop.permute.xlu2 %1059  ;;  %v208_v3 = vld [vmem:[%s5975_s3 + $0x48] sm:$0xff] }
 0x233   : > { %1551 = vst.msk [vmem:[#allocation3 + $0x1c] sm:$0xf] %vm1543_vm10, %v1510_v44  ;;  %v202_v44 = vld [vmem:[%s5975_s3 + $0x18] sm:$0xff] }
 0x236   : > { %734 = vrot.lane.b32.xlu0 %v1361_v17, %s4116_s23 }
 0x237   : > { %1406 = vrot.lane.b32.xlu1 %v1362_v37, %s4122_s29 }
 0x238   : > { %1293 = vrot.lane.b32.xlu2 %v1249_v40, %s4121_s28  ;;  %v1062_v14 = vpop.permute.xlu0 %1061 }
 0x239   : > { %v834_v15 = vpop.permute.xlu1 %833 }
 0x23a   : > { %874 = vst.msk [vmem:[#allocation3 + $0x20] sm:$0xf] %vm865_vm4, %v834_v15  ;;  %v1175_v51 = vpop.permute.xlu2 %1174  ;;  %v3850_v8 = vld [vmem:[#allocation3 + $0x18] sm:$0xff] }
 0x23b   : > { %987 = vst.msk [vmem:[#allocation3 + $0x20] sm:$0xf] %vm978_vm5, %v947_v28  ;;  %1711 = vmatmul.bf16.gmra.mxu0 %v3850_v8 }
 0x23c   : > { %1100 = vst.msk [vmem:[#allocation3 + $0x20] sm:$0xf] %vm1091_vm6, %v1060_v61  ;;  %v206_v61 = vld [vmem:[%s5975_s3 + $0x38] sm:$0xff] }
 0x23e   : > { %958 = vrot.lane.b32.xlu0 %v1249_v40, %s4118_s25 }
 0x23f   : > { %1521 = vrot.lane.b32.xlu1 %v1476_v41, %s4123_s30 }
 0x240   : > { %1408 = vrot.lane.b32.xlu2 %v1363_v42, %s4122_s29  ;;  %v1286_v50 = vpop.permute.xlu0 %1285 }
 0x241   : > { %v949_v55 = vpop.permute.xlu1 %948 }
 0x242   : > { %988 = vst.msk [vmem:[#allocation3 + $0x24] sm:$0xf] %vm978_vm5, %v949_v55  ;;  %v1399_v19 = vpop.permute.xlu2 %1398 }
 0x243   : > { %1101 = vst.msk [vmem:[#allocation3 + $0x24] sm:$0xf] %vm1091_vm6, %v1062_v14  ;;  %v209_v14 = vld [vmem:[%s5975_s3 + $0x50] sm:$0xff] }
 0x244   : > { %1214 = vst.msk [vmem:[#allocation3 + $0x24] sm:$0xf] %vm1204_vm7, %v1175_v51 }
 0x246   : > { %1073 = vrot.lane.b32.xlu0 %v1363_v42, %s4119_s26 }
 0x247   : > { %845 = vrot.lane.b32.xlu1 %v4787_v46, %s4117_s24  ;;  %v1478_v46 = vpack.c.bf16 %v1462_v36, %v1462_v36 }
 0x248   : > { %732 = vrot.lane.b32.xlu2 %v4759_v4, %s4116_s23  ;;  %v1401_v56 = vpop.permute.xlu0 %1400  ;;  %v1252_v4 = vpack.c.bf16 %v1236_v24, %v1236_v24  ;;  %v212_v24 = vld [vmem:[%s5975_s3 + $0x68] sm:$0xff] }
 0x249   : > { %v1173_v27 = vpop.permute.xlu1 %1172 }
 0x24a   : > { %1213 = vst.msk [vmem:[#allocation3 + $0x20] sm:$0xf] %vm1204_vm7, %v1173_v27  ;;  %v1514_v58 = vpop.permute.xlu2 %1513 }
 0x24b   : > { %1326 = vst.msk [vmem:[#allocation3 + $0x20] sm:$0xf] %vm1317_vm8, %v1286_v50 }
 0x24c   : > { %1439 = vst.msk [vmem:[#allocation3 + $0x20] sm:$0xf] %vm1430_vm9, %v1399_v19  ;;  %v211_v19 = vld [vmem:[%s5975_s3 + $0x60] sm:$0xff] }
 0x24e   : > { %1297 = vrot.lane.b32.xlu0 %v1251_v59, %s4121_s28 }
 0x24f   : > { %960 = vrot.lane.b32.xlu1 %v1250_v52, %s4118_s25 }
 0x250   : > { %847 = vrot.lane.b32.xlu2 %v4770_v11, %s4117_s24  ;;  %v725_v60 = vpop.permute.xlu0 %724  ;;  %v1461_v11 = vld [vmem:[#allocation2 + $0x99] sm:$0xff] }
 0x251   : > { %v1288_v6 = vpop.permute.xlu1 %1287  ;;  %763 = vst.msk [vmem:[#allocation3 + $0x28] sm:$0xf] %vm752_vm3, %v725_v60  ;;  %v1477_v12 = vpack.c.bf16 %v1461_v11, %v1461_v11 }
 0x252   : > { %1327 = vst.msk [vmem:[#allocation3 + $0x24] sm:$0xf] %vm1317_vm8, %v1288_v6  ;;  %v838_v33 = vpop.permute.xlu2 %837  ;;  %v213_v6 = vld [vmem:[%s5975_s3 + $0x70] sm:$0xff] }
 0x253   : > { %1440 = vst.msk [vmem:[#allocation3 + $0x24] sm:$0xf] %vm1430_vm9, %v1401_v56 }
 0x254   : > { %1553 = vst.msk [vmem:[#allocation3 + $0x24] sm:$0xf] %vm1543_vm10, %v1514_v58  ;;  %v214_v58 = vld [vmem:[%s5975_s3 + $0x78] sm:$0xff] }
 0x255   : > { %876 = vst.msk [vmem:[#allocation3 + $0x28] sm:$0xf] %vm865_vm4, %v838_v33 }
 0x256   : > { %1412 = vrot.lane.b32.xlu0 %v1365_v62, %s4122_s29 }
 0x257   : > { %1184 = vrot.lane.b32.xlu1 %v1475_v32, %s4120_s27 }
 0x258   : > { %1071 = vrot.lane.b32.xlu2 %v1362_v37, %s4119_s26  ;;  %v840_v31 = vpop.permute.xlu0 %839 }
 0x259   : > { %v1512_v63 = vpop.permute.xlu1 %1511 }
 0x25a   : > { %1552 = vst.msk [vmem:[#allocation3 + $0x20] sm:$0xf] %vm1543_vm10, %v1512_v63  ;;  %v953_v23 = vpop.permute.xlu2 %952 }
 0x25e   : > { %1739 = vperm.xlu0 %4098, %v199_v9  }
 0x25f   : > { %1299 = vrot.lane.b32.xlu1 %v1252_v4, %s4121_s28 }
 0x260   : > { %1186 = vrot.lane.b32.xlu2 %v1476_v41, %s4120_s27  ;;  %v1064_v38 = vpop.permute.xlu0 %1063 }
 0x261   : > { %v727_v10 = vpop.permute.xlu1 %726  ;;  %v3851_v20 = vld [vmem:[#allocation3 + $0x20] sm:$0xff] }
 0x262   : > { %764 = vst.msk [vmem:[#allocation3 + $0x2c] sm:$0xf] %vm752_vm3, %v727_v10  ;;  %v1177_v1 = vpop.permute.xlu2 %1176  ;;  %1716 = vmatmul.bf16.gmra.mxu0 %v3851_v20 }
 0x263   : > { %877 = vst.msk [vmem:[#allocation3 + $0x2c] sm:$0xf] %vm865_vm4, %v840_v31 }
 0x264   : > { %990 = vst.msk [vmem:[#allocation3 + $0x2c] sm:$0xf] %vm978_vm5, %v953_v23 }
 0x266   : > { %1764 = vperm.xlu0 %4098, %v204_v0  }
 0x267   : > { %1523 = vrot.lane.b32.xlu1 %v1477_v12, %s4123_s30  ;;  %v4956_v12 = vpop.f32.mrf.mxu0 }
 0x268   : > { %1410 = vrot.lane.b32.xlu2 %v1364_v16, %s4122_s29  ;;  %v1179_v17 = vpop.permute.xlu0 %1178 }
 0x269   : > { %v951_v2 = vpop.permute.xlu1 %950 }
 0x26a   : > { %989 = vst.msk [vmem:[#allocation3 + $0x28] sm:$0xf] %vm978_vm5, %v951_v2  ;;  %v1292_v18 = vpop.permute.xlu2 %1291 }
 0x26b   : > { %1102 = vst.msk [vmem:[#allocation3 + $0x28] sm:$0xf] %vm1091_vm6, %v1064_v38 }
 0x26c   : > { %1215 = vst.msk [vmem:[#allocation3 + $0x28] sm:$0xf] %vm1204_vm7, %v1177_v1 }
 0x26e   : > { %1779 = vperm.xlu0 %4098, %v207_v21  }
 0x26f   : > { %1744 = vperm.xlu1 %4099, %v200_v22   ;;  %v4958_v16 = vpop.f32.mrf.mxu0 }
 0x270   : > { %1525 = vrot.lane.b32.xlu2 %v1478_v46, %s4123_s30  ;;  %v1403_v45 = vpop.permute.xlu0 %1402 }
 0x271   : > { %v1066_v26 = vpop.permute.xlu1 %1065 }
 0x272   : > { %1103 = vst.msk [vmem:[#allocation3 + $0x2c] sm:$0xf] %vm1091_vm6, %v1066_v26  ;;  %v1516_v25 = vpop.permute.xlu2 %1515 }
 0x273   : > { %1216 = vst.msk [vmem:[#allocation3 + $0x2c] sm:$0xf] %vm1204_vm7, %v1179_v17 }
 0x274   : > { %1329 = vst.msk [vmem:[#allocation3 + $0x2c] sm:$0xf] %vm1317_vm8, %v1292_v18 }
 0x276   : > { %1794 = vperm.xlu0 %4098, %v210_v29  }
 0x277   : > { %1754 = vperm.xlu1 %4099, %v202_v44   ;;  %v4960_v17 = vpop.f32.mrf.mxu0 }
 0x278   : > { %1749 = vperm.xlu2 %4100, %v201_v34   ;;  %v1518_v30 = vpop.permute.xlu0 %1517 }
 0x279   : > { %v1290_v43 = vpop.permute.xlu1 %1289 }
 0x27a   : > { %1328 = vst.msk [vmem:[#allocation3 + $0x28] sm:$0xf] %vm1317_vm8, %v1290_v43  ;;  %v731_v52 = vpop.permute.xlu2 %730 }
 0x27b   : > { %1441 = vst.msk [vmem:[#allocation3 + $0x28] sm:$0xf] %vm1430_vm9, %v1403_v45 }
 0x27c   : > { %1554 = vst.msk [vmem:[#allocation3 + $0x28] sm:$0xf] %vm1543_vm10, %v1516_v25 }
 0x27d   : > { %766 = vst.msk [vmem:[#allocation3 + $0x34] sm:$0xf] %vm752_vm3, %v731_v52 }
 0x27e   : > { %1809 = vperm.xlu0 %4098, %v213_v6  }
 0x27f   : > { %1769 = vperm.xlu1 %4099, %v205_v53  }
 0x280   : > { %1759 = vperm.xlu2 %4100, %v203_v54   ;;  %v842_v13 = vpop.permute.xlu0 %841 }
 0x281   : > { %v1405_v32 = vpop.permute.xlu1 %1404 }
 0x282   : > { %1442 = vst.msk [vmem:[#allocation3 + $0x2c] sm:$0xf] %vm1430_vm9, %v1405_v32  ;;  %v955_v28 = vpop.permute.xlu2 %954 }
 0x283   : > { %1555 = vst.msk [vmem:[#allocation3 + $0x2c] sm:$0xf] %vm1543_vm10, %v1518_v30 }
 0x287   : > { %1784 = vperm.xlu1 %4099, %v208_v3  }
 0x288   : > { %1774 = vperm.xlu2 %4100, %v206_v61   ;;  %v957_v47 = vpop.permute.xlu0 %956 }
 0x289   : > { %v729_v48 = vpop.permute.xlu1 %728 }
 0x28a   : > { %765 = vst.msk [vmem:[#allocation3 + $0x30] sm:$0xf] %vm752_vm3, %v729_v48  ;;  %v1070_v37 = vpop.permute.xlu2 %1069  ;;  %v3852_v40 = vld [vmem:[#allocation3 + $0x28] sm:$0xff] }
 0x28b   : > { %878 = vst.msk [vmem:[#allocation3 + $0x30] sm:$0xf] %vm865_vm4, %v842_v13  ;;  %1721 = vmatmul.bf16.gmra.mxu0 %v3852_v40 }
 0x28c   : > { %991 = vst.msk [vmem:[#allocation3 + $0x30] sm:$0xf] %vm978_vm5, %v955_v28 }
 0x28f   : > { %1799 = vperm.xlu1 %4099, %v211_v19   ;;  %v4962_v2 = vpop.f32.mrf.mxu0 }
 0x290   : > { %v1181_v15 = vpop.permute.xlu0 %1180  ;;  %1789 = vperm.xlu2 %4100, %v209_v14  }
 0x291   : > { %v844_v51 = vpop.permute.xlu1 %843 }
 0x292   : > { %879 = vst.msk [vmem:[#allocation3 + $0x34] sm:$0xf] %vm865_vm4, %v844_v51  ;;  %v1294_v8 = vpop.permute.xlu2 %1293 }
 0x293   : > { %992 = vst.msk [vmem:[#allocation3 + $0x34] sm:$0xf] %vm978_vm5, %v957_v47 }
 0x294   : > { %1105 = vst.msk [vmem:[#allocation3 + $0x34] sm:$0xf] %vm1091_vm6, %v1070_v37 }
 0x297   : > { %1814 = vperm.xlu1 %4099, %v214_v58   ;;  %v4964_v18 = vpop.f32.mrf.mxu0 }
 0x298   : > { %v1296_v35 = vpop.permute.xlu0 %1295  ;;  %1804 = vperm.xlu2 %4100, %v212_v24  }
 0x299   : > { %v1068_v39 = vpop.permute.xlu1 %1067 }
 0x29a   : > { %1104 = vst.msk [vmem:[#allocation3 + $0x30] sm:$0xf] %vm1091_vm6, %v1068_v39  ;;  %v1409_v41 = vpop.permute.xlu2 %1408 }
 0x29b   : > { %1217 = vst.msk [vmem:[#allocation3 + $0x30] sm:$0xf] %vm1204_vm7, %v1181_v15 }
 0x29c   : > { %1330 = vst.msk [vmem:[#allocation3 + $0x30] sm:$0xf] %vm1317_vm8, %v1294_v8 }
 0x2a0   : > { %v1520_v42 = vpop.permute.xlu0 %1519 }
 0x2a1   : > { %v1183_v50 = vpop.permute.xlu1 %1182 }
 0x2a2   : > { %1218 = vst.msk [vmem:[#allocation3 + $0x34] sm:$0xf] %vm1204_vm7, %v1183_v50  ;;  %v733_v55 = vpop.permute.xlu2 %732 }
 0x2a3   : > { %1331 = vst.msk [vmem:[#allocation3 + $0x34] sm:$0xf] %vm1317_vm8, %v1296_v35 }
 0x2a4   : > { %1444 = vst.msk [vmem:[#allocation3 + $0x34] sm:$0xf] %vm1430_vm9, %v1409_v41 }
 0x2a5   : > { %767 = vst.msk [vmem:[#allocation3 + $0x38] sm:$0xf] %vm752_vm3, %v733_v55 }
 0x2a8   : > { %v735_v56 = vpop.permute.xlu0 %734 }
 0x2a9   : > { %v1407_v27 = vpop.permute.xlu1 %1406  ;;  %768 = vst.msk [vmem:[#allocation3 + $0x3c] sm:$0xf] %vm752_vm3, %v735_v56 }
 0x2aa   : > { %1443 = vst.msk [vmem:[#allocation3 + $0x30] sm:$0xf] %vm1430_vm9, %v1407_v27  ;;  %v848_v57 = vpop.permute.xlu2 %847 }
 0x2ab   : > { %1556 = vst.msk [vmem:[#allocation3 + $0x30] sm:$0xf] %vm1543_vm10, %v1520_v42 }
 0x2ac   : > { %881 = vst.msk [vmem:[#allocation3 + $0x3c] sm:$0xf] %vm865_vm4, %v848_v57 }
 0x2b0   : > { %v959_v60 = vpop.permute.xlu0 %958 }
 0x2b1   : > { %v1522_v59 = vpop.permute.xlu1 %1521 }
 0x2b2   : > { %1557 = vst.msk [vmem:[#allocation3 + $0x34] sm:$0xf] %vm1543_vm10, %v1522_v59  ;;  %v1072_v7 = vpop.permute.xlu2 %1071 }
 0x2b8   : > { %v1074_v31 = vpop.permute.xlu0 %1073  ;;  %v4966_v21 = vpop.f32.mrf.mxu0 }
 0x2b9   : > { %v846_v33 = vpop.permute.xlu1 %845  ;;  %v3853_v62 = vld [vmem:[#allocation3 + $0x30] sm:$0xff] }
 0x2ba   : > { %880 = vst.msk [vmem:[#allocation3 + $0x38] sm:$0xf] %vm865_vm4, %v846_v33  ;;  %1726 = vmatmul.bf16.gmra.mxu0 %v3853_v62  ;;  %v1187_v63 = vpop.permute.xlu2 %1186 }
 0x2bb   : > { %993 = vst.msk [vmem:[#allocation3 + $0x38] sm:$0xf] %vm978_vm5, %v959_v60 }
 0x2bc   : > { %1106 = vst.msk [vmem:[#allocation3 + $0x38] sm:$0xf] %vm1091_vm6, %v1072_v7 }
 0x2c0   : > { %v1298_v9 = vpop.permute.xlu0 %1297  ;;  %v4968_v36 = vpop.f32.mrf.mxu0 }
 0x2c1   : > { %v961_v23 = vpop.permute.xlu1 %960 }
 0x2c2   : > { %994 = vst.msk [vmem:[#allocation3 + $0x3c] sm:$0xf] %vm978_vm5, %v961_v23  ;;  %v1411_v4 = vpop.permute.xlu2 %1410 }
 0x2c3   : > { %1107 = vst.msk [vmem:[#allocation3 + $0x3c] sm:$0xf] %vm1091_vm6, %v1074_v31 }
 0x2c4   : > { %1220 = vst.msk [vmem:[#allocation3 + $0x3c] sm:$0xf] %vm1204_vm7, %v1187_v63 }
 0x2c8   : > { %v1413_v20 = vpop.permute.xlu0 %1412 }
 0x2c9   : > { %v1185_v38 = vpop.permute.xlu1 %1184 }
 0x2ca   : > { %1219 = vst.msk [vmem:[#allocation3 + $0x38] sm:$0xf] %vm1204_vm7, %v1185_v38  ;;  %v1526_v1 = vpop.permute.xlu2 %1525 }
 0x2cb   : > { %1332 = vst.msk [vmem:[#allocation3 + $0x38] sm:$0xf] %vm1317_vm8, %v1298_v9 }
 0x2cc   : > { %1445 = vst.msk [vmem:[#allocation3 + $0x38] sm:$0xf] %vm1430_vm9, %v1411_v4 }
 0x2d0   : > { %v4980_v44 = vpop.permute.xlu0 %1739 }
 0x2d1   : > { %v1300_v10 = vpop.permute.xlu1 %1299  ;;  %v1817_v43 = vmul.f32 %v4980_v44, %v4954_v5 }
 0x2d2   : > { %1333 = vst.msk [vmem:[#allocation3 + $0x3c] sm:$0xf] %vm1317_vm8, %v1300_v10  ;;  %v4976_v26 = vpop.permute.xlu2 %1749 }
 0x2d3   : > { %1446 = vst.msk [vmem:[#allocation3 + $0x3c] sm:$0xf] %vm1430_vm9, %v1413_v20  ;;  %v1819_v54 = vmul.f32 %v4976_v26, %v4958_v16 }
 0x2d4   : > { %1559 = vst.msk [vmem:[#allocation3 + $0x3c] sm:$0xf] %vm1543_vm10, %v1526_v1 }
 0x2d8   : > { %v4996_v28 = vpop.permute.xlu0 %1764 }
 0x2d9   : > { %v1524_v11 = vpop.permute.xlu1 %1523  ;;  %v1822_v14 = vmul.f32 %v4996_v28, %v4964_v18 }
 0x2da   : > { %1558 = vst.msk [vmem:[#allocation3 + $0x38] sm:$0xf] %vm1543_vm10, %v1524_v11  ;;  %v4988_v53 = vpop.permute.xlu2 %1759 }
 0x2db   : > { %v1821_v47 = vmul.f32 %v4988_v53, %v4962_v2 }
 0x2df   : > { %v4970_v22 = vpop.f32.mrf.mxu0 }
 0x2e0   : > { %v5010_v8 = vpop.permute.xlu0 %1779 }
 0x2e1   : > { %v3854_v0 = vld [vmem:[#allocation3 + $0x38] sm:$0xff]  ;;  %v4974_v45 = vpop.permute.xlu1 %1744  ;;  %v1825_v19 = vmul.f32 %v5010_v8, %v4970_v22 }
 0x2e2   : > { %1731 = vmatmul.bf16.gmra.mxu0 %v3854_v0  ;;  %v1818_v34 = vmul.f32 %v4974_v45, %v4956_v12  ;;  %v5004_v40 = vpop.permute.xlu2 %1774 }
 0x2e3   : > { %v1824_v41 = vmul.f32 %v5004_v40, %v4968_v36 }
 0x2e4   : > { %v1833_v52 = vadd.f32 %v1818_v34, %v1817_v43 }
 0x2e6   : > { %v1834_v32 = vadd.f32 %v1833_v52, %v1819_v54 }
 0x2e7   : > { %v4972_v46 = vpop.f32.mrf.mxu0 }
 0x2e8   : > { %v5024_v27 = vpop.permute.xlu0 %1794 }
 0x2e9   : > { %v4984_v30 = vpop.permute.xlu1 %1754 }
 0x2ea   : > { %v1820_v13 = vmul.f32 %v4984_v30, %v4960_v17  ;;  %v5016_v42 = vpop.permute.xlu2 %1789 }
 0x2ec   : > { %v1835_v3 = vadd.f32 %v1834_v32, %v1820_v13 }
 0x2ee   : > { %v1836_v37 = vadd.f32 %v1835_v3, %v1821_v47 }
 0x2f0   : > { %v1837_v51 = vadd.f32 %v1836_v37, %v1822_v14  ;;  %v5040_v24 = vpop.permute.xlu0 %1809 }
 0x2f1   : > { %v4998_v61 = vpop.permute.xlu1 %1769  ;;  %5984 = vst [vmem:[#allocation7_spill] sm:$0xff] %v5040_v24 }
 0x2f2   : > { %v1823_v15 = vmul.f32 %v4998_v61, %v4966_v21  ;;  %v5032_v7 = vpop.permute.xlu2 %1804 }
 0x2f3   : > { %5983 = vst [vmem:[#allocation6_spill] sm:$0xff] %v5032_v7 }
 0x2f4   : > { %v1838_v35 = vadd.f32 %v1837_v51, %v1823_v15 }
 0x2f6   : > { %v1839_v55 = vadd.f32 %v1838_v35, %v1824_v41 }
 0x2f8   : > { %v1840_v58 = vadd.f32 %v1839_v55, %v1825_v19 }
 0x2f9   : > { %v5012_v39 = vpop.permute.xlu1 %1784 }
 0x2fa   : > { %v1826_v56 = vmul.f32 %v5012_v39, %v4972_v46 }
 0x2fc   : > { %v1841_v60 = vadd.f32 %v1840_v58, %v1826_v56 }
 0x301   : > { %v5028_v59 = vpop.permute.xlu1 %1799 }
 0x308   : > { %v4978_v25 = vpop.f32.mrf.mxu0 }
 0x309   : > { %v1827_v57 = vmul.f32 %v5016_v42, %v4978_v25  ;;  %v5044_v10 = vpop.permute.xlu1 %1814 }
 0x30a   : > { %5985 = vst [vmem:[#allocation8_spill] sm:$0xff] %v5044_v10 }
 0x30b   : > { %v1842_v62 = vadd.f32 %v1841_v60, %v1827_v57 }
 0x310   : > { %v4990_v29 = vpop.f32.mrf.mxu0 }
 0x311   : > { %v1828_v6 = vmul.f32 %v5024_v27, %v4990_v29 }
 0x313   : > { %v1843_v63 = vadd.f32 %v1842_v62, %v1828_v6 }
 0x337   : > { %v5002_v48 = vpop.f32.mrf.mxu0 }
 0x338   : > { %v1829_v31 = vmul.f32 %v5028_v59, %v5002_v48 }
 0x33a   : > { %v1844_v9 = vadd.f32 %v1843_v63, %v1829_v31 }
 0x33f   : > { %v5018_v50 = vpop.f32.mrf.mxu0 }
 0x340   : > { %v1830_v23 = vmul.f32 %v5032_v7, %v5018_v50 }
 0x342   : > { %v1845_v38 = vadd.f32 %v1844_v9, %v1830_v23 }
 0x35f   : > { %v5034_v33 = vpop.f32.mrf.mxu0 }
 0x360   : > { %v1831_v4 = vmul.f32 %v5040_v24, %v5034_v33 }
 0x362   : > { %v1846_v1 = vadd.f32 %v1845_v38, %v1831_v4 }
 0x367   : > { %v1734_v20 = vpop.f32.mrf.mxu0 }
 0x368   : > { %v1832_v11 = vmul.f32 %v5044_v10, %v1734_v20 }
 0x36a   : > { %v1847_v0 = vadd.f32 %v1846_v1, %v1832_v11 }
 0x36c   : > { %v1848_v34 = vrot.slane %v1847_v0, 4 }
 0x36e   : > { %v1849_v43 = vadd.f32 %v1848_v34, %v1847_v0 }
 0x370   : > { %v1850_v52 = vrot.slane %v1849_v43, 2 }
 0x372   : > { %v1851_v54 = vadd.f32 %v1850_v52, %v1849_v43 }
 0x374   : > { %v1852_v13 = vrot.slane %v1851_v54, 1 }
 0x376   : > { %v1853_v32 = vadd.f32 %v1852_v13, %v1851_v54 }
 0x378   : > { %v1854_v3 = vmul.f32 0.015625, %v1853_v32 }
 0x37a   : > { %v5048_v47 = vsub.f32 %v4954_v5, %v1854_v3  ;;  %v5051_v37 = vsub.f32 %v4956_v12, %v1854_v3  ;;  %v5054_v14 = vsub.f32 %v4958_v16, %v1854_v3  ;;  %v5061_v35 = vsub.f32 %v4960_v17, %v1854_v3 }
 0x37b   : > { %v5064_v41 = vsub.f32 %v4962_v2, %v1854_v3  ;;  %v5069_v16 = vsub.f32 %v4964_v18, %v1854_v3  ;;  %v5074_v56 = vsub.f32 %v4966_v21, %v1854_v3  ;;  %v5079_v58 = vsub.f32 %v4968_v36, %v1854_v3 }
 0x37c   : > { %v1871_v15 = vmul.f32 %v5048_v47, %v4980_v44  ;;  %v1872_v51 = vmul.f32 %v5051_v37, %v4974_v45  ;;  %v1873_v5 = vmul.f32 %v5054_v14, %v4976_v26  ;;  %v1874_v19 = vmul.f32 %v5061_v35, %v4984_v30 }
 0x37d   : > { %v1875_v17 = vmul.f32 %v5064_v41, %v4988_v53  ;;  %v1876_v60 = vmul.f32 %v5069_v16, %v4996_v28  ;;  %v5084_v62 = vsub.f32 %v4970_v22, %v1854_v3  ;;  %v1877_v21 = vmul.f32 %v5074_v56, %v4998_v61 }
 0x37e   : > { %v1887_v12 = vmul.f32 %v1871_v15, %v1871_v15  ;;  %v1888_v55 = vmul.f32 %v1872_v51, %v1872_v51  ;;  %v1889_v57 = vmul.f32 %v1873_v5, %v1873_v5  ;;  %v1890_v6 = vmul.f32 %v1874_v19, %v1874_v19 }
 0x37f   : > { %v1891_v31 = vmul.f32 %v1875_v17, %v1875_v17  ;;  %v5089_v23 = vsub.f32 %v4972_v46, %v1854_v3  ;;  %v1878_v36 = vmul.f32 %v5079_v58, %v5004_v40  ;;  %v1892_v9 = vmul.f32 %v1876_v60, %v1876_v60 }
 0x380   : > { %v1903_v2 = vadd.f32 %v1888_v55, %v1887_v12  ;;  %v5094_v38 = vsub.f32 %v4978_v25, %v1854_v3  ;;  %v1879_v22 = vmul.f32 %v5084_v62, %v5010_v8  ;;  %v1893_v1 = vmul.f32 %v1877_v21, %v1877_v21 }
 0x381   : > { %v5099_v0 = vsub.f32 %v4990_v29, %v1854_v3  ;;  %v1880_v46 = vmul.f32 %v5089_v23, %v5012_v39  ;;  %v1894_v34 = vmul.f32 %v1878_v36, %v1878_v36  ;;  %v5104_v52 = vsub.f32 %v5002_v48, %v1854_v3 }
 0x382   : > { %v1904_v18 = vadd.f32 %v1903_v2, %v1889_v57  ;;  %v1881_v25 = vmul.f32 %v5094_v38, %v5016_v42  ;;  %v1895_v54 = vmul.f32 %v1879_v22, %v1879_v22  ;;  %v5109_v32 = vsub.f32 %v5018_v50, %v1854_v3 }
 0x383   : > { %v1882_v29 = vmul.f32 %v5099_v0, %v5024_v27  ;;  %v1896_v15 = vmul.f32 %v1880_v46, %v1880_v46  ;;  %v5114_v5 = vsub.f32 %v5034_v33, %v1854_v3  ;;  %v1883_v48 = vmul.f32 %v5104_v52, %v5028_v59 }
 0x384   : > { %v1905_v63 = vadd.f32 %v1904_v18, %v1890_v6  ;;  %v1897_v12 = vmul.f32 %v1881_v25, %v1881_v25  ;;  %v5118_v19 = vsub.f32 %v1734_v20, %v1854_v3  ;;  %v1884_v17 = vmul.f32 %v5109_v32, %v5032_v7  ;;  %v3910_v25 = vld [vmem:[%s5974_s2 + $0xb8] sm:$0xff] }
 0x385   : > { %v1898_v50 = vmul.f32 %v1882_v29, %v1882_v29  ;;  %v1885_v2 = vmul.f32 %v5114_v5, %v5040_v24  ;;  %v1899_v60 = vmul.f32 %v1883_v48, %v1883_v48  ;;  %3293 = vmatpush.bf16.msra.mxu3 %v3910_v25  ;;  %v3908_v48 = vld [vmem:[%s5974_s2 + $0xa8] sm:$0xff] }
 0x386   : > { %v1906_v4 = vadd.f32 %v1905_v63, %v1891_v31  ;;  %v1886_v33 = vmul.f32 %v5118_v19, %v5044_v10  ;;  %v1900_v18 = vmul.f32 %v1884_v17, %v1884_v17  ;;  %v3907_v17 = vld [vmem:[%s5974_s2 + $0xa0] sm:$0xff] }
 0x387   : > { %v1901_v31 = vmul.f32 %v1885_v2, %v1885_v2 }
 0x388   : > { %v1907_v11 = vadd.f32 %v1906_v4, %v1892_v9  ;;  %v1902_v36 = vmul.f32 %v1886_v33, %v1886_v33  ;;  %v4124_v9 = vmov 0.0  }
 0x389   : > { %2003 = vst [vmem:[#allocation5 + $0x98] sm:$0xff] %v4124_v9 }
 0x38a   : > { %v1908_v43 = vadd.f32 %v1907_v11, %v1893_v1  ;;  %1984 = vst [vmem:[#allocation5] sm:$0xff] %v4124_v9 }
 0x38b   : > { %1985 = vst [vmem:[#allocation5 + $0x8] sm:$0xff] %v4124_v9 }
 0x38c   : > { %v1909_v13 = vadd.f32 %v1908_v43, %v1894_v34  ;;  %1986 = vst [vmem:[#allocation5 + $0x10] sm:$0xff] %v4124_v9 }
 0x38d   : > { %2004 = vst [vmem:[#allocation5 + $0xa0] sm:$0xff] %v4124_v9 }
 0x38e   : > { %v1910_v51 = vadd.f32 %v1909_v13, %v1895_v54  ;;  %2005 = vst [vmem:[#allocation5 + $0xa8] sm:$0xff] %v4124_v9  ;;  %v3909_v13 = vld [vmem:[%s5974_s2 + $0xb0] sm:$0xff] }
 0x38f   : > { %3294 = vmatpush.bf16.msra.mxu3 %v3909_v13 }
 0x390   : > { %v1911_v55 = vadd.f32 %v1910_v51, %v1896_v15  ;;  %v4126_v51 = vmov 0.0|0.0  }
 0x391   : > { %2122 = vrot.lane.b32.xlu0 %v4126_v51, %s4123_s30  ;;  %2120 = vrot.lane.b32.xlu2 %v4126_v51, %s4123_s30 }
 0x392   : > { %v1912_v57 = vadd.f32 %v1911_v55, %v1897_v12 }
 0x393   : > { %v2185_v29 = vld [vmem:[#allocation5 + $0x9] sm:$0xff]  ;;  %3295 = vmatpush.bf16.msra.mxu3 %v3908_v48 }
 0x394   : > { %v1913_v6 = vadd.f32 %v1912_v57, %v1898_v50  ;;  %v2201_v15 = vpack.c.bf16 %v2185_v29, %v2185_v29  ;;  %v2586_v50 = vld [vmem:[#allocation5 + $0x9f] sm:$0xff] }
 0x395   : > { %v2602_v2 = vpack.c.bf16 %v2586_v50, %v2586_v50 }
 0x396   : > { %v1914_v21 = vadd.f32 %v1913_v6, %v1899_v60  ;;  %2233 = vrot.lane.b32.xlu1 %v2201_v15, %s4125_s11  ;;  %v3906_v6 = vld [vmem:[%s5974_s2 + $0x98] sm:$0xff] }
 0x397   : > { %3296 = vmatpush.bf16.msra.mxu3 %v3907_v17 }
 0x398   : > { %v1915_v63 = vadd.f32 %v1914_v21, %v1900_v18  ;;  %v3905_v21 = vld [vmem:[%s5974_s2 + $0x90] sm:$0xff] }
 0x399   : > { %2759 = vrot.lane.b32.xlu0 %v4126_v51, %s4127_s18  ;;  %2649 = vrot.lane.b32.xlu2 %v2602_v2, %s4125_s11 }
 0x39a   : > { %v1916_v20 = vadd.f32 %v1915_v63, %v1901_v31 }
 0x39b   : > { %3297 = vmatpush.bf16.msra.mxu3 %v3906_v6 }
 0x39c   : > { %v1917_v3 = vadd.f32 %v1916_v20, %v1902_v36 }
 0x39e   : > { %v1918_v4 = vrot.slane %v1917_v3, 4  ;;  %2761 = vrot.lane.b32.xlu1 %v4126_v51, %s4127_s18 }
 0x39f   : > { %3298 = vmatpush.bf16.msra.mxu3 %v3905_v21 }
 0x3a0   : > { %v1919_v22 = vadd.f32 %v1918_v4, %v1917_v3 }
 0x3a2   : > { %v1920_v1 = vrot.slane %v1919_v22, 2 }
 0x3a4   : > { %v1921_v11 = vadd.f32 %v1920_v1, %v1919_v22 }
 0x3a6   : > { %v1922_v46 = vrot.slane %v1921_v11, 1 }
 0x3a8   : > { %v1923_v34 = vadd.f32 %v1922_v46, %v1921_v11  ;;  %v3904_v11 = vld [vmem:[%s5974_s2 + $0x88] sm:$0xff] }
 0x3a9   : > { %3299 = vmatpush.bf16.msra.mxu3 %v3904_v11 }
 0x3aa   : > { %v1924_v43 = vmul.f32 0.015625, %v1923_v34 }
 0x3ac   : > { %v1925_v54 = vadd.f32 1e-05, %v1924_v43 }
 0x3ae   : > { %4101 = vrsqrt.f32 %v1925_v54  ;;  %vm1932_vm12 = vweird.f32 %v1925_v54 }
 0x3b4   : > { %v4102_v12 = vpop.eup %4101 }
 0x3b5   : > { %v1927_v55 = vmul.f32 %v4102_v12, %v1925_v54  ;;  %vm1933_vm11 = vweird.f32 %v4102_v12 }
 0x3b6   : > { %vm1934_vm13 = vmor %vm1932_vm12, %vm1933_vm11 }
 0x3b7   : > { %v1928_v57 = vmul.f32 %v4102_v12, %v1927_v55 }
 0x3b9   : > { %v1929_v60 = vmul.f32 0.5, %v1928_v57 }
 0x3bb   : > { %v1930_v33 = vsub.f32 1.5, %v1929_v60 }
 0x3bd   : > { %v1931_v18 = vmul.f32 %v4102_v12, %v1930_v33 }
 0x3bf   : > { %v1935_v31 = vsel %vm1934_vm13, %v4102_v12, %v1931_v18 }
 0x3c0   : > { %v1939_v63 = vmul.f32 %v1935_v31, %v5061_v35  ;;  %v1940_v36 = vmul.f32 %v1935_v31, %v5064_v41  ;;  %v1941_v20 = vmul.f32 %v1935_v31, %v5069_v16  ;;  %v1942_v3 = vmul.f32 %v1935_v31, %v5074_v56 }
 0x3c1   : > { %v1943_v9 = vmul.f32 %v1935_v31, %v5079_v58  ;;  %v1947_v4 = vmul.f32 %v1935_v31, %v5099_v0  ;;  %v1944_v22 = vmul.f32 %v1935_v31, %v5084_v62  ;;  %v1948_v1 = vmul.f32 %v1935_v31, %v5104_v52  ;;  %v3903_v58 = vld [vmem:[%s5974_s2 + $0x80] sm:$0xff] }
 0x3c2   : > { %v1945_v35 = vmul.f32 %v1935_v31, %v5089_v23  ;;  %v1955_v46 = vmax.f32 %v1939_v63, 0.0  ;;  %v1946_v41 = vmul.f32 %v1935_v31, %v5094_v38  ;;  %v1956_v16 = vmax.f32 %v1940_v36, 0.0  ;;  %3300 = vmatpush.bf16.msra.mxu3 %v3903_v58 }
 0x3c3   : > { %v1957_v34 = vmax.f32 %v1941_v20, 0.0  ;;  %v1958_v56 = vmax.f32 %v1942_v3, 0.0  ;;  %v1959_v62 = vmax.f32 %v1943_v9, 0.0  ;;  %v1949_v0 = vmul.f32 %v1935_v31, %v5109_v32 }
 0x3c4   : > { %v1960_v52 = vmax.f32 %v1944_v22, 0.0  ;;  %v1961_v43 = vmax.f32 %v1945_v35, 0.0  ;;  %v5168_v25 = vmul.f32 %v1955_v46, %v4984_v30  ;;  %v5171_v23 = vmul.f32 %v1956_v16, %v4988_v53 }
 0x3c5   : > { %v5174_v38 = vmul.f32 %v1957_v34, %v4996_v28  ;;  %v1950_v54 = vmul.f32 %v1935_v31, %v5114_v5  ;;  %v1962_v13 = vmax.f32 %v1946_v41, 0.0  ;;  %v5178_v29 = vmul.f32 %v1958_v56, %v4998_v61 }
 0x3c6   : > { %v1951_v32 = vmul.f32 %v1935_v31, %v5118_v19  ;;  %v1963_v15 = vmax.f32 %v1947_v4, 0.0  ;;  %v5182_v51 = vmul.f32 %v1959_v62, %v5004_v40  ;;  %1990 = vst [vmem:[#allocation5 + $0x30] sm:$0xff] %v5168_v25  ;;  %v1938_v48 = vmul.f32 %v1935_v31, %v5054_v14 }
 0x3c7   : > { %v1964_v12 = vmax.f32 %v1948_v1, 0.0  ;;  %v5187_v55 = vmul.f32 %v1960_v52, %v5010_v8  ;;  %1991 = vst [vmem:[#allocation5 + $0x38] sm:$0xff] %v5171_v23  ;;  %v1937_v5 = vmul.f32 %v1935_v31, %v5051_v37  ;;  %v1965_v17 = vmax.f32 %v1949_v0, 0.0 }
 0x3c8   : > { %v5192_v50 = vmul.f32 %v1961_v43, %v5012_v39  ;;  %1992 = vst [vmem:[#allocation5 + $0x40] sm:$0xff] %v5174_v38  ;;  %v1936_v19 = vmul.f32 %v1935_v31, %v5048_v47  ;;  %v1966_v57 = vmax.f32 %v1950_v54, 0.0  ;;  %v5197_v2 = vmul.f32 %v1962_v13, %v5016_v42 }
 0x3c9   : > { %1993 = vst [vmem:[#allocation5 + $0x48] sm:$0xff] %v5178_v29  ;;  %v1967_v14 = vmax.f32 %v1951_v32, 0.0  ;;  %v5201_v60 = vmul.f32 %v1963_v15, %v5024_v27  ;;  %v1954_v37 = vmax.f32 %v1938_v48, 0.0  ;;  %v5205_v6 = vmul.f32 %v1964_v12, %v5028_v59 }
 0x3ca   : > { %1994 = vst [vmem:[#allocation5 + $0x50] sm:$0xff] %v5182_v51  ;;  %v1953_v33 = vmax.f32 %v1937_v5, 0.0  ;;  %v5209_v47 = vmul.f32 %v1965_v17, %v5032_v7  ;;  %v1952_v18 = vmax.f32 %v1936_v19, 0.0  ;;  %v1982_v21 = vmul.f32 %v1966_v57, %v5040_v24 }
 0x3cb   : > { %1995 = vst [vmem:[#allocation5 + $0x58] sm:$0xff] %v5187_v55  ;;  %v1983_v31 = vmul.f32 %v1967_v14, %v5044_v10  ;;  %v1970_v63 = vmul.f32 %v1954_v37, %v4976_v26  ;;  %v5273_v43 = vpack.c.bf16 %v5168_v25, %v5168_v25 }
 0x3cc   : > { %1996 = vst [vmem:[#allocation5 + $0x60] sm:$0xff] %v5192_v50  ;;  %v5220_v36 = vmul.f32 %v1953_v33, %v4974_v45  ;;  %v5223_v20 = vmul.f32 %v1952_v18, %v4980_v44 }
 0x3cd   : > { %1997 = vst [vmem:[#allocation5 + $0x68] sm:$0xff] %v5197_v2  ;;  %v5275_v54 = vpack.c.bf16 %v1970_v63, %v1970_v63 }
 0x3ce   : > { %1998 = vst [vmem:[#allocation5 + $0x70] sm:$0xff] %v5201_v60  ;;  %v2796_v3 = vld [vmem:[#allocation5 + $0x31] sm:$0xff] }
 0x3cf   : > { %1999 = vst [vmem:[#allocation5 + $0x78] sm:$0xff] %v5205_v6  ;;  %v5226_v9 = vpack.c.bf16 %v2796_v3, %v2796_v3  ;;  %v2797_v0 = vld [vmem:[#allocation5 + $0x39] sm:$0xff] }
 0x3d0   : > { %2000 = vst [vmem:[#allocation5 + $0x80] sm:$0xff] %v5209_v47  ;;  %v2798_v32 = vld [vmem:[#allocation5 + $0x41] sm:$0xff]  ;;  %v5289_v25 = vpack.c.bf16 %v2797_v0, %v2797_v0 }
 0x3d1   : > { %2001 = vst [vmem:[#allocation5 + $0x88] sm:$0xff] %v1982_v21  ;;  %v2799_v5 = vld [vmem:[#allocation5 + $0x49] sm:$0xff]  ;;  %v5295_v19 = vpack.c.bf16 %v2798_v32, %v2798_v32  ;;  %v2573_v32 = vld [vmem:[#allocation5 + $0x37] sm:$0xff] }
 0x3d2   : > { %2002 = vst [vmem:[#allocation5 + $0x90] sm:$0xff] %v1983_v31  ;;  %v2800_v17 = vld [vmem:[#allocation5 + $0x51] sm:$0xff]  ;;  %v5298_v14 = vpack.c.bf16 %v2799_v5, %v2799_v5 }
 0x3d3   : > { %1989 = vst [vmem:[#allocation5 + $0x28] sm:$0xff] %v1970_v63  ;;  %v2801_v57 = vld [vmem:[#allocation5 + $0x59] sm:$0xff]  ;;  %v5301_v21 = vpack.c.bf16 %v2800_v17, %v2800_v17 }
 0x3d4   : > { %1988 = vst [vmem:[#allocation5 + $0x20] sm:$0xff] %v5220_v36  ;;  %v2802_v37 = vld [vmem:[#allocation5 + $0x61] sm:$0xff]  ;;  %v5305_v49 = vpack.c.bf16 %v2801_v57, %v2801_v57 }
 0x3d5   : > { %1987 = vst [vmem:[#allocation5 + $0x18] sm:$0xff] %v5223_v20  ;;  %v2803_v31 = vld [vmem:[#allocation5 + $0x69] sm:$0xff]  ;;  %v2416_v57 = vld [vmem:[#allocation5 + $0x40] sm:$0xff] }
 0x3d6   : > { %2828 = vst.msk [vmem:[#allocation4 + $0x14] sm:$0xf] %vm2055_vm15, %v5226_v9  ;;  %v2804_v3 = vld [vmem:[#allocation5 + $0x71] sm:$0xff] }
 0x3d7   : > { %2829 = vst.msk [vmem:[#allocation4 + $0x20] sm:$0xf] %vm2055_vm15, %v5289_v25 }
 0x3d8   : > { %2830 = vst.msk [vmem:[#allocation4 + $0x2c] sm:$0xf] %vm2055_vm15, %v5295_v19 }
 0x3d9   : > { %v2807_v34 = vld [vmem:[#allocation5 + $0x89] sm:$0xff]  ;;  %v2808_v56 = vld [vmem:[#allocation5 + $0x91] sm:$0xff]  ;;  %2831 = vst.msk [vmem:[#allocation4 + $0x38] sm:$0xf] %vm2055_vm15, %v5298_v14 }
 0x3da   : > { %v2795_v4 = vld [vmem:[#allocation5 + $0x29] sm:$0xff]  ;;  %v2823_v52 = vpack.c.bf16 %v2807_v34, %v2807_v34  ;;  %v2824_v15 = vpack.c.bf16 %v2808_v56, %v2808_v56  ;;  %v5313_v34 = vpack.c.bf16 %v2803_v31, %v2803_v31  ;;  %v2806_v56 = vld [vmem:[#allocation5 + $0x81] sm:$0xff]  ;;  %2832 = vst.msk [vmem:[#allocation4 + $0x44] sm:$0xf] %vm2055_vm15, %v5301_v21 }
 0x3db   : > { %v2571_v22 = vld [vmem:[#allocation5 + $0x27] sm:$0xff]  ;;  %v5239_v11 = vpack.c.bf16 %v2795_v4, %v2795_v4  ;;  %v2572_v58 = vld [vmem:[#allocation5 + $0x2f] sm:$0xff]  ;;  %v5309_v4 = vpack.c.bf16 %v2802_v37, %v2802_v37  ;;  %2833 = vst.msk [vmem:[#allocation4 + $0x50] sm:$0xf] %vm2055_vm15, %v5305_v49  ;;  %v2574_v31 = vld [vmem:[#allocation5 + $0x3f] sm:$0xff] }
 0x3dc   : > { %v2460_v1 = vld [vmem:[#allocation5 + $0x21] sm:$0xff]  ;;  %v5243_v35 = vpack.c.bf16 %v2571_v22, %v2571_v22  ;;  %v2459_v41 = vld [vmem:[#allocation5 + $0x19] sm:$0xff]  ;;  %v5279_v48 = vpack.c.bf16 %v2572_v58, %v2572_v58  ;;  %2839 = vst.msk [vmem:[#allocation4 + $0x98] sm:$0xf] %vm2055_vm15, %v2823_v52  ;;  %v2186_v63 = vld [vmem:[#allocation5 + $0x11] sm:$0xff]  ;;  %v5328_v52 = vpack.c.bf16 %v2806_v56, %v2806_v56  ;;  %v5377_v56 = vpack.c.bf16 %v2574_v31, %v2574_v31 }
 0x3dd   : > { %v5245_v46 = vpack.c.bf16 %v2460_v1, %v2460_v1  ;;  %v5249_v16 = vpack.c.bf16 %v2459_v41, %v2459_v41  ;;  %2827 = vst.msk [vmem:[#allocation4 + $0x8] sm:$0xf] %vm2055_vm15, %v5239_v11  ;;  %v3865_v62 = vld [vmem:[#allocation4 + $0x10] sm:$0xf0]  ;;  %v2299_v33 = vld [vmem:[#allocation5 + $0x1f] sm:$0xff]  ;;  %v2202_v58 = vpack.c.bf16 %v2186_v63, %v2186_v63  ;;  %v2417_v37 = vld [vmem:[#allocation5 + $0x48] sm:$0xff] }
 0x3de   : > { %2619 = vrot.lane.b32.xlu1 %v5243_v35, %s4125_s11  ;;  %2840 = vst.msk [vmem:[#allocation4 + $0xa4] sm:$0xf] %vm2055_vm15, %v2824_v15  ;;  %v2298_v18 = vld [vmem:[#allocation5 + $0x17] sm:$0xff]  ;;  %v2315_v1 = vpack.c.bf16 %v2299_v33, %v2299_v33  ;;  %v5338_v15 = vpack.c.bf16 %v5220_v36, %v5220_v36  ;;  %v5352_v36 = vpack.c.bf16 %v5171_v23, %v5171_v23 }
 0x3df   : > { %2509 = vrot.lane.b32.xlu0 %v5245_v46, %s4123_s30  ;;  %2507 = vrot.lane.b32.xlu2 %v5249_v16, %s4123_s30  ;;  %v2805_v22 = vld [vmem:[#allocation5 + $0x79] sm:$0xff]  ;;  %v2314_v41 = vpack.c.bf16 %v2298_v18, %v2298_v18  ;;  %2834 = vst.msk [vmem:[#allocation4 + $0x5c] sm:$0xf] %vm2055_vm15, %v5309_v4  ;;  %v3868_v5 = vld [vmem:[#allocation4 + $0x28] sm:$0xf0]  ;;  %v2432_v23 = vpack.c.bf16 %v2416_v57, %v2416_v57  ;;  %v2418_v18 = vld [vmem:[#allocation5 + $0x50] sm:$0xff] }
 0x3e0   : > { %v5323_v0 = vpack.c.bf16 %v2805_v22, %v2805_v22  ;;  %2835 = vst.msk [vmem:[#allocation4 + $0x68] sm:$0xf] %vm2055_vm15, %v5313_v34  ;;  %v2433_v33 = vpack.c.bf16 %v2417_v37, %v2417_v37  ;;  %v2082_v63 = vld [vmem:[#allocation5 + $0x58] sm:$0xff]  ;;  %v2575_v22 = vld [vmem:[#allocation5 + $0x47] sm:$0xff]  ;;  %v2085_v57 = vld [vmem:[#allocation5 + $0x70] sm:$0xff] }
 0x3e1   : > { %2838 = vst.msk [vmem:[#allocation4 + $0x8c] sm:$0xf] %vm2055_vm15, %v5328_v52 }
 0x3e2   : > { %2837 = vst.msk [vmem:[#allocation4 + $0x80] sm:$0xf] %vm2055_vm15, %v5323_v0 }
 0x3e3   : > { %2444 = vst.msk [vmem:[#allocation4 + $0x10] sm:$0xf] %vm2055_vm15, %v5338_v15 }
 0x3e4   : > { %v3662_v13 = vld [vmem:[#allocation4 + $0x8] sm:$0xf]  ;;  %2445 = vst.msk [vmem:[#allocation4 + $0x1c] sm:$0xf] %vm2055_vm15, %v5275_v54 }
 0x3e5   : > { %v3663_v12 = vor.u32 %v3865_v62, %v3662_v13  ;;  %v5317_v62 = vpack.c.bf16 %v2804_v3, %v2804_v3  ;;  %v5332_v13 = vpack.c.bf16 %v5223_v20, %v5223_v20  ;;  %v5346_v20 = vpack.c.bf16 %v2573_v32, %v2573_v32  ;;  %2058 = vst.msk [vmem:[#allocation4 + $0x18] sm:$0xf] %vm2055_vm15, %v2314_v41 }
 0x3e6   : > { %2733 = vrot.lane.b32.xlu1 %v5273_v43, %s4127_s18  ;;  %2446 = vst.msk [vmem:[#allocation4 + $0x28] sm:$0xf] %vm2055_vm15, %v5273_v43  ;;  %v5374_v3 = vpack.c.bf16 %v5174_v38, %v5174_v38  ;;  %v5379_v32 = vpack.c.bf16 %v2082_v63, %v2082_v63  ;;  %v2084_v38 = vld [vmem:[#allocation5 + $0x68] sm:$0xff] }
 0x3e7   : > { %2731 = vrot.lane.b32.xlu0 %v5275_v54, %s4127_s18  ;;  %2621 = vrot.lane.b32.xlu2 %v5279_v48, %s4125_s11  ;;  %2836 = vst.msk [vmem:[#allocation4 + $0x74] sm:$0xf] %vm2055_vm15, %v5317_v62  ;;  %v5397_v37 = vpack.c.bf16 %v2084_v38, %v2084_v38 }
 0x3e8   : > { %3301 = vmatmul.bf16.vlgmr.msra.gmra.mxu3 %v3663_v12  ;;  %v3674_v12 = vld [vmem:[#allocation4 + $0x20] sm:$0xf]  ;;  %2443 = vst.msk [vmem:[#allocation4 + $0x4] sm:$0xf] %vm2055_vm15, %v5332_v13 }
 0x3e9   : > { %v3675_v17 = vor.u32 %v3868_v5, %v3674_v12  ;;  %2447 = vst.msk [vmem:[#allocation4 + $0x34] sm:$0xf] %vm2055_vm15, %v5352_v36  ;;  %v2576_v12 = vld [vmem:[#allocation5 + $0x4f] sm:$0xff]  ;;  %v2577_v5 = vld [vmem:[#allocation5 + $0x57] sm:$0xff] }
 0x3ea   : > { %2059 = vst.msk [vmem:[#allocation4 + $0x24] sm:$0xf] %vm2055_vm15, %v2315_v1  ;;  %v5401_v31 = vpack.c.bf16 %v2576_v12, %v2576_v12  ;;  %v5405_v63 = vpack.c.bf16 %v2577_v5, %v2577_v5  ;;  %v2579_v12 = vld [vmem:[#allocation5 + $0x67] sm:$0xff] }
 0x3eb   : > { %2060 = vst.msk [vmem:[#allocation4 + $0x30] sm:$0xf] %vm2055_vm15, %v5243_v35  ;;  %v2023_v5 = vld [vmem:[#allocation5 + $0x7] sm:$0xff] }
 0x3ec   : > { %2448 = vst.msk [vmem:[#allocation4 + $0x40] sm:$0xf] %vm2055_vm15, %v2432_v23  ;;  %v2086_v23 = vld [vmem:[#allocation5 + $0x78] sm:$0xff] }
 0x3ed   : > { %2449 = vst.msk [vmem:[#allocation4 + $0x4c] sm:$0xf] %vm2055_vm15, %v2433_v33  ;;  %v3686_v33 = vld [vmem:[#allocation4 + $0x38] sm:$0xf]  ;;  %v5413_v38 = vpack.c.bf16 %v2086_v23, %v2086_v23  ;;  %v2039_v23 = vpack.c.bf16 %v2023_v5, %v2023_v5  ;;  %v2696_v5 = vld [vmem:[#allocation5 + $0x90] sm:$0xff] }
 0x3ee   : > { %2348 = vrot.lane.b32.xlu1 %v2315_v1, %s4127_s18  ;;  %2061 = vst.msk [vmem:[#allocation4 + $0x3c] sm:$0xf] %vm2055_vm15, %v5279_v48  ;;  %v5390_v1 = vpack.c.bf16 %v2575_v22, %v2575_v22  ;;  %v5409_v22 = vpack.c.bf16 %v2085_v57, %v2085_v57  ;;  %v2087_v57 = vld [vmem:[#allocation5 + $0x80] sm:$0xff] }
 0x3ef   : > { %2346 = vrot.lane.b32.xlu0 %v2314_v41, %s4127_s18  ;;  %2235 = vrot.lane.b32.xlu2 %v2202_v58, %s4125_s11  ;;  %v2434_v41 = vpack.c.bf16 %v2418_v18, %v2418_v18  ;;  %v2083_v58 = vld [vmem:[#allocation5 + $0x60] sm:$0xff]  ;;  %2062 = vst.msk [vmem:[#allocation4 + $0x48] sm:$0xf] %vm2055_vm15, %v5346_v20  ;;  %v5436_v10 = vpack.c.bf16 %v2087_v57, %v2087_v57 }
 0x3f0   : > { %2451 = vst.msk [vmem:[#allocation4 + $0x64] sm:$0xf] %vm2055_vm15, %v5379_v32  ;;  %v3871_v18 = vld [vmem:[#allocation4 + $0x40] sm:$0xf0]  ;;  %v5453_v57 = vpack.c.bf16 %v2696_v5, %v2696_v5 }
 0x3f1   : > { %2450 = vst.msk [vmem:[#allocation4 + $0x58] sm:$0xf] %vm2055_vm15, %v2434_v41  ;;  %v3687_v41 = vor.u32 %v3871_v18, %v3686_v33  ;;  %v2580_v18 = vld [vmem:[#allocation5 + $0x6f] sm:$0xff] }
 0x3f2   : > { %2063 = vst.msk [vmem:[#allocation4 + $0x54] sm:$0xf] %vm2055_vm15, %v5377_v56  ;;  %v5441_v24 = vpack.c.bf16 %v2580_v18, %v2580_v18  ;;  %v5483_v18 = vpack.c.bf16 %v5182_v51, %v5182_v51  ;;  %v3902_v51 = vld [vmem:[%s5974_s2 + $0x78] sm:$0xff] }
 0x3f3   : > { %2064 = vst.msk [vmem:[#allocation4 + $0x60] sm:$0xf] %vm2055_vm15, %v5390_v1  ;;  %3244 = vmatpush.bf16.msra.mxu2 %v3902_v51  ;;  %v3891_v51 = vld [vmem:[%s5974_s2 + $0x20] sm:$0xff] }
 0x3f4   : > { %2453 = vst.msk [vmem:[#allocation4 + $0x7c] sm:$0xf] %vm2055_vm15, %v5397_v37 }
 0x3f5   : > { %2065 = vst.msk [vmem:[#allocation4 + $0x6c] sm:$0xf] %vm2055_vm15, %v5401_v31 }
 0x3f6   : > { %2623 = vrot.lane.b32.xlu1 %v5346_v20, %s4125_s11  ;;  %2066 = vst.msk [vmem:[#allocation4 + $0x78] sm:$0xf] %vm2055_vm15, %v5405_v63 }
 0x3f7   : > { %2513 = vrot.lane.b32.xlu0 %v5226_v9, %s4123_s30  ;;  %2511 = vrot.lane.b32.xlu2 %v5239_v11, %s4123_s30  ;;  %2454 = vst.msk [vmem:[#allocation4 + $0x88] sm:$0xf] %vm2055_vm15, %v5409_v22 }
 0x3f8   : > { %3306 = vmatmul.bf16.gmra.mxu3 %v3675_v17  ;;  %v5394_v17 = vpack.c.bf16 %v2083_v58, %v2083_v58  ;;  %v2578_v58 = vld [vmem:[#allocation5 + $0x5f] sm:$0xff]  ;;  %2455 = vst.msk [vmem:[#allocation4 + $0x94] sm:$0xf] %vm2055_vm15, %v5413_v38 }
 0x3f9   : > { %v5427_v33 = vpack.c.bf16 %v2578_v58, %v2578_v58  ;;  %2056 = vst.msk [vmem:[#allocation4] sm:$0xf] %vm2055_vm15, %v2039_v23 }
 0x3fa   : > { %2452 = vst.msk [vmem:[#allocation4 + $0x70] sm:$0xf] %vm2055_vm15, %v5394_v17 }
 0x3fb   : > { %2067 = vst.msk [vmem:[#allocation4 + $0x84] sm:$0xf] %vm2055_vm15, %v5427_v33 }
 0x3fc   : > { %2456 = vst.msk [vmem:[#allocation4 + $0xa0] sm:$0xf] %vm2055_vm15, %v5436_v10 }
 0x3fd   : > { %2069 = vst.msk [vmem:[#allocation4 + $0x9c] sm:$0xf] %vm2055_vm15, %v5441_v24 }
 0x3fe   : > { %2737 = vrot.lane.b32.xlu1 %v5374_v3, %s4127_s18  ;;  %2458 = vst.msk [vmem:[#allocation4 + $0xb8] sm:$0xf] %vm2055_vm15, %v5453_v57 }
 0x3ff   : > { %2735 = vrot.lane.b32.xlu0 %v5352_v36, %s4127_s18  ;;  %2625 = vrot.lane.b32.xlu2 %v5377_v56, %s4125_s11 }
 0x403   : > { %v2123_v5 = vpop.permute.xlu0 %2122 }
 0x406   : > { %2237 = vrot.lane.b32.xlu1 %v5249_v16, %s4125_s11  ;;  %v5431_v16 = vpack.c.bf16 %v2579_v12, %v2579_v12  ;;  %v2582_v12 = vld [vmem:[#allocation5 + $0x7f] sm:$0xff] }
 0x407   : > { %2126 = vrot.lane.b32.xlu0 %v5338_v15, %s4123_s30  ;;  %2124 = vrot.lane.b32.xlu2 %v5332_v13, %s4123_s30  ;;  %v2695_v15 = vld [vmem:[#allocation5 + $0x88] sm:$0xff]  ;;  %v2121_v13 = vpop.permute.xlu2 %2120  ;;  %v5459_v23 = vpack.c.bf16 %v2582_v12, %v2582_v12 }
 0x408   : > { %3311 = vmatmul.bf16.gmra.mxu3 %v3687_v41  ;;  %v2581_v41 = vld [vmem:[#allocation5 + $0x77] sm:$0xff]  ;;  %2169 = vst.msk [vmem:[#allocation4] sm:$0xf] %vm2168_vm0, %v2121_v13  ;;  %v5439_v58 = vpack.c.bf16 %v2695_v15, %v2695_v15  ;;  %v5479_v15 = vpack.c.bf16 %v5178_v29, %v5178_v29  ;;  %v2234_v13 = vpop.permute.xlu1 %2233  ;;  %v3710_v12 = vld [vmem:[#allocation4 + $0x68] sm:$0xf] }
 0x409   : > { %v5445_v7 = vpack.c.bf16 %v2581_v41, %v2581_v41  ;;  %2068 = vst.msk [vmem:[#allocation4 + $0x90] sm:$0xf] %vm2055_vm15, %v5431_v16  ;;  %v2024_v41 = vld [vmem:[#allocation5 + $0xf] sm:$0xff] }
 0x40a   : > { %2457 = vst.msk [vmem:[#allocation4 + $0xac] sm:$0xf] %vm2055_vm15, %v5439_v58  ;;  %v2040_v29 = vpack.c.bf16 %v2024_v41, %v2024_v41  ;;  %v3899_v41 = vld [vmem:[%s5974_s2 + $0x60] sm:$0xff] }
 0x40b   : > { %2070 = vst.msk [vmem:[#allocation4 + $0xa8] sm:$0xf] %vm2055_vm15, %v5445_v7 }
 0x40c   : > { %2071 = vst.msk [vmem:[#allocation4 + $0xb4] sm:$0xf] %vm2055_vm15, %v5459_v23 }
 0x40d   : > { %2282 = vst.msk [vmem:[#allocation4] sm:$0xf] %vm2281_vm1, %v2234_v13  ;;  %v3894_v13 = vld [vmem:[%s5974_s2 + $0x38] sm:$0xff] }
 0x40e   : > { %2352 = vrot.lane.b32.xlu1 %v5279_v48, %s4127_s18  ;;  %v3874_v48 = vld [vmem:[#allocation4 + $0x58] sm:$0xf0]  ;;  %2057 = vst.msk [vmem:[#allocation4 + $0xc] sm:$0xf] %vm2055_vm15, %v2040_v29  ;;  %3195 = vmatpush.bf16.msra.mxu1 %v3894_v13  ;;  %v3722_v29 = vld [vmem:[#allocation4 + $0x80] sm:$0xf] }
 0x40f   : > { %2350 = vrot.lane.b32.xlu0 %v5243_v35, %s4127_s18  ;;  %2239 = vrot.lane.b32.xlu2 %v5245_v46, %s4125_s11  ;;  %v3698_v35 = vld [vmem:[#allocation4 + $0x50] sm:$0xf]  ;;  %2170 = vst.msk [vmem:[#allocation4 + $0xc] sm:$0xf] %vm2168_vm0, %v2123_v5  ;;  %v3890_v13 = vld [vmem:[%s5974_s2 + $0x18] sm:$0xff] }
 0x410   : > { %v3699_v46 = vor.u32 %v3874_v48, %v3698_v35  ;;  %v3877_v35 = vld [vmem:[#allocation4 + $0x70] sm:$0xf0] }
 0x411   : > { %v3711_v48 = vor.u32 %v3877_v35, %v3710_v12  ;;  %v3897_v12 = vld [vmem:[%s5974_s2 + $0x50] sm:$0xff] }
 0x416   : > { %2627 = vrot.lane.b32.xlu1 %v5390_v1, %s4125_s11 }
 0x417   : > { %2517 = vrot.lane.b32.xlu0 %v5295_v19, %s4123_s30  ;;  %2515 = vrot.lane.b32.xlu2 %v5289_v25, %s4123_s30 }
 0x418   : > { %3316 = vmatmul.bf16.gmra.mxu3 %v3699_v46  ;;  %v3901_v46 = vld [vmem:[%s5974_s2 + $0x70] sm:$0xff] }
 0x419   : > { %3245 = vmatpush.bf16.msra.mxu2 %v3901_v46  ;;  %v2706_v46 = vpack.c.bf16 %v5192_v50, %v5192_v50  ;;  %v3895_v50 = vld [vmem:[%s5974_s2 + $0x40] sm:$0xff] }
 0x41e   : > { %2741 = vrot.lane.b32.xlu1 %v5483_v18, %s4127_s18 }
 0x41f   : > { %2739 = vrot.lane.b32.xlu0 %v5479_v15, %s4127_s18  ;;  %2629 = vrot.lane.b32.xlu2 %v5401_v31, %s4125_s11 }
 0x426   : > { %2241 = vrot.lane.b32.xlu1 %v5239_v11, %s4125_s11  ;;  %v5518_v11 = vpop.permute.xlu2 %2649 }
 0x427   : > { %2130 = vrot.lane.b32.xlu0 %v5273_v43, %s4123_s30  ;;  %2128 = vrot.lane.b32.xlu2 %v5275_v54, %s4123_s30  ;;  %v3900_v43 = vld [vmem:[%s5974_s2 + $0x68] sm:$0xff]  ;;  %v3893_v54 = vld [vmem:[%s5974_s2 + $0x30] sm:$0xff] }
 0x428   : > { %3321 = vmatmul.bf16.gmra.mxu3 %v3711_v48  ;;  %3246 = vmatpush.bf16.msra.mxu2 %v3900_v43  ;;  %v2705_v48 = vpack.c.bf16 %v5187_v55, %v5187_v55  ;;  %v3896_v43 = vld [vmem:[%s5974_s2 + $0x48] sm:$0xff]  ;;  %v3889_v55 = vld [vmem:[%s5974_s2 + $0x10] sm:$0xff] }
 0x429   : > { %3196 = vmatpush.bf16.msra.mxu1 %v3893_v54 }
 0x42c   : > { %3247 = vmatpush.bf16.msra.mxu2 %v3899_v41  ;;  %v3734_v41 = vld [vmem:[#allocation4 + $0x98] sm:$0xf] }
 0x42e   : > { %2356 = vrot.lane.b32.xlu1 %v5377_v56, %s4127_s18  ;;  %v3892_v56 = vld [vmem:[%s5974_s2 + $0x28] sm:$0xff] }
 0x42f   : > { %2354 = vrot.lane.b32.xlu0 %v5346_v20, %s4127_s18  ;;  %2243 = vrot.lane.b32.xlu2 %v5226_v9, %s4125_s11  ;;  %v3880_v20 = vld [vmem:[#allocation4 + $0x88] sm:$0xf0] }
 0x430   : > { %v3898_v9 = vld [vmem:[%s5974_s2 + $0x58] sm:$0xff]  ;;  %v3723_v5 = vor.u32 %v3880_v20, %v3722_v29  ;;  %3197 = vmatpush.bf16.msra.mxu1 %v3892_v56  ;;  %v3883_v29 = vld [vmem:[#allocation4 + $0xa0] sm:$0xf0]  ;;  %v3888_v20 = vld [vmem:[%s5974_s2 + $0x8] sm:$0xff] }
 0x431   : > { %3248 = vmatpush.bf16.msra.mxu2 %v3898_v9  ;;  %v3735_v56 = vor.u32 %v3883_v29, %v3734_v41  ;;  %v5572_v9 = vpop.permute.xlu1 %2761 }
 0x434   : > { %3198 = vmatpush.bf16.msra.mxu1 %v3891_v51  ;;  %v3887_v51 = vld [vmem:[%s5974_s2] sm:$0xff] }
 0x435   : > { %3249 = vmatpush.bf16.msra.mxu2 %v3897_v12 }
 0x436   : > { %2631 = vrot.lane.b32.xlu1 %v5405_v63, %s4125_s11 }
 0x437   : > { %2521 = vrot.lane.b32.xlu0 %v5301_v21, %s4123_s30  ;;  %2519 = vrot.lane.b32.xlu2 %v5298_v14, %s4123_s30 }
 0x438   : > { %3326 = vmatmul.bf16.gmra.mxu3 %v3723_v5  ;;  %3199 = vmatpush.bf16.msra.mxu1 %v3890_v13  ;;  %v5574_v5 = vpop.permute.xlu0 %2759 }
 0x439   : > { %v2508_v35 = vpop.permute.xlu2 %2507  ;;  %3250 = vmatpush.bf16.msra.mxu2 %v3896_v43 }
 0x43a   : > { %2555 = vst.msk [vmem:[#allocation4 + $0x4] sm:$0xf] %vm2168_vm0, %v2508_v35  ;;  %v2707_v35 = vpack.c.bf16 %v5197_v2, %v5197_v2 }
 0x43c   : > { %3200 = vmatpush.bf16.msra.mxu1 %v3889_v55 }
 0x43d   : > { %3251 = vmatpush.bf16.msra.mxu2 %v3895_v50 }
 0x43e   : > { %2745 = vrot.lane.b32.xlu1 %v2706_v46, %s4127_s18 }
 0x43f   : > { %2743 = vrot.lane.b32.xlu0 %v2705_v48, %s4127_s18  ;;  %2633 = vrot.lane.b32.xlu2 %v5427_v33, %s4125_s11  ;;  %v2708_v48 = vpack.c.bf16 %v5201_v60, %v5201_v60 }
 0x440   : > { %3201 = vmatpush.bf16.msra.mxu1 %v3888_v20 }
 0x441   : > { %v2622_v54 = vpop.permute.xlu2 %2621 }
 0x444   : > { %3202 = vmatpush.bf16.msra.mxu1 %v3887_v51 }
 0x446   : > { %2245 = vrot.lane.b32.xlu1 %v5289_v25, %s4125_s11 }
 0x447   : > { %2134 = vrot.lane.b32.xlu0 %v5374_v3, %s4123_s30  ;;  %2132 = vrot.lane.b32.xlu2 %v5352_v36, %s4123_s30 }
 0x448   : > { %3331 = vmatmul.bf16.gmra.mxu3 %v3735_v56 }
 0x449   : > { %v2236_v12 = vpop.permute.xlu2 %2235 }
 0x44a   : > { %2283 = vst.msk [vmem:[#allocation4 + $0xc] sm:$0xf] %vm2281_vm1, %v2236_v12 }
 0x44e   : > { %2360 = vrot.lane.b32.xlu1 %v5401_v31, %s4127_s18 }
 0x44f   : > { %2358 = vrot.lane.b32.xlu0 %v5390_v1, %s4127_s18  ;;  %2247 = vrot.lane.b32.xlu2 %v5295_v19, %s4125_s11 }
 0x450   : > { %v2620_v25 = vpop.permute.xlu1 %2619 }
 0x451   : > { %v2510_v36 = vpop.permute.xlu0 %2509  ;;  %2667 = vst.msk [vmem:[#allocation4 + $0x4] sm:$0xf] %vm2281_vm1, %v2620_v25  ;;  %v2512_v3 = vpop.permute.xlu2 %2511 }
 0x452   : > { %2556 = vst.msk [vmem:[#allocation4 + $0x10] sm:$0xf] %vm2168_vm0, %v2510_v36  ;;  %v2709_v36 = vpack.c.bf16 %v5205_v6, %v5205_v6 }
 0x453   : > { %2668 = vst.msk [vmem:[#allocation4 + $0x10] sm:$0xf] %vm2281_vm1, %v2622_v54 }
 0x454   : > { %2557 = vst.msk [vmem:[#allocation4 + $0x1c] sm:$0xf] %vm2168_vm0, %v2512_v3  ;;  %v2710_v3 = vpack.c.bf16 %v5209_v47, %v5209_v47 }
 0x456   : > { %2635 = vrot.lane.b32.xlu1 %v5431_v16, %s4125_s11 }
 0x457   : > { %2525 = vrot.lane.b32.xlu0 %v5309_v4, %s4123_s30  ;;  %2523 = vrot.lane.b32.xlu2 %v5305_v49, %s4123_s30 }
 0x458   : > { %v2734_v19 = vpop.permute.xlu1 %2733 }
 0x459   : > { %v2732_v1 = vpop.permute.xlu0 %2731  ;;  %2780 = vst.msk [vmem:[#allocation4 + $0x10] sm:$0xf] %vm2394_vm2, %v2734_v19  ;;  %v2626_v31 = vpop.permute.xlu2 %2625 }
 0x45a   : > { %2779 = vst.msk [vmem:[#allocation4 + $0x4] sm:$0xf] %vm2394_vm2, %v2732_v1 }
 0x45e   : > { %2749 = vrot.lane.b32.xlu1 %v2708_v48, %s4127_s18 }
 0x45f   : > { %2747 = vrot.lane.b32.xlu0 %v2707_v35, %s4127_s18  ;;  %2637 = vrot.lane.b32.xlu2 %v5441_v24, %s4125_s11 }
 0x460   : > { %v2349_v46 = vpop.permute.xlu1 %2348  ;;  %v3656_v43 = vld [vmem:[#allocation4 + $0xc] sm:$0xf0] }
 0x461   : > { %v2347_v13 = vpop.permute.xlu0 %2346  ;;  %2396 = vst.msk [vmem:[#allocation4 + $0xc] sm:$0xf] %vm2394_vm2, %v2349_v46  ;;  %v2125_v55 = vpop.permute.xlu2 %2124  ;;  %v3863_v50 = vld [vmem:[#allocation4 + $0x4] sm:$0xf] }
 0x462   : > { %2395 = vst.msk [vmem:[#allocation4] sm:$0xf] %vm2394_vm2, %v2347_v13  ;;  %v3659_v2 = vor.u32 %v3863_v50, %v3656_v43  ;;  %v2583_v43 = vld [vmem:[#allocation5 + $0x87] sm:$0xff] }
 0x463   : > { %2171 = vst.msk [vmem:[#allocation4 + $0x18] sm:$0xf] %vm2168_vm0, %v2125_v55  ;;  %v5667_v55 = vpack.c.bf16 %v2583_v43, %v2583_v43 }
 0x464   : > { %3252 = vmatmul.bf16.vlgmr.msra.gmra.mxu2 %v3659_v2 }
 0x466   : > { %2249 = vrot.lane.b32.xlu1 %v5298_v14, %s4125_s11 }
 0x467   : > { %2138 = vrot.lane.b32.xlu0 %v5483_v18, %s4123_s30  ;;  %2136 = vrot.lane.b32.xlu2 %v5479_v15, %s4123_s30 }
 0x468   : > { %v2624_v60 = vpop.permute.xlu1 %2623  ;;  %v3864_v41 = vld [vmem:[#allocation4 + $0x8] sm:$0xf0] }
 0x469   : > { %v2514_v54 = vpop.permute.xlu0 %2513  ;;  %2669 = vst.msk [vmem:[#allocation4 + $0x1c] sm:$0xf] %vm2281_vm1, %v2624_v60  ;;  %v2240_v29 = vpop.permute.xlu2 %2239  ;;  %v3654_v20 = vld [vmem:[#allocation4] sm:$0xf] }
 0x46a   : > { %2558 = vst.msk [vmem:[#allocation4 + $0x28] sm:$0xf] %vm2168_vm0, %v2514_v54  ;;  %v3655_v56 = vor.u32 %v3864_v41, %v3654_v20  ;;  %v2584_v54 = vld [vmem:[#allocation5 + $0x8f] sm:$0xff] }
 0x46b   : > { %2670 = vst.msk [vmem:[#allocation4 + $0x28] sm:$0xf] %vm2281_vm1, %v2626_v31  ;;  %v2600_v41 = vpack.c.bf16 %v2584_v54, %v2584_v54 }
 0x46c   : > { %3203 = vmatmul.bf16.vlgmr.msra.gmra.mxu1 %v3655_v56 }
 0x46e   : > { %2364 = vrot.lane.b32.xlu1 %v5427_v33, %s4127_s18 }
 0x46f   : > { %2362 = vrot.lane.b32.xlu0 %v5405_v63, %s4127_s18  ;;  %2251 = vrot.lane.b32.xlu2 %v5301_v21, %s4125_s11 }
 0x470   : > { %v2738_v14 = vpop.permute.xlu1 %2737 }
 0x471   : > { %v2736_v15 = vpop.permute.xlu0 %2735  ;;  %2782 = vst.msk [vmem:[#allocation4 + $0x28] sm:$0xf] %vm2394_vm2, %v2738_v14  ;;  %v2516_v18 = vpop.permute.xlu2 %2515 }
 0x472   : > { %2781 = vst.msk [vmem:[#allocation4 + $0x1c] sm:$0xf] %vm2394_vm2, %v2736_v15 }
 0x473   : > { %2559 = vst.msk [vmem:[#allocation4 + $0x34] sm:$0xf] %vm2168_vm0, %v2516_v18 }
 0x476   : > { %2639 = vrot.lane.b32.xlu1 %v5445_v7, %s4125_s11 }
 0x477   : > { %2529 = vrot.lane.b32.xlu0 %v5317_v62, %s4123_s30  ;;  %2527 = vrot.lane.b32.xlu2 %v5313_v34, %s4123_s30 }
 0x478   : > { %v2238_v21 = vpop.permute.xlu1 %2237  ;;  %v3668_v33 = vld [vmem:[#allocation4 + $0x24] sm:$0xf0] }
 0x479   : > { %v2127_v63 = vpop.permute.xlu0 %2126  ;;  %v2630_v51 = vpop.permute.xlu2 %2629  ;;  %v3866_v12 = vld [vmem:[#allocation4 + $0x1c] sm:$0xf]  ;;  %2284 = vst.msk [vmem:[#allocation4 + $0x18] sm:$0xf] %vm2281_vm1, %v2238_v21  ;;  %v2474_v21 = vld [vmem:[#allocation5 + $0x91] sm:$0xff] }
 0x47a   : > { %2172 = vst.msk [vmem:[#allocation4 + $0x24] sm:$0xf] %vm2168_vm0, %v2127_v63  ;;  %v3671_v25 = vor.u32 %v3866_v12, %v3668_v33  ;;  %v2585_v33 = vld [vmem:[#allocation5 + $0x97] sm:$0xff]  ;;  %v2490_v12 = vpack.c.bf16 %v2474_v21, %v2474_v21 }
 0x47b   : > { %2285 = vst.msk [vmem:[#allocation4 + $0x24] sm:$0xf] %vm2281_vm1, %v2240_v29 }
 0x47c   : > { %3257 = vmatmul.bf16.gmra.mxu2 %v3671_v25 }
 0x47e   : > { %2753 = vrot.lane.b32.xlu1 %v2710_v3, %s4127_s18 }
 0x47f   : > { %2751 = vrot.lane.b32.xlu0 %v2709_v36, %s4127_s18  ;;  %2641 = vrot.lane.b32.xlu2 %v5459_v23, %s4125_s11 }
 0x480   : > { %v2353_v1 = vpop.permute.xlu1 %2352 }
 0x481   : > { %v2351_v19 = vpop.permute.xlu0 %2350  ;;  %v2129_v31 = vpop.permute.xlu2 %2128  ;;  %2398 = vst.msk [vmem:[#allocation4 + $0x24] sm:$0xf] %vm2394_vm2, %v2353_v1 }
 0x482   : > { %2397 = vst.msk [vmem:[#allocation4 + $0x18] sm:$0xf] %vm2394_vm2, %v2351_v19 }
 0x483   : > { %2173 = vst.msk [vmem:[#allocation4 + $0x30] sm:$0xf] %vm2168_vm0, %v2129_v31 }
 0x486   : > { %2253 = vrot.lane.b32.xlu1 %v5305_v49, %s4125_s11 }
 0x487   : > { %2142 = vrot.lane.b32.xlu0 %v5394_v17, %s4123_s30  ;;  %2140 = vrot.lane.b32.xlu2 %v5379_v32, %s4123_s30 }
 0x488   : > { %v2628_v47 = vpop.permute.xlu1 %2627  ;;  %v3867_v46 = vld [vmem:[#allocation4 + $0x20] sm:$0xf0] }
 0x489   : > { %v2518_v6 = vpop.permute.xlu0 %2517  ;;  %v3666_v35 = vld [vmem:[#allocation4 + $0x18] sm:$0xf]  ;;  %v2244_v48 = vpop.permute.xlu2 %2243  ;;  %2671 = vst.msk [vmem:[#allocation4 + $0x34] sm:$0xf] %vm2281_vm1, %v2628_v47 }
 0x48a   : > { %2560 = vst.msk [vmem:[#allocation4 + $0x40] sm:$0xf] %vm2168_vm0, %v2518_v6  ;;  %v3667_v13 = vor.u32 %v3867_v46, %v3666_v35 }
 0x48b   : > { %2672 = vst.msk [vmem:[#allocation4 + $0x40] sm:$0xf] %vm2281_vm1, %v2630_v51  ;;  %v2473_v51 = vld [vmem:[#allocation5 + $0x89] sm:$0xff] }
 0x48c   : > { %3208 = vmatmul.bf16.gmra.mxu1 %v3667_v13  ;;  %v2489_v25 = vpack.c.bf16 %v2473_v51, %v2473_v51 }
 0x48e   : > { %2368 = vrot.lane.b32.xlu1 %v5441_v24, %s4127_s18 }
 0x48f   : > { %2366 = vrot.lane.b32.xlu0 %v5431_v16, %s4127_s18  ;;  %2255 = vrot.lane.b32.xlu2 %v5309_v4, %s4125_s11 }
 0x490   : > { %v2742_v32 = vpop.permute.xlu1 %2741 }
 0x491   : > { %v2740_v49 = vpop.permute.xlu0 %2739  ;;  %v2520_v17 = vpop.permute.xlu2 %2519  ;;  %2784 = vst.msk [vmem:[#allocation4 + $0x40] sm:$0xf] %vm2394_vm2, %v2742_v32 }
 0x492   : > { %2783 = vst.msk [vmem:[#allocation4 + $0x34] sm:$0xf] %vm2394_vm2, %v2740_v49 }
 0x493   : > { %2561 = vst.msk [vmem:[#allocation4 + $0x4c] sm:$0xf] %vm2168_vm0, %v2520_v17 }
 0x496   : > { %2643 = vrot.lane.b32.xlu1 %v5667_v55, %s4125_s11 }
 0x497   : > { %2533 = vrot.lane.b32.xlu0 %v5328_v52, %s4123_s30  ;;  %2531 = vrot.lane.b32.xlu2 %v5323_v0, %s4123_s30 }
 0x498   : > { %v2242_v4 = vpop.permute.xlu1 %2241  ;;  %v3680_v2 = vld [vmem:[#allocation4 + $0x3c] sm:$0xf0] }
 0x499   : > { %v2131_v24 = vpop.permute.xlu0 %2130  ;;  %v3869_v16 = vld [vmem:[#allocation4 + $0x34] sm:$0xf]  ;;  %v2634_v50 = vpop.permute.xlu2 %2633  ;;  %2286 = vst.msk [vmem:[#allocation4 + $0x30] sm:$0xf] %vm2281_vm1, %v2242_v4 }
 0x49a   : > { %2174 = vst.msk [vmem:[#allocation4 + $0x3c] sm:$0xf] %vm2168_vm0, %v2131_v24  ;;  %v3683_v60 = vor.u32 %v3869_v16, %v3680_v2 }
 0x49b   : > { %2287 = vst.msk [vmem:[#allocation4 + $0x3c] sm:$0xf] %vm2281_vm1, %v2244_v48 }
 0x49c   : > { %3262 = vmatmul.bf16.gmra.mxu2 %v3683_v60  ;;  %v3302_v60 = vpop.f32.mrf.mxu3 }
 0x49e   : > { %2757 = vrot.lane.b32.xlu1 %v5453_v57, %s4127_s18 }
 0x49f   : > { %2755 = vrot.lane.b32.xlu0 %v5439_v58, %s4127_s18  ;;  %2645 = vrot.lane.b32.xlu2 %v2600_v41, %s4125_s11 }
 0x4a0   : > { %v2357_v20 = vpop.permute.xlu1 %2356 }
 0x4a1   : > { %v2355_v29 = vpop.permute.xlu0 %2354  ;;  %v2133_v56 = vpop.permute.xlu2 %2132  ;;  %2400 = vst.msk [vmem:[#allocation4 + $0x3c] sm:$0xf] %vm2394_vm2, %v2357_v20 }
 0x4a2   : > { %2399 = vst.msk [vmem:[#allocation4 + $0x30] sm:$0xf] %vm2394_vm2, %v2355_v29 }
 0x4a3   : > { %2175 = vst.msk [vmem:[#allocation4 + $0x48] sm:$0xf] %vm2168_vm0, %v2133_v56 }
 0x4a4   : > { %v3304_v51 = vpop.f32.mrf.mxu3 }
 0x4a6   : > { %2257 = vrot.lane.b32.xlu1 %v5313_v34, %s4125_s11 }
 0x4a7   : > { %2146 = vrot.lane.b32.xlu0 %v5409_v22, %s4123_s30  ;;  %2144 = vrot.lane.b32.xlu2 %v5397_v37, %s4123_s30 }
 0x4a8   : > { %v2632_v57 = vpop.permute.xlu1 %2631  ;;  %v3870_v18 = vld [vmem:[#allocation4 + $0x38] sm:$0xf0] }
 0x4a9   : > { %v2522_v58 = vpop.permute.xlu0 %2521  ;;  %v3678_v14 = vld [vmem:[#allocation4 + $0x30] sm:$0xf]  ;;  %v2248_v15 = vpop.permute.xlu2 %2247  ;;  %2673 = vst.msk [vmem:[#allocation4 + $0x4c] sm:$0xf] %vm2281_vm1, %v2632_v57 }
 0x4aa   : > { %2562 = vst.msk [vmem:[#allocation4 + $0x58] sm:$0xf] %vm2168_vm0, %v2522_v58  ;;  %v3679_v63 = vor.u32 %v3870_v18, %v3678_v14 }
 0x4ab   : > { %2674 = vst.msk [vmem:[#allocation4 + $0x58] sm:$0xf] %vm2281_vm1, %v2634_v50 }
 0x4ac   : > { %3213 = vmatmul.bf16.gmra.mxu1 %v3679_v63 }
 0x4ae   : > { %2372 = vrot.lane.b32.xlu1 %v5459_v23, %s4127_s18 }
 0x4af   : > { %2370 = vrot.lane.b32.xlu0 %v5445_v7, %s4127_s18  ;;  %2259 = vrot.lane.b32.xlu2 %v5317_v62, %s4125_s11  ;;  %v2601_v7 = vpack.c.bf16 %v2585_v33, %v2585_v33 }
 0x4b0   : > { %v2746_v37 = vpop.permute.xlu1 %2745 }
 0x4b1   : > { %v2744_v34 = vpop.permute.xlu0 %2743  ;;  %v2524_v22 = vpop.permute.xlu2 %2523  ;;  %2786 = vst.msk [vmem:[#allocation4 + $0x58] sm:$0xf] %vm2394_vm2, %v2746_v37 }
 0x4b2   : > { %2785 = vst.msk [vmem:[#allocation4 + $0x4c] sm:$0xf] %vm2394_vm2, %v2744_v34 }
 0x4b3   : > { %2563 = vst.msk [vmem:[#allocation4 + $0x64] sm:$0xf] %vm2168_vm0, %v2524_v22 }
 0x4b6   : > { %2647 = vrot.lane.b32.xlu1 %v2601_v7, %s4125_s11 }
 0x4b7   : > { %2537 = vrot.lane.b32.xlu0 %v2490_v12, %s4123_s30  ;;  %2535 = vrot.lane.b32.xlu2 %v2489_v25, %s4123_s30 }
 0x4b8   : > { %v2246_v23 = vpop.permute.xlu1 %2245  ;;  %v3692_v19 = vld [vmem:[#allocation4 + $0x54] sm:$0xf0] }
 0x4b9   : > { %v2135_v62 = vpop.permute.xlu0 %2134  ;;  %v3872_v36 = vld [vmem:[#allocation4 + $0x4c] sm:$0xf]  ;;  %v2638_v3 = vpop.permute.xlu2 %2637  ;;  %2288 = vst.msk [vmem:[#allocation4 + $0x48] sm:$0xf] %vm2281_vm1, %v2246_v23 }
 0x4ba   : > { %2176 = vst.msk [vmem:[#allocation4 + $0x54] sm:$0xf] %vm2168_vm0, %v2135_v62  ;;  %v3695_v1 = vor.u32 %v3872_v36, %v3692_v19 }
 0x4bb   : > { %2289 = vst.msk [vmem:[#allocation4 + $0x54] sm:$0xf] %vm2281_vm1, %v2248_v15 }
 0x4bc   : > { %3267 = vmatmul.bf16.gmra.mxu2 %v3695_v1 }
 0x4be   : > { %2261 = vrot.lane.b32.xlu1 %v5323_v0, %s4125_s11 }
 0x4bf   : > { %2150 = vrot.lane.b32.xlu0 %v5436_v10, %s4123_s30  ;;  %2148 = vrot.lane.b32.xlu2 %v5413_v38, %s4123_s30  ;;  %s3846_s30 = sshll.u32 %s5990_s16, 7 }
 0x4c0   : > { %v2361_v6 = vpop.permute.xlu1 %2360  ;;  %s5928_s14 = scalar_lea.vmem %s5976_s4, %s3846_s30 }
 0x4c1   : > { %v2359_v31 = vpop.permute.xlu0 %2358  ;;  %v2137_v47 = vpop.permute.xlu2 %2136  ;;  %2402 = vst.msk [vmem:[#allocation4 + $0x54] sm:$0xf] %vm2394_vm2, %v2361_v6 }
 0x4c2   : > { %2401 = vst.msk [vmem:[#allocation4 + $0x48] sm:$0xf] %vm2394_vm2, %v2359_v31 }
 0x4c3   : > { %2177 = vst.msk [vmem:[#allocation4 + $0x60] sm:$0xf] %vm2168_vm0, %v2137_v47 }
 0x4c6   : > { %2376 = vrot.lane.b32.xlu1 %v2600_v41, %s4127_s18 }
 0x4c7   : > { %2374 = vrot.lane.b32.xlu0 %v5667_v55, %s4127_s18  ;;  %2263 = vrot.lane.b32.xlu2 %v5328_v52, %s4125_s11 }
 0x4c8   : > { %v2636_v0 = vpop.permute.xlu1 %2635  ;;  %v3873_v48 = vld [vmem:[#allocation4 + $0x50] sm:$0xf0] }
 0x4c9   : > { %v2526_v10 = vpop.permute.xlu0 %2525  ;;  %v3690_v38 = vld [vmem:[#allocation4 + $0x48] sm:$0xf]  ;;  %v2252_v35 = vpop.permute.xlu2 %2251  ;;  %2675 = vst.msk [vmem:[#allocation4 + $0x64] sm:$0xf] %vm2281_vm1, %v2636_v0 }
 0x4ca   : > { %2564 = vst.msk [vmem:[#allocation4 + $0x70] sm:$0xf] %vm2168_vm0, %v2526_v10  ;;  %v3691_v46 = vor.u32 %v3873_v48, %v3690_v38  ;;  %v3307_v38 = vpop.f32.mrf.mxu3 }
 0x4cb   : > { %2676 = vst.msk [vmem:[#allocation4 + $0x70] sm:$0xf] %vm2281_vm1, %v2638_v3 }
 0x4cc   : > { %3218 = vmatmul.bf16.gmra.mxu1 %v3691_v46 }
 0x4d0   : > { %v2750_v49 = vpop.permute.xlu1 %2749 }
 0x4d1   : > { %v2748_v13 = vpop.permute.xlu0 %2747  ;;  %v2528_v32 = vpop.permute.xlu2 %2527  ;;  %2788 = vst.msk [vmem:[#allocation4 + $0x70] sm:$0xf] %vm2394_vm2, %v2750_v49 }
 0x4d2   : > { %2787 = vst.msk [vmem:[#allocation4 + $0x64] sm:$0xf] %vm2394_vm2, %v2748_v13 }
 0x4d3   : > { %2565 = vst.msk [vmem:[#allocation4 + $0x7c] sm:$0xf] %vm2168_vm0, %v2528_v32 }
 0x4d8   : > { %v2250_v17 = vpop.permute.xlu1 %2249  ;;  %v3704_v24 = vld [vmem:[#allocation4 + $0x6c] sm:$0xf0] }
 0x4d9   : > { %v2139_v52 = vpop.permute.xlu0 %2138  ;;  %v3875_v43 = vld [vmem:[#allocation4 + $0x64] sm:$0xf]  ;;  %v2642_v55 = vpop.permute.xlu2 %2641  ;;  %2290 = vst.msk [vmem:[#allocation4 + $0x60] sm:$0xf] %vm2281_vm1, %v2250_v17 }
 0x4da   : > { %2178 = vst.msk [vmem:[#allocation4 + $0x6c] sm:$0xf] %vm2168_vm0, %v2139_v52  ;;  %v3707_v4 = vor.u32 %v3875_v43, %v3704_v24 }
 0x4db   : > { %2291 = vst.msk [vmem:[#allocation4 + $0x6c] sm:$0xf] %vm2281_vm1, %v2252_v35 }
 0x4dc   : > { %3272 = vmatmul.bf16.gmra.mxu2 %v3707_v4 }
 0x4e0   : > { %v2365_v50 = vpop.permute.xlu1 %2364 }
 0x4e1   : > { %v2363_v16 = vpop.permute.xlu0 %2362  ;;  %v2141_v2 = vpop.permute.xlu2 %2140  ;;  %2404 = vst.msk [vmem:[#allocation4 + $0x6c] sm:$0xf] %vm2394_vm2, %v2365_v50 }
 0x4e2   : > { %2403 = vst.msk [vmem:[#allocation4 + $0x60] sm:$0xf] %vm2394_vm2, %v2363_v16 }
 0x4e3   : > { %2179 = vst.msk [vmem:[#allocation4 + $0x78] sm:$0xf] %vm2168_vm0, %v2141_v2 }
 0x4e7   : > { %v3253_v54 = vpop.f32.mrf.mxu2 }
 0x4e8   : > { %v2640_v29 = vpop.permute.xlu1 %2639  ;;  %v3876_v57 = vld [vmem:[#allocation4 + $0x68] sm:$0xf0] }
 0x4e9   : > { %v2530_v41 = vpop.permute.xlu0 %2529  ;;  %v3702_v20 = vld [vmem:[#allocation4 + $0x60] sm:$0xf]  ;;  %v3204_v56 = vpop.f32.mrf.mxu1  ;;  %2677 = vst.msk [vmem:[#allocation4 + $0x7c] sm:$0xf] %vm2281_vm1, %v2640_v29 }
 0x4ea   : > { %2566 = vst.msk [vmem:[#allocation4 + $0x88] sm:$0xf] %vm2168_vm0, %v2530_v41  ;;  %v2256_v58 = vpop.permute.xlu2 %2255  ;;  %v3254_v14 = vadd.f32 %v3253_v54, %v3204_v56  ;;  %v3703_v15 = vor.u32 %v3876_v57, %v3702_v20  ;;  %v3309_v41 = vpop.f32.mrf.mxu3 }
 0x4eb   : > { %2678 = vst.msk [vmem:[#allocation4 + $0x88] sm:$0xf] %vm2281_vm1, %v2642_v55 }
 0x4ec   : > { %3223 = vmatmul.bf16.gmra.mxu1 %v3703_v15  ;;  %v5740_v21 = vadd.f32 %v3302_v60, %v3254_v14  ;;  %v2809_v15 = vld [vmem:[#allocation5 + $0x99] sm:$0xff] }
 0x4ee   : > { %v3342_v7 = vmul.f32 %v5740_v21, %v4980_v44 }
 0x4ef   : > { %v3255_v18 = vpop.f32.mrf.mxu2 }
 0x4f0   : > { %v2754_v34 = vpop.permute.xlu1 %2753 }
 0x4f1   : > { %v2752_v63 = vpop.permute.xlu0 %2751  ;;  %v3206_v37 = vpop.f32.mrf.mxu1  ;;  %2790 = vst.msk [vmem:[#allocation4 + $0x88] sm:$0xf] %vm2394_vm2, %v2754_v34 }
 0x4f2   : > { %2789 = vst.msk [vmem:[#allocation4 + $0x7c] sm:$0xf] %vm2394_vm2, %v2752_v63  ;;  %v2532_v22 = vpop.permute.xlu2 %2531  ;;  %v3256_v33 = vadd.f32 %v3255_v18, %v3206_v37  ;;  %v2810_v18 = vld [vmem:[#allocation5 + $0xa1] sm:$0xff]  ;;  %v2825_v37 = vpack.c.bf16 %v2809_v15, %v2809_v15 }
 0x4f3   : > { %2567 = vst.msk [vmem:[#allocation4 + $0x94] sm:$0xf] %vm2168_vm0, %v2532_v22 }
 0x4f4   : > { %v5744_v12 = vadd.f32 %v3304_v51, %v3256_v33  ;;  %v2826_v33 = vpack.c.bf16 %v2810_v18, %v2810_v18  ;;  %2841 = vst.msk [vmem:[#allocation4 + $0xb0] sm:$0xf] %vm2055_vm15, %v2825_v37 }
 0x4f6   : > { %v3343_v25 = vmul.f32 %v5744_v12, %v4974_v45  ;;  %2842 = vst.msk [vmem:[#allocation4 + $0xbc] sm:$0xf] %vm2055_vm15, %v2826_v33 }
 0x4f8   : > { %v3358_v62 = vadd.f32 %v3343_v25, %v3342_v7  ;;  %v2254_v36 = vpop.permute.xlu1 %2253  ;;  %v3716_v1 = vld [vmem:[#allocation4 + $0x84] sm:$0xf0] }
 0x4f9   : > { %v2143_v23 = vpop.permute.xlu0 %2142  ;;  %v3878_v3 = vld [vmem:[#allocation4 + $0x7c] sm:$0xf]  ;;  %2292 = vst.msk [vmem:[#allocation4 + $0x78] sm:$0xf] %vm2281_vm1, %v2254_v36 }
 0x4fa   : > { %2180 = vst.msk [vmem:[#allocation4 + $0x84] sm:$0xf] %vm2168_vm0, %v2143_v23  ;;  %v2646_v19 = vpop.permute.xlu2 %2645  ;;  %v3719_v31 = vor.u32 %v3878_v3, %v3716_v1 }
 0x4fb   : > { %2293 = vst.msk [vmem:[#allocation4 + $0x84] sm:$0xf] %vm2281_vm1, %v2256_v58  ;;  %v3746_v25 = vld [vmem:[#allocation4 + $0xb0] sm:$0xf] }
 0x4fc   : > { %3277 = vmatmul.bf16.gmra.mxu2 %v3719_v31 }
 0x4ff   : > { %v3258_v0 = vpop.f32.mrf.mxu2 }
 0x500   : > { %v2369_v47 = vpop.permute.xlu1 %2368 }
 0x501   : > { %v2367_v6 = vpop.permute.xlu0 %2366  ;;  %2406 = vst.msk [vmem:[#allocation4 + $0x84] sm:$0xf] %vm2394_vm2, %v2369_v47 }
 0x502   : > { %2405 = vst.msk [vmem:[#allocation4 + $0x78] sm:$0xf] %vm2394_vm2, %v2367_v6  ;;  %v2145_v10 = vpop.permute.xlu2 %2144 }
 0x503   : > { %2181 = vst.msk [vmem:[#allocation4 + $0x90] sm:$0xf] %vm2168_vm0, %v2145_v10 }
 0x507   : > { %v3260_v24 = vpop.f32.mrf.mxu2 }
 0x508   : > { %v2644_v48 = vpop.permute.xlu1 %2643  ;;  %v3879_v32 = vld [vmem:[#allocation4 + $0x80] sm:$0xf0] }
 0x509   : > { %v2534_v35 = vpop.permute.xlu0 %2533  ;;  %v3714_v46 = vld [vmem:[#allocation4 + $0x78] sm:$0xf]  ;;  %v3209_v49 = vpop.f32.mrf.mxu1  ;;  %2679 = vst.msk [vmem:[#allocation4 + $0x94] sm:$0xf] %vm2281_vm1, %v2644_v48 }
 0x50a   : > { %2568 = vst.msk [vmem:[#allocation4 + $0xa0] sm:$0xf] %vm2168_vm0, %v2534_v35  ;;  %v2260_v13 = vpop.permute.xlu2 %2259  ;;  %v3259_v52 = vadd.f32 %v3258_v0, %v3209_v49  ;;  %v3715_v17 = vor.u32 %v3879_v32, %v3714_v46  ;;  %v3312_v0 = vpop.f32.mrf.mxu3 }
 0x50b   : > { %2680 = vst.msk [vmem:[#allocation4 + $0xa0] sm:$0xf] %vm2281_vm1, %v2646_v19 }
 0x50c   : > { %v5759_v43 = vadd.f32 %v3307_v38, %v3259_v52  ;;  %3228 = vmatmul.bf16.gmra.mxu1 %v3715_v17 }
 0x50e   : > { %v3344_v55 = vmul.f32 %v5759_v43, %v4976_v26 }
 0x510   : > { %v3359_v4 = vadd.f32 %v3358_v62, %v3344_v55  ;;  %v2758_v50 = vpop.permute.xlu1 %2757  ;;  %v3886_v62 = vld [vmem:[#allocation4 + $0xb8] sm:$0xf0] }
 0x511   : > { %v2756_v16 = vpop.permute.xlu0 %2755  ;;  %v3211_v60 = vpop.f32.mrf.mxu1  ;;  %2792 = vst.msk [vmem:[#allocation4 + $0xa0] sm:$0xf] %vm2394_vm2, %v2758_v50  ;;  %v3747_v23 = vor.u32 %v3886_v62, %v3746_v25 }
 0x512   : > { %2791 = vst.msk [vmem:[#allocation4 + $0x94] sm:$0xf] %vm2394_vm2, %v2756_v16  ;;  %v2536_v2 = vpop.permute.xlu2 %2535  ;;  %v3261_v54 = vadd.f32 %v3260_v24, %v3211_v60 }
 0x513   : > { %2569 = vst.msk [vmem:[#allocation4 + $0xac] sm:$0xf] %vm2168_vm0, %v2536_v2  ;;  %3336 = vmatmul.bf16.gmra.mxu3 %v3747_v23 }
 0x514   : > { %v5766_v29 = vadd.f32 %v3309_v41, %v3261_v54 }
 0x516   : > { %v3345_v20 = vmul.f32 %v5766_v29, %v4984_v30 }
 0x518   : > { %v3360_v56 = vadd.f32 %v3359_v4, %v3345_v20  ;;  %v2258_v57 = vpop.permute.xlu1 %2257  ;;  %v3728_v34 = vld [vmem:[#allocation4 + $0x9c] sm:$0xf0]  ;;  %v3314_v4 = vpop.f32.mrf.mxu3 }
 0x519   : > { %v2147_v58 = vpop.permute.xlu0 %2146  ;;  %v3881_v14 = vld [vmem:[#allocation4 + $0x94] sm:$0xf]  ;;  %2294 = vst.msk [vmem:[#allocation4 + $0x90] sm:$0xf] %vm2281_vm1, %v2258_v57 }
 0x51a   : > { %2182 = vst.msk [vmem:[#allocation4 + $0x9c] sm:$0xf] %vm2168_vm0, %v2147_v58  ;;  %v2149_v63 = vpop.permute.xlu2 %2148  ;;  %v3731_v22 = vor.u32 %v3881_v14, %v3728_v34 }
 0x51b   : > { %2295 = vst.msk [vmem:[#allocation4 + $0x9c] sm:$0xf] %vm2281_vm1, %v2260_v13 }
 0x51c   : > { %2183 = vst.msk [vmem:[#allocation4 + $0xa8] sm:$0xf] %vm2168_vm0, %v2149_v63  ;;  %3282 = vmatmul.bf16.gmra.mxu2 %v3731_v22 }
 0x51f   : > { %v3263_v1 = vpop.f32.mrf.mxu2 }
 0x520   : > { %v2373_v7 = vpop.permute.xlu1 %2372  ;;  %v3317_v2 = vpop.f32.mrf.mxu3 }
 0x521   : > { %v2371_v51 = vpop.permute.xlu0 %2370  ;;  %2408 = vst.msk [vmem:[#allocation4 + $0x9c] sm:$0xf] %vm2394_vm2, %v2373_v7 }
 0x522   : > { %2407 = vst.msk [vmem:[#allocation4 + $0x90] sm:$0xf] %vm2394_vm2, %v2371_v51  ;;  %v2264_v13 = vpop.permute.xlu2 %2263 }
 0x527   : > { %v3265_v16 = vpop.f32.mrf.mxu2 }
 0x528   : > { %v2648_v3 = vpop.permute.xlu1 %2647  ;;  %v3882_v6 = vld [vmem:[#allocation4 + $0x98] sm:$0xf0]  ;;  %v3319_v41 = vpop.f32.mrf.mxu3 }
 0x529   : > { %v2538_v36 = vpop.permute.xlu0 %2537  ;;  %v3726_v19 = vld [vmem:[#allocation4 + $0x90] sm:$0xf]  ;;  %v3214_v31 = vpop.f32.mrf.mxu1  ;;  %2681 = vst.msk [vmem:[#allocation4 + $0xac] sm:$0xf] %vm2281_vm1, %v2648_v3 }
 0x52a   : > { %2570 = vst.msk [vmem:[#allocation4 + $0xb8] sm:$0xf] %vm2168_vm0, %v2538_v36  ;;  %v3264_v47 = vadd.f32 %v3263_v1, %v3214_v31  ;;  %v3727_v10 = vor.u32 %v3882_v6, %v3726_v19 }
 0x52b   : > { %2682 = vst.msk [vmem:[#allocation4 + $0xb8] sm:$0xf] %vm2281_vm1, %v5518_v11 }
 0x52c   : > { %2794 = vst.msk [vmem:[#allocation4 + $0xb8] sm:$0xf] %vm2394_vm2, %v5572_v9  ;;  %v5784_v38 = vadd.f32 %v3312_v0, %v3264_v47  ;;  %3233 = vmatmul.bf16.gmra.mxu1 %v3727_v10 }
 0x52d   : > { %2793 = vst.msk [vmem:[#allocation4 + $0xac] sm:$0xf] %vm2394_vm2, %v5574_v5 }
 0x52e   : > { %v3346_v35 = vmul.f32 %v5784_v38, %v4988_v53 }
 0x530   : > { %v3361_v48 = vadd.f32 %v3360_v56, %v3346_v35  ;;  %v2262_v11 = vpop.permute.xlu1 %2261  ;;  %v3322_v58 = vpop.f32.mrf.mxu3 }
 0x531   : > { %v2151_v46 = vpop.permute.xlu0 %2150  ;;  %2296 = vst.msk [vmem:[#allocation4 + $0xa8] sm:$0xf] %vm2281_vm1, %v2262_v11  ;;  %v3216_v50 = vpop.f32.mrf.mxu1 }
 0x532   : > { %2184 = vst.msk [vmem:[#allocation4 + $0xb4] sm:$0xf] %vm2168_vm0, %v2151_v46  ;;  %v3266_v36 = vadd.f32 %v3265_v16, %v3216_v50 }
 0x533   : > { %2297 = vst.msk [vmem:[#allocation4 + $0xb4] sm:$0xf] %vm2281_vm1, %v2264_v13  ;;  %v3740_v9 = vld [vmem:[#allocation4 + $0xb4] sm:$0xf0] }
 0x534   : > { %v3884_v49 = vld [vmem:[#allocation4 + $0xac] sm:$0xf]  ;;  %v5795_v19 = vadd.f32 %v3314_v4, %v3266_v36  ;;  %v5987_v36 = vld [vmem:[#allocation7_spill] sm:$0xff] }
 0x535   : > { %v3743_v32 = vor.u32 %v3884_v49, %v3740_v9 }
 0x536   : > { %v3347_v10 = vmul.f32 %v5795_v19, %v4996_v28 }
 0x537   : > { %3287 = vmatmul.bf16.gmra.mxu2 %v3743_v32 }
 0x538   : > { %v2377_v17 = vpop.permute.xlu1 %2376  ;;  %v3324_v15 = vpop.f32.mrf.mxu3  ;;  %v3362_v32 = vadd.f32 %v3361_v48, %v3347_v10 }
 0x539   : > { %v2375_v52 = vpop.permute.xlu0 %2374  ;;  %2410 = vst.msk [vmem:[#allocation4 + $0xb4] sm:$0xf] %vm2394_vm2, %v2377_v17 }
 0x53a   : > { %2409 = vst.msk [vmem:[#allocation4 + $0xa8] sm:$0xf] %vm2394_vm2, %v2375_v52 }
 0x53f   : > { %v3268_v60 = vpop.f32.mrf.mxu2 }
 0x540   : > { %v3885_v55 = vld [vmem:[#allocation4 + $0xb0] sm:$0xf0]  ;;  %v3327_v34 = vpop.f32.mrf.mxu3 }
 0x541   : > { %v3738_v5 = vld [vmem:[#allocation4 + $0xa8] sm:$0xf] }
 0x542   : > { %v3739_v24 = vor.u32 %v3885_v55, %v3738_v5 }
 0x544   : > { %3238 = vmatmul.bf16.gmra.mxu1 %v3739_v24 }
 0x547   : > { %v3270_v20 = vpop.f32.mrf.mxu2 }
 0x548   : > { %v3329_v33 = vpop.f32.mrf.mxu3 }
 0x549   : > { %v3219_v54 = vpop.f32.mrf.mxu1 }
 0x54a   : > { %v3269_v3 = vadd.f32 %v3268_v60, %v3219_v54 }
 0x54c   : > { %v5797_v31 = vadd.f32 %v3317_v2, %v3269_v3 }
 0x54e   : > { %v3348_v13 = vmul.f32 %v5797_v31, %v4998_v61 }
 0x550   : > { %v3332_v62 = vpop.f32.mrf.mxu3  ;;  %v3363_v55 = vadd.f32 %v3362_v32, %v3348_v13 }
 0x551   : > { %v3221_v56 = vpop.f32.mrf.mxu1 }
 0x552   : > { %v3271_v1 = vadd.f32 %v3270_v20, %v3221_v56 }
 0x554   : > { %v5801_v0 = vadd.f32 %v3319_v41, %v3271_v1 }
 0x556   : > { %v3349_v52 = vmul.f32 %v5801_v0, %v5004_v40 }
 0x558   : > { %v3334_v46 = vpop.f32.mrf.mxu3  ;;  %v3364_v2 = vadd.f32 %v3363_v55, %v3349_v52 }
 0x55f   : > { %v3273_v57 = vpop.f32.mrf.mxu2 }
 0x567   : > { %v3275_v18 = vpop.f32.mrf.mxu2 }
 0x569   : > { %v3224_v14 = vpop.f32.mrf.mxu1 }
 0x56a   : > { %v3274_v6 = vadd.f32 %v3273_v57, %v3224_v14 }
 0x56c   : > { %v5805_v9 = vadd.f32 %v3322_v58, %v3274_v6 }
 0x56e   : > { %v3350_v24 = vmul.f32 %v5805_v9, %v5010_v8 }
 0x570   : > { %v3365_v56 = vadd.f32 %v3364_v2, %v3350_v24 }
 0x571   : > { %v3226_v63 = vpop.f32.mrf.mxu1 }
 0x572   : > { %v3276_v35 = vadd.f32 %v3275_v18, %v3226_v63 }
 0x574   : > { %v5809_v17 = vadd.f32 %v3324_v15, %v3276_v35 }
 0x576   : > { %v3351_v60 = vmul.f32 %v5809_v17, %v5012_v39 }
 0x578   : > { %v3366_v15 = vadd.f32 %v3365_v56, %v3351_v60 }
 0x57f   : > { %v3278_v37 = vpop.f32.mrf.mxu2 }
 0x587   : > { %v3280_v51 = vpop.f32.mrf.mxu2 }
 0x589   : > { %v3229_v22 = vpop.f32.mrf.mxu1 }
 0x58a   : > { %v3279_v49 = vadd.f32 %v3278_v37, %v3229_v22 }
 0x58c   : > { %v5813_v4 = vadd.f32 %v3327_v34, %v3279_v49 }
 0x58e   : > { %v3352_v58 = vmul.f32 %v5813_v4, %v5016_v42 }
 0x590   : > { %v3367_v34 = vadd.f32 %v3366_v15, %v3352_v58 }
 0x591   : > { %v3231_v7 = vpop.f32.mrf.mxu1 }
 0x592   : > { %v3281_v5 = vadd.f32 %v3280_v51, %v3231_v7  ;;  %v5986_v51 = vld [vmem:[#allocation6_spill] sm:$0xff] }
 0x594   : > { %v5817_v54 = vadd.f32 %v3329_v33, %v3281_v5 }
 0x596   : > { %v3337_v41 = vpop.f32.mrf.mxu3  ;;  %v3353_v18 = vmul.f32 %v5817_v54, %v5024_v27 }
 0x598   : > { %v3368_v33 = vadd.f32 %v3367_v34, %v3353_v18 }
 0x59e   : > { %v3339_v6 = vpop.f32.mrf.mxu3 }
 0x59f   : > { %v3283_v25 = vpop.f32.mrf.mxu2 }
 0x5a7   : > { %v3285_v47 = vpop.f32.mrf.mxu2 }
 0x5a9   : > { %v3234_v23 = vpop.f32.mrf.mxu1 }
 0x5aa   : > { %v3284_v16 = vadd.f32 %v3283_v25, %v3234_v23 }
 0x5ac   : > { %v5821_v57 = vadd.f32 %v3332_v62, %v3284_v16 }
 0x5ae   : > { %v3354_v37 = vmul.f32 %v5821_v57, %v5028_v59 }
 0x5b0   : > { %v3369_v23 = vadd.f32 %v3368_v33, %v3354_v37 }
 0x5b1   : > { %v3236_v11 = vpop.f32.mrf.mxu1 }
 0x5b2   : > { %v3286_v48 = vadd.f32 %v3285_v47, %v3236_v11 }
 0x5b4   : > { %v5825_v63 = vadd.f32 %v3334_v46, %v3286_v48  ;;  %v5988_v46 = vld [vmem:[#allocation8_spill] sm:$0xff] }
 0x5b6   : > { %v3355_v7 = vmul.f32 %v5825_v63, %v5986_v51 }
 0x5b8   : > { %v3370_v47 = vadd.f32 %v3369_v23, %v3355_v7 }
 0x5ba   : > { %v3288_v50 = vpop.f32.mrf.mxu2 }
 0x5c1   : > { %v3239_v20 = vpop.f32.mrf.mxu1 }
 0x5c2   : > { %v3289_v14 = vadd.f32 %v3288_v50, %v3239_v20  ;;  %v3290_v25 = vpop.f32.mrf.mxu2 }
 0x5c4   : > { %v5829_v22 = vadd.f32 %v3337_v41, %v3289_v14 }
 0x5c6   : > { %v3356_v3 = vmul.f32 %v5829_v22, %v5987_v36 }
 0x5c8   : > { %v3371_v35 = vadd.f32 %v3370_v47, %v3356_v3 }
 0x5c9   : > { %v3241_v62 = vpop.f32.mrf.mxu1 }
 0x5ca   : > { %v3291_v1 = vadd.f32 %v3290_v25, %v3241_v62 }
 0x5cc   : > { %v3340_v10 = vadd.f32 %v3339_v6, %v3291_v1 }
 0x5ce   : > { %v3357_v11 = vmul.f32 %v3340_v10, %v5988_v46 }
 0x5d0   : > { %v3372_v13 = vadd.f32 %v3371_v35, %v3357_v11 }
 0x5d2   : > { %v3373_v49 = vrot.slane %v3372_v13, 4 }
 0x5d4   : > { %v3374_v32 = vadd.f32 %v3373_v49, %v3372_v13 }
 0x5d6   : > { %v3375_v52 = vrot.slane %v3374_v32, 2 }
 0x5d8   : > { %v3376_v5 = vadd.f32 %v3375_v52, %v3374_v32 }
 0x5da   : > { %v3377_v55 = vrot.slane %v3376_v5, 1 }
 0x5dc   : > { %v3378_v24 = vadd.f32 %v3377_v55, %v3376_v5 }
 0x5de   : > { %v3379_v16 = vmul.f32 0.015625, %v3378_v24 }
 0x5e0   : > { %v5837_v50 = vsub.f32 %v5740_v21, %v3379_v16  ;;  %v5840_v2 = vsub.f32 %v5744_v12, %v3379_v16  ;;  %v5843_v60 = vsub.f32 %v5759_v43, %v3379_v16  ;;  %v5846_v48 = vsub.f32 %v5766_v29, %v3379_v16 }
 0x5e1   : > { %v5849_v41 = vsub.f32 %v5784_v38, %v3379_v16  ;;  %v5858_v43 = vsub.f32 %v5795_v19, %v3379_v16  ;;  %v5863_v38 = vsub.f32 %v5797_v31, %v3379_v16  ;;  %v5868_v34 = vsub.f32 %v5801_v0, %v3379_v16 }
 0x5e2   : > { %v3396_v20 = vmul.f32 %v5837_v50, %v4980_v44  ;;  %v3397_v56 = vmul.f32 %v5840_v2, %v4974_v45  ;;  %v3398_v21 = vmul.f32 %v5843_v60, %v4976_v26  ;;  %v3399_v29 = vmul.f32 %v5846_v48, %v4984_v30 }
 0x5e3   : > { %v3400_v14 = vmul.f32 %v5849_v41, %v4988_v53  ;;  %v3401_v37 = vmul.f32 %v5858_v43, %v4996_v28  ;;  %v5873_v7 = vsub.f32 %v5805_v9, %v3379_v16  ;;  %v3402_v31 = vmul.f32 %v5863_v38, %v4998_v61 }
 0x5e4   : > { %v3412_v12 = vmul.f32 %v3396_v20, %v3396_v20  ;;  %v3413_v58 = vmul.f32 %v3397_v56, %v3397_v56  ;;  %v3414_v15 = vmul.f32 %v3398_v21, %v3398_v21  ;;  %v3415_v33 = vmul.f32 %v3399_v29, %v3399_v29 }
 0x5e5   : > { %v3416_v25 = vmul.f32 %v3400_v14, %v3400_v14  ;;  %v5878_v23 = vsub.f32 %v5809_v17, %v3379_v16  ;;  %v3403_v0 = vmul.f32 %v5868_v34, %v5004_v40  ;;  %v3417_v3 = vmul.f32 %v3401_v37, %v3401_v37 }
 0x5e6   : > { %v3428_v18 = vadd.f32 %v3413_v58, %v3412_v12  ;;  %v5883_v6 = vsub.f32 %v5813_v4, %v3379_v16  ;;  %v3404_v9 = vmul.f32 %v5873_v7, %v5010_v8  ;;  %v3418_v47 = vmul.f32 %v3402_v31, %v3402_v31 }
 0x5e7   : > { %v5888_v11 = vsub.f32 %v5817_v54, %v3379_v16  ;;  %v3405_v17 = vmul.f32 %v5878_v23, %v5012_v39  ;;  %v3419_v13 = vmul.f32 %v3403_v0, %v3403_v0  ;;  %v5893_v32 = vsub.f32 %v5821_v57, %v3379_v16 }
 0x5e8   : > { %v3429_v19 = vadd.f32 %v3428_v18, %v3414_v15  ;;  %v3406_v4 = vmul.f32 %v5883_v6, %v5016_v42  ;;  %v3420_v52 = vmul.f32 %v3404_v9, %v3404_v9  ;;  %v5898_v55 = vsub.f32 %v5825_v63, %v3379_v16 }
 0x5e9   : > { %v3407_v54 = vmul.f32 %v5888_v11, %v5024_v27  ;;  %v3421_v24 = vmul.f32 %v3405_v17, %v3405_v17  ;;  %v5903_v56 = vsub.f32 %v5829_v22, %v3379_v16  ;;  %v3408_v57 = vmul.f32 %v5893_v32, %v5028_v59 }
 0x5ea   : > { %v3430_v62 = vadd.f32 %v3429_v19, %v3415_v33  ;;  %v3422_v21 = vmul.f32 %v3406_v4, %v3406_v4  ;;  %v5907_v58 = vsub.f32 %v3340_v10, %v3379_v16  ;;  %v3409_v29 = vmul.f32 %v5898_v55, %v5986_v51 }
 0x5eb   : > { %v3423_v63 = vmul.f32 %v3407_v54, %v3407_v54  ;;  %v3410_v15 = vmul.f32 %v5903_v56, %v5987_v36  ;;  %v3424_v18 = vmul.f32 %v3408_v57, %v3408_v57 }
 0x5ec   : > { %v3431_v1 = vadd.f32 %v3430_v62, %v3416_v25  ;;  %v3411_v22 = vmul.f32 %v5907_v58, %v5988_v46  ;;  %v3425_v33 = vmul.f32 %v3409_v29, %v3409_v29 }
 0x5ed   : > { %v3426_v31 = vmul.f32 %v3410_v15, %v3410_v15 }
 0x5ee   : > { %v3432_v35 = vadd.f32 %v3431_v1, %v3417_v3  ;;  %v3427_v62 = vmul.f32 %v3411_v22, %v3411_v22 }
 0x5f0   : > { %v3433_v49 = vadd.f32 %v3432_v35, %v3418_v47 }
 0x5f2   : > { %v3434_v5 = vadd.f32 %v3433_v49, %v3419_v13 }
 0x5f4   : > { %v3435_v20 = vadd.f32 %v3434_v5, %v3420_v52 }
 0x5f6   : > { %v3436_v12 = vadd.f32 %v3435_v20, %v3421_v24 }
 0x5f8   : > { %v3437_v14 = vadd.f32 %v3436_v12, %v3422_v21 }
 0x5fa   : > { %v3438_v37 = vadd.f32 %v3437_v14, %v3423_v63 }
 0x5fc   : > { %v3439_v19 = vadd.f32 %v3438_v37, %v3424_v18 }
 0x5fe   : > { %v3440_v25 = vadd.f32 %v3439_v19, %v3425_v33 }
 0x600   : > { %v3441_v10 = vadd.f32 %v3440_v25, %v3426_v31 }
 0x602   : > { %v3442_v16 = vadd.f32 %v3441_v10, %v3427_v62 }
 0x604   : > { %v3443_v0 = vrot.slane %v3442_v16, 4 }
 0x606   : > { %v3444_v3 = vadd.f32 %v3443_v0, %v3442_v16 }
 0x608   : > { %v3445_v1 = vrot.slane %v3444_v3, 2 }
 0x60a   : > { %v3446_v9 = vadd.f32 %v3445_v1, %v3444_v3 }
 0x60c   : > { %v3447_v47 = vrot.slane %v3446_v9, 1 }
 0x60e   : > { %v3448_v35 = vadd.f32 %v3447_v47, %v3446_v9 }
 0x610   : > { %v3449_v17 = vmul.f32 0.015625, %v3448_v35 }
 0x612   : > { %v3450_v13 = vadd.f32 1e-05, %v3449_v17 }
 0x614   : > { %4103 = vrsqrt.f32 %v3450_v13  ;;  %vm3457_vm4 = vweird.f32 %v3450_v13 }
 0x61a   : > { %v4104_v49 = vpop.eup %4103 }
 0x61b   : > { %v3452_v4 = vmul.f32 %v4104_v49, %v3450_v13  ;;  %vm3458_vm3 = vweird.f32 %v4104_v49 }
 0x61c   : > { %vm3459_vm5 = vmor %vm3457_vm4, %vm3458_vm3 }
 0x61d   : > { %v3453_v52 = vmul.f32 %v4104_v49, %v3452_v4 }
 0x61f   : > { %v3454_v5 = vmul.f32 0.5, %v3453_v52 }
 0x621   : > { %v3455_v54 = vsub.f32 1.5, %v3454_v5 }
 0x623   : > { %v3456_v24 = vmul.f32 %v4104_v49, %v3455_v54 }
 0x625   : > { %v3460_v20 = vsel %vm3459_vm5, %v4104_v49, %v3456_v24 }
 0x626   : > { %v3461_v57 = vmul.f32 %v3460_v20, %v5837_v50  ;;  %v3462_v21 = vmul.f32 %v3460_v20, %v5840_v2  ;;  %v3463_v12 = vmul.f32 %v3460_v20, %v5843_v60  ;;  %v3464_v29 = vmul.f32 %v3460_v20, %v5846_v48 }
 0x627   : > { %v3467_v63 = vmul.f32 %v3460_v20, %v5863_v38  ;;  %v3468_v14 = vmul.f32 %v3460_v20, %v5868_v34  ;;  %v3465_v15 = vmul.f32 %v3460_v20, %v5849_v41  ;;  %v3466_v18 = vmul.f32 %v3460_v20, %v5858_v43 }
 0x628   : > { %v3477_v37 = vmax.f32 %v3461_v57, 0.0  ;;  %v3478_v22 = vmax.f32 %v3462_v21, 0.0  ;;  %v3479_v33 = vmax.f32 %v3463_v12, 0.0  ;;  %v3480_v19 = vmax.f32 %v3464_v29, 0.0 }
 0x629   : > { %v3469_v50 = vmul.f32 %v3460_v20, %v5873_v7  ;;  %v3481_v2 = vmax.f32 %v3465_v15, 0.0  ;;  %v3470_v60 = vmul.f32 %v3460_v20, %v5878_v23  ;;  %v3471_v48 = vmul.f32 %v3460_v20, %v5883_v6 }
 0x62a   : > { %v3482_v41 = vmax.f32 %v3466_v18, 0.0  ;;  %v3483_v43 = vmax.f32 %v3467_v63, 0.0  ;;  %v3493_v38 = vmul.f32 %v3477_v37, %v4980_v44  ;;  %v3494_v34 = vmul.f32 %v3478_v22, %v4974_v45 }
 0x62b   : > { %v3495_v7 = vmul.f32 %v3479_v33, %v4976_v26  ;;  %v3472_v31 = vmul.f32 %v3460_v20, %v5888_v11  ;;  %v3484_v25 = vmax.f32 %v3468_v14, 0.0  ;;  %v3496_v62 = vmul.f32 %v3480_v19, %v4984_v30 }
 0x62c   : > { %v3473_v23 = vmul.f32 %v3460_v20, %v5893_v32  ;;  %v3485_v10 = vmax.f32 %v3469_v50, 0.0  ;;  %v3497_v6 = vmul.f32 %v3481_v2, %v4988_v53  ;;  %3509 = vst [vmem:[%s5928_s14] sm:$0xff] %v3493_v38  ;;  %v3474_v44 = vmul.f32 %v3460_v20, %v5898_v55 }
 0x62d   : > { %v3486_v16 = vmax.f32 %v3470_v60, 0.0  ;;  %v3498_v45 = vmul.f32 %v3482_v41, %v4996_v28  ;;  %3510 = vst [vmem:[%s5928_s14 + $0x8] sm:$0xff] %v3494_v34  ;;  %v3475_v26 = vmul.f32 %v3460_v20, %v5903_v56  ;;  %v3487_v11 = vmax.f32 %v3471_v48, 0.0 }
 0x62e   : > { %v3499_v30 = vmul.f32 %v3483_v43, %v4998_v61  ;;  %3511 = vst [vmem:[%s5928_s14 + $0x10] sm:$0xff] %v3495_v7  ;;  %v3476_v32 = vmul.f32 %v3460_v20, %v5907_v58  ;;  %v3488_v53 = vmax.f32 %v3472_v31, 0.0  ;;  %v3500_v0 = vmul.f32 %v3484_v25, %v5004_v40 }
 0x62f   : > { %3512 = vst [vmem:[%s5928_s14 + $0x18] sm:$0xff] %v3496_v62  ;;  %v3489_v55 = vmax.f32 %v3473_v23, 0.0  ;;  %v3501_v28 = vmul.f32 %v3485_v10, %v5010_v8  ;;  %v3490_v56 = vmax.f32 %v3474_v44, 0.0  ;;  %v3502_v3 = vmul.f32 %v3486_v16, %v5012_v39 }
 0x630   : > { %3513 = vst [vmem:[%s5928_s14 + $0x20] sm:$0xff] %v3497_v6  ;;  %v3491_v61 = vmax.f32 %v3475_v26, 0.0  ;;  %v3503_v58 = vmul.f32 %v3487_v11, %v5016_v42  ;;  %v3492_v40 = vmax.f32 %v3476_v32, 0.0  ;;  %v3504_v1 = vmul.f32 %v3488_v53, %v5024_v27 }
 0x631   : > { %3514 = vst [vmem:[%s5928_s14 + $0x28] sm:$0xff] %v3498_v45  ;;  %v3505_v8 = vmul.f32 %v3489_v55, %v5028_v59  ;;  %v3506_v9 = vmul.f32 %v3490_v56, %v5986_v51 }
 0x632   : > { %3515 = vst [vmem:[%s5928_s14 + $0x30] sm:$0xff] %v3499_v30  ;;  %v3507_v39 = vmul.f32 %v3491_v61, %v5987_v36  ;;  %v3508_v47 = vmul.f32 %v3492_v40, %v5988_v46 }
 0x633   : > { %3516 = vst [vmem:[%s5928_s14 + $0x38] sm:$0xff] %v3500_v0 }
 0x634   : > { %3517 = vst [vmem:[%s5928_s14 + $0x40] sm:$0xff] %v3501_v28 }
 0x635   : > { %3518 = vst [vmem:[%s5928_s14 + $0x48] sm:$0xff] %v3502_v3 }
 0x636   : > { %3519 = vst [vmem:[%s5928_s14 + $0x50] sm:$0xff] %v3503_v58 }
 0x637   : > { %3520 = vst [vmem:[%s5928_s14 + $0x58] sm:$0xff] %v3504_v1 }
 0x638   : > { %3521 = vst [vmem:[%s5928_s14 + $0x60] sm:$0xff] %v3505_v8 }
 0x639   : > { %3522 = vst [vmem:[%s5928_s14 + $0x68] sm:$0xff] %v3506_v9 }
 0x63a   : > { %3523 = vst [vmem:[%s5928_s14 + $0x70] sm:$0xff] %v3507_v39 }
 0x63b   : > { %3524 = vst [vmem:[%s5928_s14 + $0x78] sm:$0xff] %v3508_v47 }
 0x63c PF: > { %s14_s15 = sadd.s32 1, %s4111_s15  }
 0x63d   : > { %p11_p4 = scmp.ge.s32.totalorder %s14_s15, 4  }
 0x63f   :  { %13 = sbr.rel (!%p11_p4) target bundleno = 1 (0x1), region = 66 }

</bundles_post_ra>
